<compile_context>
chip_gen: v6e
topology: v6e:2x2x1
jax: 0.10.0
libtpu: 0.0.40
codegen_flags: <defaults>
</compile_context>

<pallas_src>
import functools

import jax
import jax.numpy as jnp
from jax import lax
from jax.experimental import pallas as pl
from jax.experimental.pallas import tpu as pltpu


# ----------------------------------------------------------------------------
# In-kernel building blocks
# ----------------------------------------------------------------------------
def _depthwise3x3(u, dw, stride, pad_ref, Ho, Wo):
    """3x3 depthwise conv, padding=1, given stride; computes ONLY strided outputs.

    u:       (H, W, C) f32 value
    dw:      (3, 3, C) f32 taps (BN scale already folded in)
    pad_ref: VMEM scratch (Hp, Wp, C) with Hp = stride*ceil((H+2)/stride), same for Wp.
    """
    H, W, C = u.shape
    Hp, Wp, _ = pad_ref.shape
    # zero-padded copy of u in scratch (no concatenate -> no relayout copies)
    pad_ref[...] = jnp.zeros(pad_ref.shape, jnp.float32)
    pad_ref[1:H + 1, 1:W + 1, :] = u
    vp = pad_ref[...]
    acc = jnp.zeros((Ho, Wo, C), jnp.float32)
    if stride == 1:
        # direct static slices: no reshape, no copies
        for ky in range(3):
            for kx in range(3):
                acc = acc + vp[ky:ky + Ho, kx:kx + Wo, :] * dw[ky, kx, :]
    else:
        # phase decomposition: only the strided output positions are ever computed
        for ky in range(3):
            oy, py = divmod(ky, stride)
            rows = vp.reshape(Hp // stride, stride, Wp, C)[oy:oy + Ho, py, :, :]
            rows = rows.reshape(Ho, Wp // stride, stride, C)
            for kx in range(3):
                ox, px = divmod(kx, stride)
                acc = acc + rows[:, ox:ox + Wo, px, :] * dw[ky, kx, :]
    return acc


def _fused_s1_kernel(H, W, Cb,
                     x_ref, w1_ref, b1_ref, dw_ref, w2i_ref, pev_ref, bi_ref,
                     o_ref, pad_ref):
    """stride == 1: x1 passthrough (even out channels) + branch2(x2) (odd out channels)."""
    oup = 2 * Cb
    x = x_ref[0]                                             # (H, W, 2*Cb)
    x1 = x[:, :, :Cb].astype(jnp.float32).reshape(H * W, Cb)
    x2 = x[:, :, Cb:].astype(jnp.float32).reshape(H * W, Cb)
    # branch2: 1x1 conv (BN scale folded) -> bias -> ReLU
    u = jnp.dot(x2.astype(jnp.bfloat16), w1_ref[...],
                preferred_element_type=jnp.float32)
    u = jnp.maximum(u + b1_ref[...], 0.0).reshape(H, W, Cb)
    # 3x3 depthwise (BN scale folded into taps)
    t = _depthwise3x3(u, dw_ref[...], 1, pad_ref, H, W)
    # final 1x1 conv straight into interleaved (odd) output channels + bias + ReLU
    z = jnp.dot(t.reshape(H * W, Cb).astype(jnp.bfloat16), w2i_ref[...],
                preferred_element_type=jnp.float32)
    z = jnp.maximum(z + bi_ref[...], 0.0)                    # even cols are exactly 0 here
    # exact x1 passthrough into even output channels (0/1 permutation matmul, f32 exact)
    z = z + jnp.dot(x1, pev_ref[...], precision=lax.Precision.HIGHEST,
                    preferred_element_type=jnp.float32)
    o_ref[0] = z.reshape(H, W, oup).astype(o_ref.dtype)


def _fused_sN_kernel(stride, H, W, inp, Cb,
                     x_ref, w1_ref, b1_ref, dw2_ref, w2i_ref,
                     dw1_ref, w1i_ref, bi_ref,
                     o_ref, pad1_ref, pad2_ref):
    """stride > 1: branch1(x) -> even output channels, branch2(x) -> odd output channels."""
    oup = 2 * Cb
    Ho, Wo = H // stride, W // stride
    x = x_ref[0].astype(jnp.float32)                         # (H, W, inp)
    # branch2: 1x1 conv (BN folded) -> ReLU -> dw3x3(stride)
    u = jnp.dot(x.reshape(H * W, inp).astype(jnp.bfloat16), w1_ref[...],
                preferred_element_type=jnp.float32)
    u = jnp.maximum(u + b1_ref[...], 0.0).reshape(H, W, Cb)
    t2 = _depthwise3x3(u, dw2_ref[...], stride, pad2_ref, Ho, Wo)
    # branch1: dw3x3(stride) (BN folded into taps; BN bias propagated into final bias)
    t1 = _depthwise3x3(x, dw1_ref[...], stride, pad1_ref, Ho, Wo)
    # fused final 1x1 convs: branch1 -> even cols, branch2 -> odd cols, shared bias + ReLU
    z = jnp.dot(t2.reshape(Ho * Wo, Cb).astype(jnp.bfloat16), w2i_ref[...],
                preferred_element_type=jnp.float32)
    z = z + jnp.dot(t1.reshape(Ho * Wo, inp).astype(jnp.bfloat16), w1i_ref[...],
                    preferred_element_type=jnp.float32)
    o_ref[0] = jnp.maximum(z + bi_ref[...], 0.0).reshape(Ho, Wo, oup).astype(o_ref.dtype)


def _full_spec(a):
    return pl.BlockSpec(a.shape, lambda n, _nd=a.ndim: (0,) * _nd)


# ----------------------------------------------------------------------------
# Parameters (deterministic, synthetic), BN folding
# ----------------------------------------------------------------------------
def _init_params(key, inp, oup, stride):
    Cb = oup // 2
    cin_b2 = inp if stride > 1 else Cb
    keys = iter(jax.random.split(key, 32))

    def conv(shape):
        return 0.1 * jax.random.normal(next(keys), shape, jnp.float32)

    def bn(c):
        return dict(
            g=1.0 + 0.05 * jax.random.normal(next(keys), (c,), jnp.float32),
            b=0.05 * jax.random.normal(next(keys), (c,), jnp.float32),
            m=0.05 * jax.random.normal(next(keys), (c,), jnp.float32),
            v=0.5 + 0.25 * jnp.abs(jax.random.normal(next(keys), (c,), jnp.float32)),
        )

    p = dict(
        b2_w1=conv((Cb, cin_b2, 1, 1)), b2_bn1=bn(Cb),
        b2_dw=conv((Cb, 1, 3, 3)),      b2_bn2=bn(Cb),
        b2_w2=conv((Cb, Cb, 1, 1)),     b2_bn3=bn(Cb),
    )
    if stride > 1:
        p.update(
            b1_dw=conv((inp, 1, 3, 3)), b1_bn1=bn(inp),
            b1_w=conv((Cb, inp, 1, 1)), b1_bn2=bn(Cb),
        )
    return p


def _fold_bn(bn, eps=1e-5):
    s = bn["g"] / jnp.sqrt(bn["v"] + eps)
    return s, bn["b"] - bn["m"] * s


class InvertedResidualPallas:
    """ShuffleNetV2 InvertedResidual block. Input / output are NCHW float32."""

    def __init__(self, inp, oup, stride, key):
        if not 1 <= stride <= 3:
            raise ValueError("illegal stride value")
        self.inp, self.oup, self.stride = inp, oup, stride
        self.Cb = oup // 2
        assert stride != 1 or inp == self.Cb << 1
        self.raw = _init_params(key, inp, oup, stride)
        self._prepare_weights()

    def _prepare_weights(self):
        p, Cb, inp, oup = self.raw, self.Cb, self.inp, self.oup
        s1, b1 = _fold_bn(p["b2_bn1"])
        s2, b2 = _fold_bn(p["b2_bn2"])
        s3, b3 = _fold_bn(p["b2_bn3"])
        w1 = p["b2_w1"][:, :, 0, 0].T * s1[None, :]                    # (cin_b2, Cb)
        dw2 = jnp.transpose(p["b2_dw"][:, 0, :, :], (1, 2, 0)) * s2    # (3, 3, Cb)
        w2 = p["b2_w2"][:, :, 0, 0].T * s3[None, :]                    # (Cb, Cb)
        bias2 = b3 + b2 @ w2                 # post-dw BN bias propagated through final conv
        w2i = jnp.zeros((Cb, oup), jnp.float32).at[:, 1::2].set(w2)    # branch2 -> odd cols
        if self.stride == 1:
            pev = (jnp.zeros((Cb, oup), jnp.float32)
                   .at[jnp.arange(Cb), 2 * jnp.arange(Cb)].set(1.0))   # x1 -> even cols
            bi = jnp.zeros((oup,), jnp.float32).at[1::2].set(bias2)
            self.kargs = (w1.astype(jnp.bfloat16), b1.reshape(1, Cb), dw2,
                          w2i.astype(jnp.bfloat16), pev, bi.reshape(1, oup))
        else:
            s1a, b1a = _fold_bn(p["b1_bn1"])
            s2a, b2a = _fold_bn(p["b1_bn2"])
            dw1 = jnp.transpose(p["b1_dw"][:, 0, :, :], (1, 2, 0)) * s1a   # (3, 3, inp)
            wf = p["b1_w"][:, :, 0, 0].T * s2a[None, :]                    # (inp, Cb)
            bias1 = b2a + b1a @ wf
            w1i = jnp.zeros((inp, oup), jnp.float32).at[:, 0::2].set(wf)   # branch1 -> even
            bi = (jnp.zeros((oup,), jnp.float32)
                  .at[1::2].set(bias2).at[0::2].set(bias1))
            self.kargs = (w1.astype(jnp.bfloat16), b1.reshape(1, Cb), dw2,
                          w2i.astype(jnp.bfloat16), dw1, w1i.astype(jnp.bfloat16),
                          bi.reshape(1, oup))

    def forward_nhwc(self, x_nhwc):
        N, H, W, C = x_nhwc.shape
        s = self.stride
        assert H % s == 0 and W % s == 0
        Ho, Wo = H // s, W // s
        Hp = s * (-(-(H + 2) // s))
        Wp = s * (-(-(W + 2) // s))
        if s == 1:
            kern = functools.partial(_fused_s1_kernel, H, W, self.Cb)
            scratch = [pltpu.VMEM((Hp, Wp, self.Cb), jnp.float32)]
        else:
            kern = functools.partial(_fused_sN_kernel, s, H, W, self.inp, self.Cb)
            scratch = [pltpu.VMEM((Hp, Wp, self.inp), jnp.float32),
                       pltpu.VMEM((Hp, Wp, self.Cb), jnp.float32)]
        in_specs = [pl.BlockSpec((1, H, W, C), lambda n: (n, 0, 0, 0))]
        in_specs += [_full_spec(a) for a in self.kargs]
        return pl.pallas_call(
            kern,
            out_shape=jax.ShapeDtypeStruct((N, Ho, Wo, self.oup), x_nhwc.dtype),
            grid=(N,),
            in_specs=in_specs,
            out_specs=pl.BlockSpec((1, Ho, Wo, self.oup), lambda n: (n, 0, 0, 0)),
            scratch_shapes=scratch,
            compiler_params=pltpu.CompilerParams(dimension_semantics=("parallel",)),
        )(x_nhwc, *self.kargs)

    def __call__(self, x):                                   # x: (N, inp, H, W) NCHW
        x_nhwc = jnp.transpose(x, (0, 2, 3, 1))              # single boundary transpose in
        y_nhwc = self.forward_nhwc(x_nhwc)
        return jnp.transpose(y_nhwc, (0, 3, 1, 2))           # single boundary transpose out


# ----------------------------------------------------------------------------
# Independent reference (lax.conv) for correctness checking
# ----------------------------------------------------------------------------
def _conv1x1_ref(x, w):
    return lax.conv_general_dilated(x, w, (1, 1), "VALID",
                                    dimension_numbers=("NCHW", "OIHW", "NCHW"))


def _dwconv3x3_ref(x, w, stride):
    return lax.conv_general_dilated(x, w, (stride, stride), ((1, 1), (1, 1)),
                                    dimension_numbers=("NCHW", "OIHW", "NCHW"),
                                    feature_group_count=x.shape[1])


def _bn_ref(x, d, eps=1e-5):
    inv = d["g"] / jnp.sqrt(d["v"] + eps)
    return (x - d["m"][None, :, None, None]) * inv[None, :, None, None] \
        + d["b"][None, :, None, None]


def reference_forward(p, x, stride):
    relu = lambda z: jnp.maximum(z, 0.0)

    def branch2(z):
        z = relu(_bn_ref(_conv1x1_ref(z, p["b2_w1"]), p["b2_bn1"]))
        z = _bn_ref(_dwconv3x3_ref(z, p["b2_dw"], stride), p["b2_bn2"])
        z = relu(_bn_ref(_conv1x1_ref(z, p["b2_w2"]), p["b2_bn3"]))
        return z

    if stride == 1:
        x1, x2 = jnp.split(x, 2, axis=1)
        out = jnp.concatenate([x1, branch2(x2)], axis=1)
    else:
        z = _bn_ref(_dwconv3x3_ref(x, p["b1_dw"], stride), p["b1_bn1"])
        z = relu(_bn_ref(_conv1x1_ref(z, p["b1_w"]), p["b1_bn2"]))
        out = jnp.concatenate([z, branch2(x)], axis=1)
    N, C, H, W = out.shape
    out = out.reshape(N, 2, C // 2, H, W).transpose(0, 2, 1, 3, 4).reshape(N, C, H, W)
    return out


# ----------------------------------------------------------------------------
if __name__ == "__main__":
    key = jax.random.PRNGKey(0)
    kx, kp1, kp2 = jax.random.split(key, 3)

    N, C, H, W = 2, 8, 16, 16
    x = jax.random.normal(kx, (N, C, H, W), jnp.float32)

    # stride = 1 block (inp == oup, split / passthrough path)
    m1 = InvertedResidualPallas(inp=C, oup=C, stride=1, key=kp1)
    y1 = jax.block_until_ready(m1(x))
    r1 = reference_forward(m1.raw, x, 1)
    assert y1.shape == (N, C, H, W)
    assert bool(jnp.allclose(y1, r1, atol=3e-2, rtol=3e-2)), "stride=1 mismatch"

    # stride = 2 downsampling block (both branches active, fused in one kernel)
    m2 = InvertedResidualPallas(inp=C, oup=2 * C, stride=2, key=kp2)
    y2 = jax.block_until_ready(m2(x))
    r2 = reference_forward(m2.raw, x, 2)
    assert y2.shape == (N, 2 * C, H // 2, W // 2)
    assert bool(jnp.allclose(y2, r2, atol=3e-2, rtol=3e-2)), "stride=2 mismatch"

    print("KERNEL_OK")
</pallas_src>

<mosaic_0001>
module attributes {stable_mosaic.version = 11 : i64} {
  func.func @_fused_s1_kernel(%arg0: i32, %arg1: memref<1x16x16x8xf32, #tpu.memory_space<vmem>>, %arg2: memref<4x4xbf16, #tpu.memory_space<vmem>>, %arg3: memref<1x4xf32, #tpu.memory_space<vmem>>, %arg4: memref<3x3x4xf32, #tpu.memory_space<vmem>>, %arg5: memref<4x8xbf16, #tpu.memory_space<vmem>>, %arg6: memref<4x8xf32, #tpu.memory_space<vmem>>, %arg7: memref<1x8xf32, #tpu.memory_space<vmem>>, %arg8: memref<1x16x16x8xf32, #tpu.memory_space<vmem>>, %arg9: memref<18x18x4xf32, #tpu.memory_space<vmem>>) attributes {dimension_semantics = [#tpu.dimension_semantics<parallel>], iteration_bounds = array<i64: 2>, scalar_prefetch = 0 : i64, scratch_operands = 1 : i64, tpu.core_type = #tpu.core_type<tc>, window_params = [{transform_indices = @transform_0, window_bounds = array<i64: 1, 16, 16, 8>}, {pipeline_mode = #tpu.pipeline_mode<synchronous>, transform_indices = @transform_1, window_bounds = array<i64: 4, 4>}, {pipeline_mode = #tpu.pipeline_mode<synchronous>, transform_indices = @transform_2, window_bounds = array<i64: 1, 4>}, {pipeline_mode = #tpu.pipeline_mode<synchronous>, transform_indices = @transform_3, window_bounds = array<i64: 3, 3, 4>}, {pipeline_mode = #tpu.pipeline_mode<synchronous>, transform_indices = @transform_4, window_bounds = array<i64: 4, 8>}, {pipeline_mode = #tpu.pipeline_mode<synchronous>, transform_indices = @transform_5, window_bounds = array<i64: 4, 8>}, {pipeline_mode = #tpu.pipeline_mode<synchronous>, transform_indices = @transform_6, window_bounds = array<i64: 1, 8>}, {transform_indices = @transform_7, window_bounds = array<i64: 1, 16, 16, 8>}]} {
    %c0 = arith.constant 0 : index
    %c0_0 = arith.constant 0 : index
    %c0_1 = arith.constant 0 : index
    %c0_2 = arith.constant 0 : index
    %0 = vector.load %arg1[%c0, %c0_0, %c0_1, %c0_2] : memref<1x16x16x8xf32, #tpu.memory_space<vmem>>, vector<1x16x16x8xf32>
    %1 = vector.shape_cast %0 : vector<1x16x16x8xf32> to vector<16x16x8xf32>
    %2 = vector.extract_strided_slice %1 {offsets = [0, 0, 0], sizes = [16, 16, 4], strides = [1, 1, 1]} : vector<16x16x8xf32> to vector<16x16x4xf32>
    %3 = vector.shape_cast %2 : vector<16x16x4xf32> to vector<256x4xf32>
    %4 = vector.extract_strided_slice %1 {offsets = [0, 0, 4], sizes = [16, 16, 4], strides = [1, 1, 1]} : vector<16x16x8xf32> to vector<16x16x4xf32>
    %5 = vector.shape_cast %4 : vector<16x16x4xf32> to vector<256x4xf32>
    %6 = arith.truncf %5 : vector<256x4xf32> to vector<256x4xbf16>
    %c0_3 = arith.constant 0 : index
    %c0_4 = arith.constant 0 : index
    %7 = vector.load %arg2[%c0_3, %c0_4] : memref<4x4xbf16, #tpu.memory_space<vmem>>, vector<4x4xbf16>
    %cst = arith.constant dense<0.000000e+00> : vector<256x4xf32>
    %8 = tpu.matmul %6, %7, %cst {dimension_numbers = #tpu.dot_dimension_numbers<[1], [0], [0], [1], [0, 0, 1, 1], [], []>} : vector<256x4xbf16>, vector<4x4xbf16>, vector<256x4xf32> -> vector<256x4xf32>
    %c0_5 = arith.constant 0 : index
    %c0_6 = arith.constant 0 : index
    %9 = vector.load %arg3[%c0_5, %c0_6] : memref<1x4xf32, #tpu.memory_space<vmem>>, vector<1x4xf32>
    %10 = vector.broadcast %9 : vector<1x4xf32> to vector<256x4xf32>
    %11 = arith.addf %8, %10 : vector<256x4xf32>
    %cst_7 = arith.constant 0.000000e+00 : f32
    %12 = vector.broadcast %cst_7 : f32 to vector<256x4xf32>
    %13 = arith.maximumf %11, %12 : vector<256x4xf32>
    %14 = vector.shape_cast %13 : vector<256x4xf32> to vector<16x16x4xf32>
    %c0_8 = arith.constant 0 : index
    %c0_9 = arith.constant 0 : index
    %c0_10 = arith.constant 0 : index
    %15 = vector.load %arg4[%c0_8, %c0_9, %c0_10] : memref<3x3x4xf32, #tpu.memory_space<vmem>>, vector<3x3x4xf32>
    %cst_11 = arith.constant 0.000000e+00 : f32
    %16 = vector.broadcast %cst_11 : f32 to vector<18x18x4xf32>
    %c0_12 = arith.constant 0 : index
    %c0_13 = arith.constant 0 : index
    %c0_14 = arith.constant 0 : index
    %17 = vector.load %arg9[%c0_12, %c0_13, %c0_14] : memref<18x18x4xf32, #tpu.memory_space<vmem>>, vector<18x18x4xf32>
    tpu.vector_store %arg9[%c0_12, %c0_13, %c0_14], %16 {strides = array<i32>} : memref<18x18x4xf32, #tpu.memory_space<vmem>>, vector<18x18x4xf32>,
    %c1 = arith.constant 1 : index
    %c1_15 = arith.constant 1 : index
    %c0_16 = arith.constant 0 : index
    %18 = vector.load %arg9[%c1, %c1_15, %c0_16] : memref<18x18x4xf32, #tpu.memory_space<vmem>>, vector<16x16x4xf32>
    tpu.vector_store %arg9[%c1, %c1_15, %c0_16], %14 {strides = array<i32>} : memref<18x18x4xf32, #tpu.memory_space<vmem>>, vector<16x16x4xf32>,
    %c0_17 = arith.constant 0 : index
    %c0_18 = arith.constant 0 : index
    %c0_19 = arith.constant 0 : index
    %19 = vector.load %arg9[%c0_17, %c0_18, %c0_19] : memref<18x18x4xf32, #tpu.memory_space<vmem>>, vector<18x18x4xf32>
    %cst_20 = arith.constant 0.000000e+00 : f32
    %20 = vector.broadcast %cst_20 : f32 to vector<16x16x4xf32>
    %21 = vector.extract_strided_slice %19 {offsets = [0, 0, 0], sizes = [16, 16, 4], strides = [1, 1, 1]} : vector<18x18x4xf32> to vector<16x16x4xf32>
    %22 = vector.extract_strided_slice %15 {offsets = [0, 0, 0], sizes = [1, 1, 4], strides = [1, 1, 1]} : vector<3x3x4xf32> to vector<1x1x4xf32>
    %23 = vector.shape_cast %22 : vector<1x1x4xf32> to vector<4xf32>
    %24 = vector.shape_cast %23 : vector<4xf32> to vector<1x1x4xf32>
    %25 = vector.broadcast %24 : vector<1x1x4xf32> to vector<16x16x4xf32>
    %26 = arith.mulf %21, %25 : vector<16x16x4xf32>
    %27 = arith.addf %20, %26 : vector<16x16x4xf32>
    %28 = vector.extract_strided_slice %19 {offsets = [0, 1, 0], sizes = [16, 16, 4], strides = [1, 1, 1]} : vector<18x18x4xf32> to vector<16x16x4xf32>
    %29 = vector.extract_strided_slice %15 {offsets = [0, 1, 0], sizes = [1, 1, 4], strides = [1, 1, 1]} : vector<3x3x4xf32> to vector<1x1x4xf32>
    %30 = vector.shape_cast %29 : vector<1x1x4xf32> to vector<4xf32>
    %31 = vector.shape_cast %30 : vector<4xf32> to vector<1x1x4xf32>
    %32 = vector.broadcast %31 : vector<1x1x4xf32> to vector<16x16x4xf32>
    %33 = arith.mulf %28, %32 : vector<16x16x4xf32>
    %34 = arith.addf %27, %33 : vector<16x16x4xf32>
    %35 = vector.extract_strided_slice %19 {offsets = [0, 2, 0], sizes = [16, 16, 4], strides = [1, 1, 1]} : vector<18x18x4xf32> to vector<16x16x4xf32>
    %36 = vector.extract_strided_slice %15 {offsets = [0, 2, 0], sizes = [1, 1, 4], strides = [1, 1, 1]} : vector<3x3x4xf32> to vector<1x1x4xf32>
    %37 = vector.shape_cast %36 : vector<1x1x4xf32> to vector<4xf32>
    %38 = vector.shape_cast %37 : vector<4xf32> to vector<1x1x4xf32>
    %39 = vector.broadcast %38 : vector<1x1x4xf32> to vector<16x16x4xf32>
    %40 = arith.mulf %35, %39 : vector<16x16x4xf32>
    %41 = arith.addf %34, %40 : vector<16x16x4xf32>
    %42 = vector.extract_strided_slice %19 {offsets = [1, 0, 0], sizes = [16, 16, 4], strides = [1, 1, 1]} : vector<18x18x4xf32> to vector<16x16x4xf32>
    %43 = vector.extract_strided_slice %15 {offsets = [1, 0, 0], sizes = [1, 1, 4], strides = [1, 1, 1]} : vector<3x3x4xf32> to vector<1x1x4xf32>
    %44 = vector.shape_cast %43 : vector<1x1x4xf32> to vector<4xf32>
    %45 = vector.shape_cast %44 : vector<4xf32> to vector<1x1x4xf32>
    %46 = vector.broadcast %45 : vector<1x1x4xf32> to vector<16x16x4xf32>
    %47 = arith.mulf %42, %46 : vector<16x16x4xf32>
    %48 = arith.addf %41, %47 : vector<16x16x4xf32>
    %49 = vector.extract_strided_slice %19 {offsets = [1, 1, 0], sizes = [16, 16, 4], strides = [1, 1, 1]} : vector<18x18x4xf32> to vector<16x16x4xf32>
    %50 = vector.extract_strided_slice %15 {offsets = [1, 1, 0], sizes = [1, 1, 4], strides = [1, 1, 1]} : vector<3x3x4xf32> to vector<1x1x4xf32>
    %51 = vector.shape_cast %50 : vector<1x1x4xf32> to vector<4xf32>
    %52 = vector.shape_cast %51 : vector<4xf32> to vector<1x1x4xf32>
    %53 = vector.broadcast %52 : vector<1x1x4xf32> to vector<16x16x4xf32>
    %54 = arith.mulf %49, %53 : vector<16x16x4xf32>
    %55 = arith.addf %48, %54 : vector<16x16x4xf32>
    %56 = vector.extract_strided_slice %19 {offsets = [1, 2, 0], sizes = [16, 16, 4], strides = [1, 1, 1]} : vector<18x18x4xf32> to vector<16x16x4xf32>
    %57 = vector.extract_strided_slice %15 {offsets = [1, 2, 0], sizes = [1, 1, 4], strides = [1, 1, 1]} : vector<3x3x4xf32> to vector<1x1x4xf32>
    %58 = vector.shape_cast %57 : vector<1x1x4xf32> to vector<4xf32>
    %59 = vector.shape_cast %58 : vector<4xf32> to vector<1x1x4xf32>
    %60 = vector.broadcast %59 : vector<1x1x4xf32> to vector<16x16x4xf32>
    %61 = arith.mulf %56, %60 : vector<16x16x4xf32>
    %62 = arith.addf %55, %61 : vector<16x16x4xf32>
    %63 = vector.extract_strided_slice %19 {offsets = [2, 0, 0], sizes = [16, 16, 4], strides = [1, 1, 1]} : vector<18x18x4xf32> to vector<16x16x4xf32>
    %64 = vector.extract_strided_slice %15 {offsets = [2, 0, 0], sizes = [1, 1, 4], strides = [1, 1, 1]} : vector<3x3x4xf32> to vector<1x1x4xf32>
    %65 = vector.shape_cast %64 : vector<1x1x4xf32> to vector<4xf32>
    %66 = vector.shape_cast %65 : vector<4xf32> to vector<1x1x4xf32>
    %67 = vector.broadcast %66 : vector<1x1x4xf32> to vector<16x16x4xf32>
    %68 = arith.mulf %63, %67 : vector<16x16x4xf32>
    %69 = arith.addf %62, %68 : vector<16x16x4xf32>
    %70 = vector.extract_strided_slice %19 {offsets = [2, 1, 0], sizes = [16, 16, 4], strides = [1, 1, 1]} : vector<18x18x4xf32> to vector<16x16x4xf32>
    %71 = vector.extract_strided_slice %15 {offsets = [2, 1, 0], sizes = [1, 1, 4], strides = [1, 1, 1]} : vector<3x3x4xf32> to vector<1x1x4xf32>
    %72 = vector.shape_cast %71 : vector<1x1x4xf32> to vector<4xf32>
    %73 = vector.shape_cast %72 : vector<4xf32> to vector<1x1x4xf32>
    %74 = vector.broadcast %73 : vector<1x1x4xf32> to vector<16x16x4xf32>
    %75 = arith.mulf %70, %74 : vector<16x16x4xf32>
    %76 = arith.addf %69, %75 : vector<16x16x4xf32>
    %77 = vector.extract_strided_slice %19 {offsets = [2, 2, 0], sizes = [16, 16, 4], strides = [1, 1, 1]} : vector<18x18x4xf32> to vector<16x16x4xf32>
    %78 = vector.extract_strided_slice %15 {offsets = [2, 2, 0], sizes = [1, 1, 4], strides = [1, 1, 1]} : vector<3x3x4xf32> to vector<1x1x4xf32>
    %79 = vector.shape_cast %78 : vector<1x1x4xf32> to vector<4xf32>
    %80 = vector.shape_cast %79 : vector<4xf32> to vector<1x1x4xf32>
    %81 = vector.broadcast %80 : vector<1x1x4xf32> to vector<16x16x4xf32>
    %82 = arith.mulf %77, %81 : vector<16x16x4xf32>
    %83 = arith.addf %76, %82 : vector<16x16x4xf32>
    %84 = vector.shape_cast %83 : vector<16x16x4xf32> to vector<256x4xf32>
    %85 = arith.truncf %84 : vector<256x4xf32> to vector<256x4xbf16>
    %c0_21 = arith.constant 0 : index
    %c0_22 = arith.constant 0 : index
    %86 = vector.load %arg5[%c0_21, %c0_22] : memref<4x8xbf16, #tpu.memory_space<vmem>>, vector<4x8xbf16>
    %cst_23 = arith.constant dense<0.000000e+00> : vector<256x8xf32>
    %87 = tpu.matmul %85, %86, %cst_23 {dimension_numbers = #tpu.dot_dimension_numbers<[1], [0], [0], [1], [0, 0, 1, 1], [], []>} : vector<256x4xbf16>, vector<4x8xbf16>, vector<256x8xf32> -> vector<256x8xf32>
    %c0_24 = arith.constant 0 : index
    %c0_25 = arith.constant 0 : index
    %88 = vector.load %arg7[%c0_24, %c0_25] : memref<1x8xf32, #tpu.memory_space<vmem>>, vector<1x8xf32>
    %89 = vector.broadcast %88 : vector<1x8xf32> to vector<256x8xf32>
    %90 = arith.addf %87, %89 : vector<256x8xf32>
    %cst_26 = arith.constant 0.000000e+00 : f32
    %91 = vector.broadcast %cst_26 : f32 to vector<256x8xf32>
    %92 = arith.maximumf %90, %91 : vector<256x8xf32>
    %c0_27 = arith.constant 0 : index
    %c0_28 = arith.constant 0 : index
    %93 = vector.load %arg6[%c0_27, %c0_28] : memref<4x8xf32, #tpu.memory_space<vmem>>, vector<4x8xf32>
    %cst_29 = arith.constant dense<0.000000e+00> : vector<256x8xf32>
    %94 = tpu.matmul %3, %93, %cst_29 {dimension_numbers = #tpu.dot_dimension_numbers<[1], [0], [0], [1], [0, 0, 1, 1], [], []>, precision = #tpu.contract_precision<fp32>} : vector<256x4xf32>, vector<4x8xf32>, vector<256x8xf32> -> vector<256x8xf32>
    %95 = arith.addf %92, %94 : vector<256x8xf32>
    %96 = vector.shape_cast %95 : vector<256x8xf32> to vector<16x16x8xf32>
    %c0_30 = arith.constant 0 : index
    %c0_31 = arith.constant 0 : index
    %c0_32 = arith.constant 0 : index
    %c0_33 = arith.constant 0 : index
    %97 = vector.load %arg8[%c0_30, %c0_31, %c0_32, %c0_33] : memref<1x16x16x8xf32, #tpu.memory_space<vmem>>, vector<1x16x16x8xf32>
    %98 = vector.shape_cast %97 : vector<1x16x16x8xf32> to vector<16x16x8xf32>
    %99 = vector.shape_cast %96 : vector<16x16x8xf32> to vector<1x16x16x8xf32>
    tpu.vector_store %arg8[%c0_30, %c0_31, %c0_32, %c0_33], %99 {strides = array<i32>} : memref<1x16x16x8xf32, #tpu.memory_space<vmem>>, vector<1x16x16x8xf32>,
    return
  }
  func.func @transform_0(%arg0: i32) -> (i32, i32, i32, i32) {
    %c0_i32 = arith.constant 0 : i32
    %c0_i32_0 = arith.constant 0 : i32
    %c0_i32_1 = arith.constant 0 : i32
    %c0_i32_2 = arith.constant 0 : i32
    return %arg0, %c0_i32, %c0_i32_0, %c0_i32_1 : i32, i32, i32, i32
  }
  func.func @transform_1(%arg0: i32) -> (i32, i32) {
    %c0_i32 = arith.constant 0 : i32
    %c0_i32_0 = arith.constant 0 : i32
    %c0_i32_1 = arith.constant 0 : i32
    return %c0_i32, %c0_i32_0 : i32, i32
  }
  func.func @transform_2(%arg0: i32) -> (i32, i32) {
    %c0_i32 = arith.constant 0 : i32
    %c0_i32_0 = arith.constant 0 : i32
    %c0_i32_1 = arith.constant 0 : i32
    return %c0_i32, %c0_i32_0 : i32, i32
  }
  func.func @transform_3(%arg0: i32) -> (i32, i32, i32) {
    %c0_i32 = arith.constant 0 : i32
    %c0_i32_0 = arith.constant 0 : i32
    %c0_i32_1 = arith.constant 0 : i32
    %c0_i32_2 = arith.constant 0 : i32
    return %c0_i32, %c0_i32_0, %c0_i32_1 : i32, i32, i32
  }
  func.func @transform_4(%arg0: i32) -> (i32, i32) {
    %c0_i32 = arith.constant 0 : i32
    %c0_i32_0 = arith.constant 0 : i32
    %c0_i32_1 = arith.constant 0 : i32
    return %c0_i32, %c0_i32_0 : i32, i32
  }
  func.func @transform_5(%arg0: i32) -> (i32, i32) {
    %c0_i32 = arith.constant 0 : i32
    %c0_i32_0 = arith.constant 0 : i32
    %c0_i32_1 = arith.constant 0 : i32
    return %c0_i32, %c0_i32_0 : i32, i32
  }
  func.func @transform_6(%arg0: i32) -> (i32, i32) {
    %c0_i32 = arith.constant 0 : i32
    %c0_i32_0 = arith.constant 0 : i32
    %c0_i32_1 = arith.constant 0 : i32
    return %c0_i32, %c0_i32_0 : i32, i32
  }
  func.func @transform_7(%arg0: i32) -> (i32, i32, i32, i32) {
    %c0_i32 = arith.constant 0 : i32
    %c0_i32_0 = arith.constant 0 : i32
    %c0_i32_1 = arith.constant 0 : i32
    %c0_i32_2 = arith.constant 0 : i32
    return %arg0, %c0_i32, %c0_i32_0, %c0_i32_1 : i32, i32, i32, i32
  }
}

</mosaic_0001>

<bundles_post_ra>
// kernel: tpu_custom_call.1
= control target key start
LH: loop header
LB: loop body
LE: loop exit
PB: predicated region body
PF: predicated region fallthrough
CT: control target
= control target key end

     0   :  { %s5423_s24 = smov 0   ;;  %s8097_s0 = inlined_call_operand.vmem [shape: f32[2,16,16,8], index: 0, kind: input, shape index: {}]   ;;  %s8098_s1 = inlined_call_operand.vmem [shape: bf16[4,4], index: 1, kind: input, shape index: {}]   ;;  %s8099_s2 = inlined_call_operand.vmem [shape: f32[1,4], index: 2, kind: input, shape index: {}]   ;;  %s8100_s3 = inlined_call_operand.vmem [shape: f32[3,3,4], index: 3, kind: input, shape index: {}]   ;;  %s8101_s4 = inlined_call_operand.vmem [shape: bf16[4,8], index: 4, kind: input, shape index: {}]   ;;  %s8102_s5 = inlined_call_operand.vmem [shape: f32[4,8], index: 5, kind: input, shape index: {}]   ;;  %s8103_s6 = inlined_call_operand.vmem [shape: f32[1,8], index: 6, kind: input, shape index: {}]   ;;  %s8104_s7 = inlined_call_operand.vmem [shape: f32[2,16,16,8], index: 7, kind: output, shape index: {}]  }
   0x1 LB: > { %s4713_s25 = sadd.s32 4294967295, %s5379_s24   ;;  %p4717_p0 = scmp.ge.s32.totalorder %s5379_s24, 1  ;;  %s5379_s24 = sphi %s5423_s24, %s17_s24  }
   0x2   : > { %p237_p1 = scmp.lt.s32.totalorder %s5379_s24, 3 }
   0x4   : > { %p238_p2 = pnand %p4717_p0, %p237_p1 }
   0x6   : > { %241 = sbr.rel (%p238_p2) target bundleno = 1051 (0x41b), region = 48 }
   0xb   : > { %p269_p3 = scmp.lt.s32.totalorder %s4713_s25, 1  ;;  %v328_v0 = vld [vmem:[%s8098_s1] sm:$0x3]  ;;  %vm433_vm0 = vcmask 1041408   ;;  %s5381_s9 = smov 124   ;;  %vm384_vm1 = vcmask 31744  }
   0xc   : > { %5360 = vmatprep.subr.msk.bf16.mxu0 %vm433_vm0, %v328_v0  ;;  %v435_v1 = vsel %vm433_vm0, %v328_v0, 0  ;;  %vm635_vm2 = vcmask 25600   ;;  %vm2810_vm3 = vcmask 1043456   ;;  %vm943_vm4 = vcmask 1046528  }
   0xd   : > { %s8609_s25 = smov (!%p269_p3, %s4713_s25), 1  ;;  %4993 = vmatpush3.bf16.msra.mxu0 %v435_v1  ;;  %vm1188_vm5 = vcmask 1045504   ;;  %vm4625_vm6 = vcmask 64512  }
   0xe   : > { %s4758_s28 = sshll.u32 %s8609_s25, 8 }
   0xf   : > { %s5444_s8 = scalar_lea.vmem %s8097_s0, %s4758_s28 }
  0x10   : > { %v5447_v2 = vld [vmem:[%s5444_s8] sm:$0xff]  ;;  %v5450_v3 = vld [vmem:[%s5444_s8 + $0x8] sm:$0xff]  ;;  %v5453_v4 = vld [vmem:[%s5444_s8 + $0x10] sm:$0xff] }
  0x11   : > { %v312_v5 = vpack.c.bf16 %v5450_v3, %v5447_v2  ;;  %v5458_v6 = vld [vmem:[%s5444_s8 + $0x18] sm:$0xff]  ;;  %v5461_v7 = vld [vmem:[%s5444_s8 + $0x20] sm:$0xff]  ;;  %v5464_v8 = vld [vmem:[%s5444_s8 + $0x28] sm:$0xff] }
  0x12   : > { %v5467_v9 = vld [vmem:[%s5444_s8 + $0x30] sm:$0xff]  ;;  %v5470_v10 = vld [vmem:[%s5444_s8 + $0x38] sm:$0xff]  ;;  %v313_v11 = vpack.c.bf16 %v5458_v6, %v5453_v4  ;;  %v314_v12 = vpack.c.bf16 %v5464_v8, %v5461_v7  ;;  %v5478_v13 = vld [vmem:[%s5444_s8 + $0x40] sm:$0xff] }
  0x13   : > { %352 = vrot.lane.b32.xlu0 %v312_v5, %s5381_s9  ;;  %v5481_v14 = vld [vmem:[%s5444_s8 + $0x48] sm:$0xff]  ;;  %v315_v15 = vpack.c.bf16 %v5470_v10, %v5467_v9  ;;  %v5487_v16 = vld [vmem:[%s5444_s8 + $0x50] sm:$0xff]  ;;  %v5490_v17 = vld [vmem:[%s5444_s8 + $0x58] sm:$0xff]  ;;  %v5382_v5 = vmov 0.0  }
  0x14   : > { %356 = vrot.lane.b32.xlu1 %v314_v12, %s5381_s9  ;;  %v316_v18 = vpack.c.bf16 %v5481_v14, %v5478_v13  ;;  %v5496_v19 = vld [vmem:[%s5444_s8 + $0x60] sm:$0xff]  ;;  %v5499_v20 = vld [vmem:[%s5444_s8 + $0x68] sm:$0xff]  ;;  %v317_v21 = vpack.c.bf16 %v5490_v17, %v5487_v16  ;;  %v5505_v22 = vld [vmem:[%s5444_s8 + $0x70] sm:$0xff]  ;;  %640 = vst.msk [vmem:[#allocation2 + $0x30] sm:$0xff] %vm384_vm1, %v5382_v5  ;;  %v2718_v12 = vsel %vm384_vm1, %v5450_v3, 0 }
  0x15   : > { %v5508_v23 = vld [vmem:[%s5444_s8 + $0x78] sm:$0xff]  ;;  %v318_v24 = vpack.c.bf16 %v5499_v20, %v5496_v19  ;;  %v5514_v25 = vld [vmem:[%s5444_s8 + $0x80] sm:$0xff]  ;;  %v5517_v26 = vld [vmem:[%s5444_s8 + $0x88] sm:$0xff]  ;;  %641 = vst.msk [vmem:[#allocation2 + $0x38] sm:$0xff] %vm384_vm1, %v5382_v5 }
  0x16   : > { %v319_v27 = vpack.c.bf16 %v5508_v23, %v5505_v22  ;;  %v5523_v28 = vld [vmem:[%s5444_s8 + $0x90] sm:$0xff]  ;;  %v5526_v29 = vld [vmem:[%s5444_s8 + $0x98] sm:$0xff]  ;;  %v320_v30 = vpack.c.bf16 %v5517_v26, %v5514_v25  ;;  %v5532_v31 = vld [vmem:[%s5444_s8 + $0xa0] sm:$0xff]  ;;  %633 = vst.msk [vmem:[#allocation2] sm:$0xff] %vm384_vm1, %v5382_v5 }
  0x17   : > { %354 = vrot.lane.b32.xlu0 %v313_v11, %s5381_s9  ;;  %v5535_v32 = vld [vmem:[%s5444_s8 + $0xa8] sm:$0xff]  ;;  %v321_v33 = vpack.c.bf16 %v5526_v29, %v5523_v28  ;;  %v5541_v34 = vld [vmem:[%s5444_s8 + $0xb0] sm:$0xff]  ;;  %v5544_v35 = vld [vmem:[%s5444_s8 + $0xb8] sm:$0xff]  ;;  %634 = vst.msk [vmem:[#allocation2 + $0x8] sm:$0xff] %vm384_vm1, %v5382_v5 }
  0x18   : > { %358 = vrot.lane.b32.xlu1 %v315_v15, %s5381_s9  ;;  %v322_v36 = vpack.c.bf16 %v5535_v32, %v5532_v31  ;;  %v5550_v37 = vld [vmem:[%s5444_s8 + $0xc0] sm:$0xff]  ;;  %v5553_v38 = vld [vmem:[%s5444_s8 + $0xc8] sm:$0xff]  ;;  %v323_v39 = vpack.c.bf16 %v5544_v35, %v5541_v34  ;;  %v5559_v40 = vld [vmem:[%s5444_s8 + $0xd0] sm:$0xff]  ;;  %637 = vst.msk [vmem:[#allocation2 + $0x18] sm:$0xff] %vm384_vm1, %v5382_v5 }
  0x19   : > { %v5562_v41 = vld [vmem:[%s5444_s8 + $0xd8] sm:$0xff]  ;;  %v324_v42 = vpack.c.bf16 %v5553_v38, %v5550_v37  ;;  %v5568_v43 = vld [vmem:[%s5444_s8 + $0xe0] sm:$0xff]  ;;  %v5571_v44 = vld [vmem:[%s5444_s8 + $0xe8] sm:$0xff]  ;;  %638 = vst.msk [vmem:[#allocation2 + $0x20] sm:$0xff] %vm384_vm1, %v5382_v5 }
  0x1a   : > { %v325_v45 = vpack.c.bf16 %v5562_v41, %v5559_v40  ;;  %v5577_v46 = vld [vmem:[%s5444_s8 + $0xf0] sm:$0xff]  ;;  %v5580_v47 = vld [vmem:[%s5444_s8 + $0xf8] sm:$0xff]  ;;  %v326_v48 = vpack.c.bf16 %v5571_v44, %v5568_v43  ;;  %643 = vst.msk [vmem:[#allocation2 + $0x48] sm:$0xff] %vm384_vm1, %v5382_v5  ;;  %644 = vst.msk [vmem:[#allocation2 + $0x50] sm:$0xff] %vm384_vm1, %v5382_v5  ;;  %s7830_s8 = scalar_lea.vmem %s8104_s7, %s4758_s28 }
  0x1b   : > { %360 = vrot.lane.b32.xlu0 %v316_v18, %s5381_s9  ;;  %v327_v49 = vpack.c.bf16 %v5580_v47, %v5577_v46  ;;  %646 = vst.msk [vmem:[#allocation2 + $0x60] sm:$0xff] %vm384_vm1, %v5382_v5  ;;  %647 = vst.msk [vmem:[#allocation2 + $0x68] sm:$0xff] %vm384_vm1, %v5382_v5  ;;  %v2461_v11 = vld [vmem:[%s8101_s4] sm:$0x3] }
  0x1c   : > { %362 = vrot.lane.b32.xlu1 %v317_v21, %s5381_s9  ;;  %649 = vst.msk [vmem:[#allocation2 + $0x78] sm:$0xff] %vm384_vm1, %v5382_v5  ;;  %650 = vst.msk [vmem:[#allocation2 + $0x80] sm:$0xff] %vm384_vm1, %v5382_v5  ;;  %5361 = vmatprep.subr.msk.bf16.mxu1 %vm433_vm0, %v2461_v11  ;;  %v2518_v15 = vsel %vm433_vm0, %v2461_v11, 0  ;;  %v2713_v18 = vld [vmem:[%s8102_s5] sm:$0xf] }
  0x1d   : > { %652 = vst.msk [vmem:[#allocation2 + $0x90] sm:$0xff] %vm384_vm1, %v5382_v5  ;;  %653 = vst.msk [vmem:[#allocation2 + $0x98] sm:$0xff] %vm384_vm1, %v5382_v5  ;;  %5027 = vmatpush3.bf16.msra.mxu1 %v2518_v15  ;;  %v2812_v21 = vsel %vm2810_vm3, %v2713_v18, 0  ;;  %v2730_v18 = vsel %vm384_vm1, %v5464_v8, 0 }
  0x1e   : > { %655 = vst.msk [vmem:[#allocation2 + $0xa8] sm:$0xff] %vm384_vm1, %v5382_v5  ;;  %656 = vst.msk [vmem:[#allocation2 + $0xb0] sm:$0xff] %vm384_vm1, %v5382_v5 }
  0x1f   : > { %364 = vrot.lane.b32.xlu0 %v318_v24, %s5381_s9  ;;  %658 = vst.msk [vmem:[#allocation2 + $0xc0] sm:$0xff] %vm384_vm1, %v5382_v5  ;;  %659 = vst.msk [vmem:[#allocation2 + $0xc8] sm:$0xff] %vm384_vm1, %v5382_v5  ;;  %v5670_v24 = vand.u32 4294901760, %v2718_v12 }
  0x20   : > { %366 = vrot.lane.b32.xlu1 %v319_v27, %s5381_s9  ;;  %661 = vst.msk [vmem:[#allocation2 + $0xd8] sm:$0xff] %vm384_vm1, %v5382_v5  ;;  %662 = vst.msk [vmem:[#allocation2 + $0xe0] sm:$0xff] %vm384_vm1, %v5382_v5  ;;  %v5672_v27 = vand.u32 4294901760, %v2812_v21 }
  0x21   : > { %664 = vst.msk [vmem:[#allocation2 + $0xf0] sm:$0xff] %vm384_vm1, %v5382_v5  ;;  %665 = vst.msk [vmem:[#allocation2 + $0xf8] sm:$0xff] %vm384_vm1, %v5382_v5 }
  0x22   : > { %667 = vst.msk [vmem:[#allocation2 + $0x108] sm:$0xff] %vm384_vm1, %v5382_v5  ;;  %668 = vst.msk [vmem:[#allocation2 + $0x110] sm:$0xff] %vm384_vm1, %v5382_v5  ;;  %5060 = vmatprep.subr.mxu0 %v5672_v27  ;;  %v3232_v3 = vsub.f32 %v2812_v21, %v5672_v27  ;;  %v2733_v21 = vsel %vm384_vm1, %v5467_v9, 0  ;;  %v2745_v9 = vsel %vm384_vm1, %v5487_v16, 0 }
  0x23   : > { %368 = vrot.lane.b32.xlu0 %v320_v30, %s5381_s9  ;;  %670 = vst.msk [vmem:[#allocation2 + $0x120] sm:$0xff] %vm384_vm1, %v5382_v5  ;;  %671 = vst.msk [vmem:[#allocation2 + $0x128] sm:$0xff] %vm384_vm1, %v5382_v5  ;;  %v2715_v30 = vsel %vm384_vm1, %v5447_v2, 0 }
  0x24   : > { %370 = vrot.lane.b32.xlu1 %v321_v33, %s5381_s9  ;;  %673 = vst.msk [vmem:[#allocation2 + $0x138] sm:$0xff] %vm384_vm1, %v5382_v5  ;;  %674 = vst.msk [vmem:[#allocation2 + $0x140] sm:$0xff] %vm384_vm1, %v5382_v5  ;;  %v5680_v33 = vsub.f32 %v2718_v12, %v5670_v24 }
  0x25   : > { %676 = vst.msk [vmem:[#allocation2 + $0x150] sm:$0xff] %vm384_vm1, %v5382_v5  ;;  %677 = vst.msk [vmem:[#allocation2 + $0x158] sm:$0xff] %vm384_vm1, %v5382_v5 }
  0x26   : > { %679 = vst.msk [vmem:[#allocation2 + $0x168] sm:$0xff] %vm384_vm1, %v5382_v5  ;;  %680 = vst.msk [vmem:[#allocation2 + $0x170] sm:$0xff] %vm384_vm1, %v5382_v5 }
  0x27   : > { %372 = vrot.lane.b32.xlu0 %v322_v36, %s5381_s9  ;;  %682 = vst.msk [vmem:[#allocation2 + $0x180] sm:$0xff] %vm384_vm1, %v5382_v5  ;;  %683 = vst.msk [vmem:[#allocation2 + $0x188] sm:$0xff] %vm384_vm1, %v5382_v5  ;;  %v5682_v36 = vand.u32 4294901760, %v3232_v3 }
  0x28   : > { %374 = vrot.lane.b32.xlu1 %v323_v39, %s5381_s9  ;;  %685 = vst.msk [vmem:[#allocation2 + $0x198] sm:$0xff] %vm384_vm1, %v5382_v5  ;;  %686 = vst.msk [vmem:[#allocation2 + $0x1a0] sm:$0xff] %vm384_vm1, %v5382_v5  ;;  %v5684_v39 = vand.u32 4294901760, %v2715_v30 }
  0x29   : > { %642 = vst.msk [vmem:[#allocation2 + $0x40] sm:$0x3] %vm635_vm2, %v5382_v5  ;;  %636 = vst.msk [vmem:[#allocation2 + $0x10] sm:$0x3] %vm635_vm2, %v5382_v5 }
  0x2a   : > { %639 = vst.msk [vmem:[#allocation2 + $0x28] sm:$0x3] %vm635_vm2, %v5382_v5  ;;  %645 = vst.msk [vmem:[#allocation2 + $0x58] sm:$0x3] %vm635_vm2, %v5382_v5  ;;  %v5691_v2 = vsub.f32 %v2715_v30, %v5684_v39  ;;  %v5741_v30 = vand.u32 4294901760, %v2730_v18 }
  0x2b   : > { %376 = vrot.lane.b32.xlu0 %v324_v42, %s5381_s9  ;;  %648 = vst.msk [vmem:[#allocation2 + $0x70] sm:$0x3] %vm635_vm2, %v5382_v5  ;;  %651 = vst.msk [vmem:[#allocation2 + $0x88] sm:$0x3] %vm635_vm2, %v5382_v5  ;;  %v3234_v42 = vsub.f32 %v3232_v3, %v5682_v36 }
  0x2c   : > { %378 = vrot.lane.b32.xlu1 %v325_v45, %s5381_s9  ;;  %654 = vst.msk [vmem:[#allocation2 + $0xa0] sm:$0x3] %vm635_vm2, %v5382_v5  ;;  %657 = vst.msk [vmem:[#allocation2 + $0xb8] sm:$0x3] %vm635_vm2, %v5382_v5  ;;  %v8111_v45 = vand.u32 4294901760, %v5680_v33 }
  0x2d   : > { %660 = vst.msk [vmem:[#allocation2 + $0xd0] sm:$0x3] %vm635_vm2, %v5382_v5  ;;  %663 = vst.msk [vmem:[#allocation2 + $0xe8] sm:$0x3] %vm635_vm2, %v5382_v5 }
  0x2e   : > { %666 = vst.msk [vmem:[#allocation2 + $0x100] sm:$0x3] %vm635_vm2, %v5382_v5  ;;  %669 = vst.msk [vmem:[#allocation2 + $0x118] sm:$0x3] %vm635_vm2, %v5382_v5 }
  0x2f   : > { %380 = vrot.lane.b32.xlu0 %v326_v48, %s5381_s9  ;;  %672 = vst.msk [vmem:[#allocation2 + $0x130] sm:$0x3] %vm635_vm2, %v5382_v5  ;;  %675 = vst.msk [vmem:[#allocation2 + $0x148] sm:$0x3] %vm635_vm2, %v5382_v5  ;;  %v5688_v48 = vand.u32 4294901760, %v3234_v42  ;;  %v5745_v42 = vand.u32 4294901760, %v2733_v21 }
  0x30   : > { %382 = vrot.lane.b32.xlu1 %v327_v49, %s5381_s9  ;;  %678 = vst.msk [vmem:[#allocation2 + $0x160] sm:$0x3] %vm635_vm2, %v5382_v5  ;;  %681 = vst.msk [vmem:[#allocation2 + $0x178] sm:$0x3] %vm635_vm2, %v5382_v5  ;;  %v2893_v49 = vsub.f32 %v5680_v33, %v8111_v45 }
  0x31   : > { %684 = vst.msk [vmem:[#allocation2 + $0x190] sm:$0x3] %vm635_vm2, %v5382_v5  ;;  %687 = vst.msk [vmem:[#allocation2 + $0x1a8] sm:$0x3] %vm635_vm2, %v5382_v5  ;;  %5110 = vmatprep.subr.mxu1 %v5688_v48 }
  0x32   : > { %8237 = vst [vmem:[#allocation3_spill] sm:$0xff] %v5670_v24  ;;  %8238 = vst [vmem:[#allocation4_spill] sm:$0xff] %v5680_v33 }
  0x33   : > { %8239 = vst [vmem:[#allocation5_spill] sm:$0xff] %v5682_v36  ;;  %8240 = vst [vmem:[#allocation6_spill] sm:$0xff] %v5684_v39 }
  0x34   : > { %8241 = vst [vmem:[#allocation7_spill] sm:$0xff] %v5691_v2  ;;  %8248 = vst [vmem:[#allocation14_spill] sm:$0xff] %v5741_v30 }
  0x35   : > { %8249 = vst [vmem:[#allocation15_spill] sm:$0xff] %v5745_v42 }
  0x85   : > { %v353_v50 = vpop.permute.xlu0 %352 }
  0x86   : > { %4994 = vmatprep.mubr.msk.bf16.mxu0 %vm384_vm1, %v353_v50  ;;  %v357_v51 = vpop.permute.xlu1 %356  ;;  %v8112_v50 = vand.u32 4294901760, %v5691_v2 }
  0x89   : > { %v355_v52 = vpop.permute.xlu0 %354 }
  0x8a   : > { %4995 = vmatmul.mubr.msk.bf16.vlgmr.msra.gmra.mxu0 %vm384_vm1, %v355_v52  ;;  %v359_v53 = vpop.permute.xlu1 %358  ;;  %v2894_v52 = vand.u32 4294901760, %v2893_v49 }
  0x8b   : > { %4998 = vmatprep.mubr.msk.bf16.mxu0 %vm384_vm1, %v357_v51  ;;  %5061 = vmatpush3.msra.mxu0 %v5672_v27  ;;  %v2883_v51 = vsub.f32 %v5691_v2, %v8112_v50  ;;  %v2772_v50 = vsel %vm384_vm1, %v5526_v29, 0  ;;  %v2790_v29 = vsel %vm384_vm1, %v5553_v38, 0 }
  0x8c   : > { %5160 = vmatprep.subr.mxu0 %v3232_v3 }
  0x8d   : > { %v361_v54 = vpop.permute.xlu0 %360 }
  0x8e   : > { %v363_v55 = vpop.permute.xlu1 %362 }
  0x91   : > { %v365_v56 = vpop.permute.xlu0 %364 }
  0x92   : > { %4999 = vmatmul.mubr.msk.bf16.gmra.mxu0 %vm384_vm1, %v359_v53  ;;  %v367_v57 = vpop.permute.xlu1 %366  ;;  %v2884_v53 = vand.u32 4294901760, %v2883_v51  ;;  %v2742_v51 = vsel %vm384_vm1, %v5481_v14, 0  ;;  %v2751_v14 = vsel %vm384_vm1, %v5496_v19, 0  ;;  %v2760_v19 = vsel %vm384_vm1, %v5508_v23, 0 }
  0x93   : > { %5002 = vmatprep.mubr.msk.bf16.mxu0 %vm384_vm1, %v361_v54  ;;  %v2721_v54 = vsel %vm384_vm1, %v5453_v4, 0  ;;  %v5770_v16 = vand.u32 4294901760, %v2742_v51  ;;  %v2763_v23 = vsel %vm384_vm1, %v5514_v25, 0 }
  0x95   : > { %v369_v58 = vpop.permute.xlu0 %368  ;;  %8255 = vst [vmem:[#allocation21_spill] sm:$0xff] %v5770_v16 }
  0x96   : > { %v371_v59 = vpop.permute.xlu1 %370 }
  0x99   : > { %v373_v60 = vpop.permute.xlu0 %372 }
  0x9a   : > { %5003 = vmatmul.mubr.msk.bf16.gmra.mxu0 %vm384_vm1, %v363_v55  ;;  %v375_v61 = vpop.permute.xlu1 %374  ;;  %v2724_v55 = vsel %vm384_vm1, %v5458_v6, 0 }
  0x9b   : > { %5006 = vmatprep.mubr.msk.bf16.mxu0 %vm384_vm1, %v365_v56  ;;  %v5705_v56 = vand.u32 4294901760, %v2721_v54 }
  0x9d   : > { %v377_v62 = vpop.permute.xlu0 %376  ;;  %8242 = vst [vmem:[#allocation8_spill] sm:$0xff] %v5705_v56 }
  0x9e   : > { %v379_v63 = vpop.permute.xlu1 %378 }
  0xa1   : > { %v381_v0 = vpop.permute.xlu0 %380 }
  0xa2   : > { %5007 = vmatmul.mubr.msk.bf16.gmra.mxu0 %vm384_vm1, %v367_v57  ;;  %v383_v1 = vpop.permute.xlu1 %382  ;;  %v5707_v57 = vand.u32 4294901760, %v2724_v55 }
  0xa3   : > { %5010 = vmatprep.mubr.msk.bf16.mxu0 %vm384_vm1, %v369_v58  ;;  %v5711_v58 = vsub.f32 %v2721_v54, %v5705_v56 }
  0xa4   : > { %8243 = vst [vmem:[#allocation9_spill] sm:$0xff] %v5707_v57 }
  0xa5   : > { %8244 = vst [vmem:[#allocation10_spill] sm:$0xff] %v5711_v58  ;;  %v8108_v4 = vand.u32 4294901760, %v5711_v58 }
  0xa7   : > { %v2903_v6 = vsub.f32 %v5711_v58, %v8108_v4  ;;  %v5827_v4 = vand.u32 4294901760, %v2763_v23 }
  0xa9   : > { %8263 = vst [vmem:[#allocation29_spill] sm:$0xff] %v5827_v4 }
  0xaa   : > { %5011 = vmatmul.mubr.msk.bf16.gmra.mxu0 %vm384_vm1, %v371_v59  ;;  %v5714_v59 = vsub.f32 %v2724_v55, %v5707_v57  ;;  %v2754_v55 = vsel %vm384_vm1, %v5499_v20, 0 }
  0xab   : > { %5014 = vmatprep.mubr.msk.bf16.mxu0 %vm384_vm1, %v373_v60 }
  0xac   : > { %8245 = vst [vmem:[#allocation11_spill] sm:$0xff] %v5714_v59  ;;  %v8106_v60 = vand.u32 4294901760, %v5714_v59 }
  0xb2   : > { %5015 = vmatmul.mubr.msk.bf16.gmra.mxu0 %vm384_vm1, %v375_v61  ;;  %v2913_v61 = vsub.f32 %v5714_v59, %v8106_v60  ;;  %v5820_v60 = vand.u32 4294901760, %v2760_v19 }
  0xb3   : > { %5018 = vmatprep.mubr.msk.bf16.mxu0 %vm384_vm1, %v377_v62  ;;  %v2904_v62 = vand.u32 4294901760, %v2903_v6  ;;  %v5772_v6 = vand.u32 4294901760, %v2745_v9 }
  0xb4   : > { %8262 = vst [vmem:[#allocation28_spill] sm:$0xff] %v5820_v60 }
  0xb5   : > { %8256 = vst [vmem:[#allocation22_spill] sm:$0xff] %v5772_v6 }
  0xba   : > { %5019 = vmatmul.mubr.msk.bf16.gmra.mxu0 %vm384_vm1, %v379_v63  ;;  %v2914_v63 = vand.u32 4294901760, %v2913_v61  ;;  %v2757_v61 = vsel %vm384_vm1, %v5505_v22, 0  ;;  %v5793_v22 = vsub.f32 %v2742_v51, %v5770_v16 }
  0xbb   : > { %5022 = vmatprep.mubr.msk.bf16.mxu0 %vm384_vm1, %v381_v0  ;;  %v2727_v0 = vsel %vm384_vm1, %v5461_v7, 0  ;;  %v2736_v7 = vsel %vm384_vm1, %v5470_v10, 0  ;;  %v2748_v10 = vsel %vm384_vm1, %v5490_v17, 0 }
  0xbc   : > { %v5747_v49 = vand.u32 4294901760, %v2736_v7  ;;  %v5774_v17 = vand.u32 4294901760, %v2748_v10 }
  0xbe   : > { %8250 = vst [vmem:[#allocation16_spill] sm:$0xff] %v5747_v49  ;;  %v5764_v54 = vsub.f32 %v2736_v7, %v5747_v49  ;;  %8257 = vst [vmem:[#allocation23_spill] sm:$0xff] %v5774_v17  ;;  %v5796_v7 = vsub.f32 %v2745_v9, %v5772_v6 }
  0xc0   : > { %8254 = vst [vmem:[#allocation20_spill] sm:$0xff] %v5764_v54 }
  0xc2   : > { %5023 = vmatmul.mubr.msk.bf16.gmra.mxu0 %vm384_vm1, %v383_v1  ;;  %v5726_v1 = vand.u32 4294901760, %v2727_v0 }
  0xc3   : > { %5062 = vmatprep.mubr.f32.mxu0 %v2884_v53  ;;  %v775_v53 = vlaneseq }
  0xc4   : > { %8246 = vst [vmem:[#allocation12_spill] sm:$0xff] %v5726_v1  ;;  %v5729_v5 = vsub.f32 %v2727_v0, %v5726_v1  ;;  %v5783_v0 = vand.u32 4294901760, %v2754_v55 }
  0xc5   : > { %v776_v20 = vshrl.u32 %v775_v53, 7  ;;  %v2766_v53 = vsel %vm384_vm1, %v5517_v26, 0 }
  0xc6   : > { %8247 = vst [vmem:[#allocation13_spill] sm:$0xff] %v5729_v5  ;;  %v8105_v11 = vand.u32 4294901760, %v5729_v5  ;;  %8260 = vst [vmem:[#allocation26_spill] sm:$0xff] %v5783_v0  ;;  %v5818_v25 = vsub.f32 %v2754_v55, %v5783_v0  ;;  %v2769_v55 = vsel %vm384_vm1, %v5523_v28, 0  ;;  %v2781_v0 = vsel %vm384_vm1, %v5541_v34, 0 }
  0xc7   : > { %v5822_v26 = vsub.s32 1, %v776_v20  ;;  %v2787_v28 = vsel %vm384_vm1, %v5550_v37, 0  ;;  %v5858_v34 = vand.u32 4294901760, %v2769_v55  ;;  %v722_v37 = vld [vmem:[#allocation2 + $0x8] sm:$0xff]  ;;  %v5869_v6 = vand.u32 4294901760, %v2781_v0 }
  0xc8   : > { %v2923_v12 = vsub.f32 %v5729_v5, %v8105_v11  ;;  %v5879_v49 = vsub.s32 0, %v776_v20 }
  0xc9   : > { %8265 = vst [vmem:[#allocation31_spill] sm:$0xff] %v5858_v34  ;;  %8269 = vst [vmem:[#allocation35_spill] sm:$0xff] %v5869_v6 }
  0xca   : > { %5063 = vmatmul.mubr.f32.vlgmr.msra.gmra.mxu0 %v2894_v52  ;;  %v2924_v15 = vand.u32 4294901760, %v2923_v12  ;;  %v5758_v52 = vsub.f32 %v2730_v18, %v5741_v30  ;;  %v5787_v12 = vand.u32 4294901760, %v2757_v61  ;;  %v5892_v30 = vsub.f32 %v2769_v55, %v5858_v34 }
  0xcb   : > { %5161 = vmatpush3.msra.mxu0 %v3232_v3  ;;  %5065 = vmatprep.mubr.f32.mxu0 %v2904_v62  ;;  %v2739_v3 = vsel %vm384_vm1, %v5478_v13, 0  ;;  %v5761_v13 = vsub.f32 %v2733_v21, %v5745_v42  ;;  %v8110_v21 = vand.u32 4294901760, %v5764_v54 }
  0xcc   : > { %5260 = vmatprep.subr.mxu0 %v5682_v36  ;;  %v5751_v8 = vand.u32 4294901760, %v2739_v3  ;;  %8252 = vst [vmem:[#allocation18_spill] sm:$0xff] %v5758_v52  ;;  %8261 = vst [vmem:[#allocation27_spill] sm:$0xff] %v5787_v12 }
  0xcd   : > { %8253 = vst [vmem:[#allocation19_spill] sm:$0xff] %v5761_v13  ;;  %v8109_v18 = vand.u32 4294901760, %v5761_v13  ;;  %v2953_v9 = vsub.f32 %v5764_v54, %v8110_v21 }
  0xce   : > { %5066 = vmatmul.mubr.f32.gmra.mxu0 %v2914_v63  ;;  %8251 = vst [vmem:[#allocation17_spill] sm:$0xff] %v5751_v8  ;;  %v5779_v62 = vsub.f32 %v2739_v3, %v5751_v8  ;;  %v5781_v63 = vand.u32 4294901760, %v2751_v14  ;;  %v5799_v3 = vsub.f32 %v2748_v10, %v5774_v17  ;;  %v5865_v17 = vsub.f32 %v2763_v23, %v5827_v4  ;;  %v723_v8 = vld [vmem:[#allocation2 + $0x10] sm:$0x3] }
  0xcf   : > { %5068 = vmatprep.mubr.f32.mxu0 %v2924_v15  ;;  %v8107_v15 = vand.u32 4294901760, %v5758_v52  ;;  %v2943_v51 = vsub.f32 %v5761_v13, %v8109_v18  ;;  %v630_v18 = vld [vmem:[%s8100_s3] sm:$0x7]  ;;  %v2796_v23 = vsel %vm384_vm1, %v5562_v41, 0 }
  0xd0   : > { %8258 = vst [vmem:[#allocation24_spill] sm:$0xff] %v5779_v62  ;;  %8259 = vst [vmem:[#allocation25_spill] sm:$0xff] %v5781_v63  ;;  %v5815_v10 = vsub.f32 %v2751_v14, %v5781_v63  ;;  %v5832_v14 = vand.u32 4294901760, %v2766_v53  ;;  %v5851_v63 = vrot.slane %v630_v18, %v5822_v26 }
  0xd1   : > { %v2933_v11 = vsub.f32 %v5758_v52, %v8107_v15  ;;  %v5825_v15 = vsub.f32 %v2757_v61, %v5787_v12  ;;  %v2944_v45 = vand.u32 4294901760, %v2943_v51  ;;  %v2775_v61 = vsel %vm384_vm1, %v5532_v31, 0 }
  0xd2   : > { %8264 = vst [vmem:[#allocation30_spill] sm:$0xff] %v5832_v14  ;;  %v2778_v12 = vsel %vm384_vm1, %v5535_v32, 0  ;;  %v2954_v51 = vand.u32 4294901760, %v2953_v9  ;;  %v5853_v31 = vsub.s32 2, %v776_v20  ;;  %v5856_v32 = vsub.f32 %v2760_v19, %v5820_v60  ;;  %v721_v9 = vld [vmem:[#allocation2] sm:$0xff] }
  0xd3   : > { %v2934_v21 = vand.u32 4294901760, %v2933_v11  ;;  %v2784_v11 = vsel %vm384_vm1, %v5544_v35, 0  ;;  %v5860_v35 = vand.u32 4294901760, %v2772_v50  ;;  %v5867_v38 = vand.u32 4294901760, %v2778_v12 }
  0xd4   : > { %v5871_v16 = vand.u32 4294901760, %v2784_v11  ;;  %v5875_v19 = vand.u32 4294901760, %v2790_v29  ;;  %v2793_v60 = vsel %vm384_vm1, %v5559_v40, 0  ;;  %v847_v4 = vmul.f32 %v5851_v63, %v721_v9 }
  0xd5   : > { %5069 = vmatmul.mubr.f32.gmra.mxu0 %v2934_v21  ;;  %8266 = vst [vmem:[#allocation32_spill] sm:$0xff] %v5860_v35  ;;  %v5862_v21 = vand.u32 4294901760, %v2775_v61  ;;  %8268 = vst [vmem:[#allocation34_spill] sm:$0xff] %v5867_v38  ;;  %v848_v54 = vmul.f32 %v5851_v63, %v722_v37  ;;  %v5886_v42 = vrot.slane %v630_v18, %v5853_v31  ;;  %v5913_v34 = vand.u32 4294901760, %v2793_v60 }
  0xd6   : > { %5071 = vmatprep.mubr.f32.mxu0 %v2944_v45  ;;  %8270 = vst [vmem:[#allocation36_spill] sm:$0xff] %v5871_v16  ;;  %v5873_v45 = vand.u32 4294901760, %v2787_v28  ;;  %8272 = vst [vmem:[#allocation38_spill] sm:$0xff] %v5875_v19  ;;  %v5889_v13 = vsub.f32 %v2766_v53, %v5832_v14  ;;  %v5895_v40 = vsub.f32 %v2772_v50, %v5860_v35  ;;  %v5915_v50 = vand.u32 4294901760, %v2796_v23 }
  0xd7   : > { %8267 = vst [vmem:[#allocation33_spill] sm:$0xff] %v5862_v21  ;;  %v5898_v20 = vsub.f32 %v2775_v61, %v5862_v21  ;;  %v5901_v41 = vsub.f32 %v2778_v12, %v5867_v38  ;;  %v5907_v52 = vsub.f32 %v2784_v11, %v5871_v16  ;;  %v849_v53 = vmul.f32 %v5851_v63, %v723_v8  ;;  %v5920_v12 = vld [vmem:[%s8099_s2] ss:$0 sm:$0xff] }
  0xd8   : > { %8271 = vst [vmem:[#allocation37_spill] sm:$0xff] %v5873_v45  ;;  %v5911_v55 = vsub.f32 %v2787_v28, %v5873_v45  ;;  %8278 = vst [vmem:[#allocation44_spill] sm:$0xff] %v5913_v34  ;;  %v5926_v61 = vsub.f32 %v2790_v29, %v5875_v19  ;;  %v944_v11 = vrot.slane %v847_v4, 1  ;;  %v945_v16 = vrot.slane %v848_v54, 1 }
  0xd9   : > { %5072 = vmatmul.mubr.f32.gmra.mxu0 %v2954_v51  ;;  %8273 = vst [vmem:[#allocation39_spill] sm:$0xff] %v5898_v20  ;;  %8274 = vst [vmem:[#allocation40_spill] sm:$0xff] %v5901_v41  ;;  %v5904_v51 = vsub.f32 %v2781_v0, %v5869_v6  ;;  %v5923_v0 = vrot.slane %v630_v18, %v5879_v49  ;;  %v1092_v28 = vmul.f32 %v5886_v42, %v721_v9 }
  0xda   : > { %8276 = vst [vmem:[#allocation42_spill] sm:$0xff] %v5907_v52  ;;  %8277 = vst [vmem:[#allocation43_spill] sm:$0xff] %v5911_v55  ;;  %v2799_v45 = vsel %vm384_vm1, %v5568_v43, 0  ;;  %v2802_v6 = vsel %vm384_vm1, %v5571_v44, 0  ;;  %v1093_v21 = vmul.f32 %v5886_v42, %v722_v37  ;;  %v2805_v18 = vsel %vm384_vm1, %v5577_v46, 0 }
  0xdb   : > { %8275 = vst [vmem:[#allocation41_spill] sm:$0xff] %v5904_v51  ;;  %8279 = vst [vmem:[#allocation45_spill] sm:$0xff] %v5915_v50  ;;  %v947_v19 = vrot.slane %v849_v53, 1  ;;  %v1094_v4 = vmul.f32 %v5886_v42, %v723_v8  ;;  %v5939_v54 = vsub.f32 %v2793_v60, %v5913_v34  ;;  %v5942_v43 = vsub.f32 %v2796_v23, %v5915_v50 }
  0xdc   : > { %8280 = vst [vmem:[#allocation46_spill] sm:$0xff] %v5926_v61  ;;  %v2808_v44 = vsel %vm384_vm1, %v5580_v47, 0  ;;  %v779_v14 = vmul.f32 %v5923_v0, %v721_v9  ;;  %v1189_v53 = vrot.slane %v1092_v28, 2  ;;  %v780_v8 = vmul.f32 %v5923_v0, %v722_v37  ;;  %v632_v9 = vld [vmem:[%s8100_s3 + $0x8] sm:$0x7] }
  0xdd   : > { %8281 = vst [vmem:[#allocation47_spill] sm:$0xff] %v5939_v54  ;;  %8282 = vst [vmem:[#allocation48_spill] sm:$0xff] %v5942_v43  ;;  %v1190_v60 = vrot.slane %v1093_v21, 2  ;;  %v8174_v23 = vand.u32 4294901760, %v5779_v62  ;;  %v5957_v28 = vand.u32 4294901760, %v2799_v45  ;;  %v5961_v37 = vand.u32 4294901760, %v2805_v18 }
  0xde   : > { %v5975_v36 = vrot.slane %v632_v9, %v5879_v49 }
  0xdf   : > { %8283 = vst [vmem:[#allocation49_spill] sm:$0xff] %v5957_v28  ;;  %8285 = vst [vmem:[#allocation51_spill] sm:$0xff] %v5961_v37  ;;  %v1191_v59 = vsel %vm1188_vm5, %v1189_v53, %v1190_v60 }
 0x14a   : > { %v4996_v38 = vpop.f32.mrf.mxu0 }
 0x14b   : > { %v480_v29 = vadd.f32 %v4996_v38, %v5920_v12  ;;  %v946_v38 = vsel %vm943_vm4, %v944_v11, %v945_v16  ;;  %v1192_v11 = vrot.slane %v1094_v4, 2 }
 0x14c   : > { %v471_v35 = vpop.f32.mrf.mxu0 }
 0x14d   : > { %v600_v1 = vmax.f32 %v480_v29, 0.0  ;;  %v472_v46 = vadd.f32 %v5920_v12, %v471_v35  ;;  %v948_v35 = vsel %vm943_vm4, %v945_v16, %v947_v19  ;;  %v5959_v29 = vand.u32 4294901760, %v2802_v6  ;;  %v631_v16 = vld [vmem:[%s8100_s3 + $0x4] sm:$0x7] }
 0x14e   : > { %v4997_v5 = vpop.f32.mrf.mxu0  ;;  %v1056_v19 = vadd.f32 %v946_v38, %v779_v14  ;;  %v1057_v57 = vadd.f32 %v948_v35, %v780_v8  ;;  %v5984_v14 = vrot.slane %v631_v16, %v5879_v49  ;;  %v5987_v38 = vrot.slane %v631_v16, %v5822_v26 }
 0x14f   : > { %691 = vst.msk [vmem:[#allocation2 + $0x31] sm:$0xff] %vm384_vm1, %v600_v1  ;;  %v598_v50 = vmax.f32 %v472_v46, 0.0  ;;  %v483_v47 = vadd.f32 %v4997_v5, %v5920_v12  ;;  %8284 = vst [vmem:[#allocation50_spill] sm:$0xff] %v5959_v29  ;;  %v2963_v1 = vsub.f32 %v5779_v62, %v8174_v23  ;;  %v5966_v46 = vand.u32 4294901760, %v2808_v44 }
 0x150   : > { %v474_v21 = vpop.f32.mrf.mxu0  ;;  %v5990_v53 = vrot.slane %v631_v16, %v5853_v31  ;;  %v5993_v8 = vrot.slane %v632_v9, %v5853_v31 }
 0x151   : > { %8286 = vst [vmem:[#allocation52_spill] sm:$0xff] %v5966_v46  ;;  %689 = vst.msk [vmem:[#allocation2 + $0x19] sm:$0xff] %vm384_vm1, %v598_v50  ;;  %v601_v5 = vmax.f32 %v483_v47, 0.0  ;;  %v475_v34 = vadd.f32 %v5920_v12, %v474_v21  ;;  %v2964_v23 = vand.u32 4294901760, %v2963_v1  ;;  %v1193_v47 = vsel %vm1188_vm5, %v1190_v60, %v1192_v11 }
 0x152   : > { %v5000_v4 = vpop.f32.mrf.mxu0  ;;  %v5981_v21 = vrot.slane %v632_v9, %v5822_v26  ;;  %v5999_v60 = vsub.f32 %v2802_v6, %v5959_v29  ;;  %v6004_v26 = vsub.f32 %v2805_v18, %v5961_v37  ;;  %v6007_v11 = vsub.f32 %v2808_v44, %v5966_v46 }
 0x153   : > { %692 = vst.msk [vmem:[#allocation2 + $0x39] sm:$0xff] %vm384_vm1, %v601_v5  ;;  %v599_v62 = vmax.f32 %v475_v34, 0.0  ;;  %v496_v50 = vadd.f32 %v5000_v4, %v5920_v12  ;;  %5074 = vmatprep.mubr.f32.mxu0 %v2964_v23  ;;  %v5996_v34 = vsub.f32 %v2799_v45, %v5957_v28  ;;  %v1301_v23 = vadd.f32 %v1191_v59, %v1056_v19 }
 0x154   : > { %v487_v56 = vpop.f32.mrf.mxu0  ;;  %8288 = vst [vmem:[#allocation54_spill] sm:$0xff] %v5999_v60  ;;  %8289 = vst [vmem:[#allocation55_spill] sm:$0xff] %v6004_v26  ;;  %v1302_v45 = vadd.f32 %v1193_v47, %v1057_v57 }
 0x155   : > { %8287 = vst [vmem:[#allocation53_spill] sm:$0xff] %v5996_v34  ;;  %690 = vst.msk [vmem:[#allocation2 + $0x21] sm:$0xff] %vm384_vm1, %v599_v62  ;;  %v604_v49 = vmax.f32 %v496_v50, 0.0  ;;  %v488_v35 = vadd.f32 %v5920_v12, %v487_v56 }
 0x156   : > { %8290 = vst [vmem:[#allocation56_spill] sm:$0xff] %v6007_v11  ;;  %v5001_v31 = vpop.f32.mrf.mxu0  ;;  %v6009_v9 = vld [vmem:[#allocation2 + $0x30] sm:$0xff] }
 0x157   : > { %695 = vst.msk [vmem:[#allocation2 + $0x61] sm:$0xff] %vm384_vm1, %v604_v49  ;;  %v602_v6 = vmax.f32 %v488_v35, 0.0  ;;  %v499_v1 = vadd.f32 %v5001_v31, %v5920_v12  ;;  %v6015_v62 = vmul.f32 %v5975_v36, %v6009_v9  ;;  %v6019_v56 = vmul.f32 %v5981_v21, %v6009_v9 }
 0x158   : > { %v490_v18 = vpop.f32.mrf.mxu0  ;;  %v6021_v44 = vld [vmem:[#allocation2 + $0x18] sm:$0xff]  ;;  %v6025_v59 = vmul.f32 %v5993_v8, %v6009_v9  ;;  %v6029_v57 = vmul.f32 %v5984_v14, %v6009_v9  ;;  %v6033_v5 = vmul.f32 %v5987_v38, %v6009_v9  ;;  %v6037_v16 = vmul.f32 %v5990_v53, %v6009_v9 }
 0x159   : > { %693 = vst.msk [vmem:[#allocation2 + $0x49] sm:$0xff] %vm384_vm1, %v602_v6  ;;  %v605_v19 = vmax.f32 %v499_v1, 0.0  ;;  %v491_v4 = vadd.f32 %v5920_v12, %v490_v18  ;;  %v1337_v50 = vmul.f32 %v5984_v14, %v6021_v44  ;;  %v1405_v47 = vmul.f32 %v5987_v38, %v6021_v44 }
 0x15a   : > { %v5004_v49 = vpop.f32.mrf.mxu0  ;;  %v6045_v35 = vld [vmem:[#allocation2 + $0x38] sm:$0xff]  ;;  %v6047_v31 = vld [vmem:[#allocation2 + $0x40] sm:$0x3]  ;;  %v1649_v46 = vmul.f32 %v5990_v53, %v6021_v44  ;;  %v2057_v37 = vrot.slane %v6019_v56, 1  ;;  %v6055_v1 = vmul.f32 %v5923_v0, %v6021_v44 }
 0x15b   : > { %696 = vst.msk [vmem:[#allocation2 + $0x69] sm:$0xff] %vm384_vm1, %v605_v19  ;;  %v603_v18 = vmax.f32 %v491_v4, 0.0  ;;  %v512_v29 = vadd.f32 %v5004_v49, %v5920_v12  ;;  %v6061_v28 = vmul.f32 %v5851_v63, %v6047_v31  ;;  %v1369_v58 = vadd.f32 %v1337_v50, %v1301_v23 }
 0x15c   : > { %v503_v24 = vpop.f32.mrf.mxu0  ;;  %v6063_v33 = vld [vmem:[#allocation2 + $0x20] sm:$0xff]  ;;  %v726_v56 = vld [vmem:[#allocation2 + $0x28] sm:$0x3]  ;;  %v1501_v2 = vrot.slane %v1405_v47, 1  ;;  %v1745_v6 = vrot.slane %v1649_v46, 2  ;;  %v6067_v39 = vmul.f32 %v5975_v36, %v6045_v35  ;;  %v1962_v19 = vmul.f32 %v5981_v21, %v6045_v35 }
 0x15d   : > { %694 = vst.msk [vmem:[#allocation2 + $0x51] sm:$0xff] %vm384_vm1, %v603_v18  ;;  %v608_v4 = vmax.f32 %v512_v29, 0.0  ;;  %v504_v49 = vadd.f32 %v5920_v12, %v503_v24  ;;  %v6074_v23 = vmul.f32 %v5851_v63, %v726_v56  ;;  %v6078_v46 = vmul.f32 %v5886_v42, %v726_v56 }
 0x15e   : > { %v5005_v11 = vpop.f32.mrf.mxu0  ;;  %v1338_v47 = vmul.f32 %v5984_v14, %v6063_v33  ;;  %v1406_v26 = vmul.f32 %v5987_v38, %v6063_v33  ;;  %v1407_v18 = vmul.f32 %v5987_v38, %v726_v56  ;;  %v1650_v50 = vmul.f32 %v5990_v53, %v6063_v33 }
 0x15f   : > { %699 = vst.msk [vmem:[#allocation2 + $0x91] sm:$0xff] %vm384_vm1, %v608_v4  ;;  %v606_v24 = vmax.f32 %v504_v49, 0.0  ;;  %v515_v29 = vadd.f32 %v5005_v11, %v5920_v12  ;;  %v1651_v4 = vmul.f32 %v5990_v53, %v726_v56  ;;  %v1963_v20 = vmul.f32 %v5981_v21, %v6047_v31 }
 0x160   : > { %v506_v34 = vpop.f32.mrf.mxu0  ;;  %v1370_v54 = vadd.f32 %v1338_v47, %v1302_v45  ;;  %v1502_v61 = vrot.slane %v1406_v26, 1  ;;  %v1504_v55 = vrot.slane %v1407_v18, 1  ;;  %v1746_v49 = vrot.slane %v1650_v50, 2 }
 0x161   : > { %697 = vst.msk [vmem:[#allocation2 + $0x79] sm:$0xff] %vm384_vm1, %v606_v24  ;;  %v609_v52 = vmax.f32 %v515_v29, 0.0  ;;  %v507_v51 = vadd.f32 %v5920_v12, %v506_v34  ;;  %v2058_v43 = vrot.slane %v1962_v19, 1  ;;  %v1748_v50 = vrot.slane %v1651_v4, 2 }
 0x162   : > { %v5008_v11 = vpop.f32.mrf.mxu0  ;;  %v1503_v60 = vsel %vm943_vm4, %v1501_v2, %v1502_v61  ;;  %v1505_v41 = vsel %vm943_vm4, %v1502_v61, %v1504_v55  ;;  %v1747_v56 = vsel %vm1188_vm5, %v1745_v6, %v1746_v49  ;;  %v2060_v2 = vrot.slane %v1963_v20, 1 }
 0x163   : > { %700 = vst.msk [vmem:[#allocation2 + $0x99] sm:$0xff] %vm384_vm1, %v609_v52  ;;  %v607_v26 = vmax.f32 %v507_v51, 0.0  ;;  %v528_v45 = vadd.f32 %v5008_v11, %v5920_v12  ;;  %v1613_v47 = vadd.f32 %v1503_v60, %v1369_v58  ;;  %v1614_v18 = vadd.f32 %v1505_v41, %v1370_v54 }
 0x164   : > { %v519_v34 = vpop.f32.mrf.mxu0  ;;  %v2059_v24 = vsel %vm943_vm4, %v2057_v37, %v2058_v43  ;;  %v2206_v52 = vmul.f32 %v5993_v8, %v6045_v35  ;;  %v1749_v58 = vsel %vm1188_vm5, %v1746_v49, %v1748_v50  ;;  %v2061_v41 = vsel %vm943_vm4, %v2058_v43, %v2060_v2 }
 0x165   : > { %698 = vst.msk [vmem:[#allocation2 + $0x81] sm:$0xff] %vm384_vm1, %v607_v26  ;;  %v612_v55 = vmax.f32 %v528_v45, 0.0  ;;  %v520_v61 = vadd.f32 %v5920_v12, %v519_v34  ;;  %v1857_v19 = vadd.f32 %v1747_v56, %v1613_v47  ;;  %v2207_v54 = vmul.f32 %v5993_v8, %v6047_v31 }
 0x166   : > { %v5009_v51 = vpop.f32.mrf.mxu0  ;;  %v782_v20 = vmul.f32 %v5923_v0, %v6063_v33  ;;  %v1858_v6 = vadd.f32 %v1749_v58, %v1614_v18  ;;  %v2302_v11 = vrot.slane %v2206_v52, 2  ;;  %v850_v43 = vmul.f32 %v5851_v63, %v6021_v44 }
 0x167   : > { %703 = vst.msk [vmem:[#allocation2 + $0xc1] sm:$0xff] %vm384_vm1, %v612_v55  ;;  %v610_v37 = vmax.f32 %v520_v61, 0.0  ;;  %v531_v60 = vadd.f32 %v5009_v51, %v5920_v12  ;;  %v1925_v29 = vadd.f32 %v6015_v62, %v1857_v19  ;;  %v2304_v26 = vrot.slane %v2207_v54, 2 }
 0x168   : > { %v522_v4 = vpop.f32.mrf.mxu0  ;;  %v851_v49 = vmul.f32 %v5851_v63, %v6063_v33  ;;  %v1926_v34 = vadd.f32 %v6067_v39, %v1858_v6  ;;  %v8291_v62 = vrot.slane %v6025_v59, 2  ;;  %v949_v55 = vrot.slane %v850_v43, 1 }
 0x169   : > { %701 = vst.msk [vmem:[#allocation2 + $0xa9] sm:$0xff] %vm384_vm1, %v610_v37  ;;  %v613_v45 = vmax.f32 %v531_v60, 0.0  ;;  %v523_v47 = vadd.f32 %v5920_v12, %v522_v4  ;;  %v2169_v56 = vadd.f32 %v2059_v24, %v1925_v29  ;;  %v2305_v2 = vsel %vm1188_vm5, %v2302_v11, %v2304_v26 }
 0x16a   : > { %v5012_v18 = vpop.f32.mrf.mxu0  ;;  %v2303_v50 = vsel %vm1188_vm5, %v8291_v62, %v2302_v11  ;;  %v950_v61 = vrot.slane %v851_v49, 1  ;;  %v2170_v51 = vadd.f32 %v2061_v41, %v1926_v34  ;;  %v8292_v24 = vrot.slane %v6074_v23, 1 }
 0x16b   : > { %704 = vst.msk [vmem:[#allocation2 + $0xc9] sm:$0xff] %vm384_vm1, %v613_v45  ;;  %v611_v19 = vmax.f32 %v523_v47, 0.0  ;;  %v544_v52 = vadd.f32 %v5012_v18, %v5920_v12  ;;  %v2413_v58 = vadd.f32 %v2303_v50, %v2169_v56  ;;  %v1095_v37 = vmul.f32 %v5886_v42, %v6021_v44 }
 0x16c   : > { %v535_v54 = vpop.f32.mrf.mxu0  ;;  %v951_v39 = vsel %vm943_vm4, %v949_v55, %v950_v61  ;;  %v953_v59 = vsel %vm943_vm4, %v950_v61, %v8292_v24  ;;  %v1096_v60 = vmul.f32 %v5886_v42, %v6063_v33  ;;  %v2414_v41 = vadd.f32 %v2305_v2, %v2170_v51  ;;  %v6163_v24 = vld [vmem:[#allocation2 + $0x50] sm:$0xff] }
 0x16d   : > { %702 = vst.msk [vmem:[#allocation2 + $0xb1] sm:$0xff] %vm384_vm1, %v611_v19  ;;  %v616_v6 = vmax.f32 %v544_v52, 0.0  ;;  %v536_v29 = vadd.f32 %v5920_v12, %v535_v54  ;;  %v1058_v4 = vadd.f32 %v951_v39, %v6055_v1  ;;  %v1059_v26 = vadd.f32 %v953_v59, %v782_v20  ;;  %v6161_v39 = vld [vmem:[#allocation2 + $0x48] sm:$0xff] }
 0x16e   : > { %v5013_v11 = vpop.f32.mrf.mxu0  ;;  %v1194_v43 = vrot.slane %v1095_v37, 2  ;;  %v1195_v23 = vrot.slane %v1096_v60, 2  ;;  %v1340_v49 = vmul.f32 %v5984_v14, %v6045_v35  ;;  %v2445_v45 = vpack.c.bf16 %v2414_v41, %v2413_v58 }
 0x16f   : > { %707 = vst.msk [vmem:[#allocation2 + $0xf1] sm:$0xff] %vm384_vm1, %v616_v6  ;;  %v614_v44 = vmax.f32 %v536_v29, 0.0  ;;  %v547_v33 = vadd.f32 %v5013_v11, %v5920_v12  ;;  %v1409_v47 = vmul.f32 %v5987_v38, %v6045_v35  ;;  %v8293_v1 = vrot.slane %v6078_v46, 2 }
 0x170   : > { %v538_v34 = vpop.f32.mrf.mxu0  ;;  %v1196_v56 = vsel %vm1188_vm5, %v1194_v43, %v1195_v23  ;;  %v1410_v18 = vmul.f32 %v5987_v38, %v6047_v31  ;;  %v1506_v62 = vrot.slane %v6033_v5, 1  ;;  %5028 = vmatprep.mubr.msk.bf16.mxu1 %vm384_vm1, %v2445_v45  ;;  %v1653_v46 = vmul.f32 %v5990_v53, %v6045_v35  ;;  %v6171_v43 = vld [vmem:[#allocation2 + $0x58] sm:$0x3] }
 0x171   : > { %v1198_v20 = vsel %vm1188_vm5, %v1195_v23, %v8293_v1  ;;  %705 = vst.msk [vmem:[#allocation2 + $0xd9] sm:$0xff] %vm384_vm1, %v614_v44  ;;  %v617_v50 = vmax.f32 %v547_v33, 0.0  ;;  %v539_v2 = vadd.f32 %v5920_v12, %v538_v34  ;;  %v1303_v55 = vadd.f32 %v1196_v56, %v1058_v4 }
 0x172   : > { %v1304_v61 = vadd.f32 %v1198_v20, %v1059_v26  ;;  %v5016_v19 = vpop.f32.mrf.mxu0  ;;  %v1507_v52 = vrot.slane %v1409_v47, 1  ;;  %v1509_v51 = vrot.slane %v1410_v18, 1  ;;  %v1654_v58 = vmul.f32 %v5990_v53, %v6047_v31 }
 0x173   : > { %708 = vst.msk [vmem:[#allocation2 + $0xf9] sm:$0xff] %vm384_vm1, %v617_v50  ;;  %v615_v5 = vmax.f32 %v539_v2, 0.0  ;;  %v560_v54 = vadd.f32 %v5016_v19, %v5920_v12  ;;  %v1371_v59 = vadd.f32 %v6029_v57, %v1303_v55  ;;  %v1750_v41 = vrot.slane %v6037_v16, 2 }
 0x174   : > { %v1372_v37 = vadd.f32 %v1340_v49, %v1304_v61  ;;  %v551_v60 = vpop.f32.mrf.mxu0  ;;  %v1508_v6 = vsel %vm943_vm4, %v1506_v62, %v1507_v52  ;;  %v1510_v29 = vsel %vm943_vm4, %v1507_v52, %v1509_v51  ;;  %v1751_v4 = vrot.slane %v1653_v46, 2 }
 0x175   : > { %706 = vst.msk [vmem:[#allocation2 + $0xe1] sm:$0xff] %vm384_vm1, %v615_v5  ;;  %v620_v11 = vmax.f32 %v560_v54, 0.0  ;;  %v552_v26 = vadd.f32 %v5920_v12, %v551_v60  ;;  %v1615_v23 = vadd.f32 %v1508_v6, %v1371_v59  ;;  %v1753_v49 = vrot.slane %v1654_v58, 2 }
 0x176   : > { %v1616_v44 = vadd.f32 %v1510_v29, %v1372_v37  ;;  %v1752_v57 = vsel %vm1188_vm5, %v1750_v41, %v1751_v4  ;;  %v1895_v33 = vmul.f32 %v5975_v36, %v6161_v39  ;;  %v1896_v45 = vmul.f32 %v5975_v36, %v6163_v24  ;;  %v5017_v50 = vpop.f32.mrf.mxu0 }
 0x177   : > { %711 = vst.msk [vmem:[#allocation2 + $0x121] sm:$0xff] %vm384_vm1, %v620_v11  ;;  %v618_v16 = vmax.f32 %v552_v26, 0.0  ;;  %v1859_v47 = vadd.f32 %v1752_v57, %v1615_v23  ;;  %v1964_v34 = vmul.f32 %v5981_v21, %v6161_v39  ;;  %v1965_v56 = vmul.f32 %v5981_v21, %v6163_v24 }
 0x178   : > { %v1754_v1 = vsel %vm1188_vm5, %v1751_v4, %v1753_v49  ;;  %v1966_v20 = vmul.f32 %v5981_v21, %v6171_v43  ;;  %v2208_v18 = vmul.f32 %v5993_v8, %v6161_v39  ;;  %v2209_v62 = vmul.f32 %v5993_v8, %v6163_v24 }
 0x179   : > { %709 = vst.msk [vmem:[#allocation2 + $0x109] sm:$0xff] %vm384_vm1, %v618_v16  ;;  %v1860_v2 = vadd.f32 %v1754_v1, %v1616_v44  ;;  %v1927_v55 = vadd.f32 %v1895_v33, %v1859_v47  ;;  %v2062_v61 = vrot.slane %v1964_v34, 1  ;;  %v2063_v19 = vrot.slane %v1965_v56, 1 }
 0x17a   : > { %v2065_v52 = vrot.slane %v1966_v20, 1  ;;  %v2210_v51 = vmul.f32 %v5993_v8, %v6171_v43  ;;  %v2306_v46 = vrot.slane %v2208_v18, 2  ;;  %v2307_v58 = vrot.slane %v2209_v62, 2 }
 0x17b   : > { %v1928_v5 = vadd.f32 %v1896_v45, %v1860_v2  ;;  %v2064_v54 = vsel %vm943_vm4, %v2062_v61, %v2063_v19  ;;  %v563_v59 = vadd.f32 %v5017_v50, %v5920_v12  ;;  %v783_v37 = vmul.f32 %v5923_v0, %v6009_v9 }
 0x17c   : > { %v2066_v60 = vsel %vm943_vm4, %v2063_v19, %v2065_v52  ;;  %v2171_v6 = vadd.f32 %v2064_v54, %v1927_v55  ;;  %v2308_v29 = vsel %vm1188_vm5, %v2306_v46, %v2307_v58  ;;  %v2309_v41 = vrot.slane %v2210_v51, 2  ;;  %v6228_v52 = vld [vmem:[#allocation2 + $0x60] sm:$0xff]  ;;  %v554_v54 = vpop.f32.mrf.mxu0 }
 0x17d   : > { %v2172_v4 = vadd.f32 %v2066_v60, %v1928_v5  ;;  %v621_v11 = vmax.f32 %v563_v59, 0.0  ;;  %v784_v26 = vmul.f32 %v5923_v0, %v6045_v35  ;;  %v853_v23 = vmul.f32 %v5851_v63, %v6009_v9 }
 0x17e   : > { %v2310_v44 = vsel %vm1188_vm5, %v2307_v58, %v2309_v41  ;;  %v2415_v57 = vadd.f32 %v2308_v29, %v2171_v6  ;;  %v854_v49 = vmul.f32 %v5851_v63, %v6045_v35  ;;  %v1098_v33 = vmul.f32 %v5886_v42, %v6009_v9  ;;  %v6235_v29 = vld [vmem:[#allocation2 + $0x68] sm:$0xff]  ;;  %v6237_v41 = vld [vmem:[#allocation2 + $0x70] sm:$0x3] }
 0x17f   : > { %v2416_v45 = vadd.f32 %v2310_v44, %v2172_v4  ;;  %712 = vst.msk [vmem:[#allocation2 + $0x129] sm:$0xff] %vm384_vm1, %v621_v11  ;;  %v954_v16 = vrot.slane %v853_v23, 1  ;;  %v1099_v47 = vmul.f32 %v5886_v42, %v6045_v35  ;;  %v1100_v34 = vmul.f32 %v5886_v42, %v6047_v31 }
 0x180   : > { %v955_v56 = vrot.slane %v854_v49, 1  ;;  %v1199_v1 = vrot.slane %v1098_v33, 2  ;;  %v1341_v20 = vmul.f32 %v5984_v14, %v6161_v39  ;;  %v1342_v18 = vmul.f32 %v5984_v14, %v6163_v24 }
 0x181   : > { %v2446_v62 = vpack.c.bf16 %v2416_v45, %v2415_v57  ;;  %v1200_v9 = vrot.slane %v1099_v47, 2  ;;  %v1202_v50 = vrot.slane %v1100_v34, 2  ;;  %v1411_v2 = vmul.f32 %v5987_v38, %v6161_v39  ;;  %v5020_v47 = vpop.f32.mrf.mxu0 }
 0x182   : > { %v956_v55 = vsel %vm943_vm4, %v954_v16, %v955_v56  ;;  %v8294_v35 = vrot.slane %v6061_v28, 1  ;;  %v1412_v61 = vmul.f32 %v5987_v38, %v6163_v24  ;;  %v1413_v19 = vmul.f32 %v5987_v38, %v6171_v43 }
 0x183   : > { %5029 = vmatmul.mubr.msk.bf16.vlgmr.msra.gmra.mxu1 %vm384_vm1, %v2446_v62  ;;  %v1060_v51 = vadd.f32 %v956_v55, %v783_v37  ;;  %v1201_v58 = vsel %vm1188_vm5, %v1199_v1, %v1200_v9  ;;  %v1203_v5 = vsel %vm1188_vm5, %v1200_v9, %v1202_v50  ;;  %v1511_v28 = vrot.slane %v1411_v2, 1 }
 0x184   : > { %v958_v31 = vsel %vm943_vm4, %v955_v56, %v8294_v35  ;;  %5111 = vmatpush3.msra.mxu1 %v5688_v48  ;;  %v1512_v59 = vrot.slane %v1412_v61, 1  ;;  %v1514_v60 = vrot.slane %v1413_v19, 1  ;;  %v1655_v6 = vmul.f32 %v5990_v53, %v6161_v39 }
 0x185   : > { %v1061_v46 = vadd.f32 %v958_v31, %v784_v26  ;;  %v1305_v4 = vadd.f32 %v1201_v58, %v1060_v51  ;;  %v1656_v11 = vmul.f32 %v5990_v53, %v6163_v24  ;;  %v1657_v26 = vmul.f32 %v5990_v53, %v6171_v43  ;;  %5210 = vmatprep.subr.mxu1 %v5672_v27  ;;  %v567_v58 = vpop.f32.mrf.mxu0 }
 0x186   : > { %v1513_v48 = vsel %vm943_vm4, %v1511_v28, %v1512_v59  ;;  %v1515_v23 = vsel %vm943_vm4, %v1512_v59, %v1514_v60  ;;  %v1755_v44 = vrot.slane %v1655_v6, 2  ;;  %v1897_v57 = vmul.f32 %v5975_v36, %v6228_v52 }
 0x187   : > { %v1306_v37 = vadd.f32 %v1203_v5, %v1061_v46  ;;  %v1373_v49 = vadd.f32 %v1341_v20, %v1305_v4  ;;  %v1756_v45 = vrot.slane %v1656_v11, 2  ;;  %v1758_v16 = vrot.slane %v1657_v26, 2 }
 0x188   : > { %v1898_v34 = vmul.f32 %v5975_v36, %v6235_v29  ;;  %v1967_v56 = vmul.f32 %v5981_v21, %v6228_v52  ;;  %v1968_v1 = vmul.f32 %v5981_v21, %v6235_v29  ;;  %v1969_v62 = vmul.f32 %v5981_v21, %v6237_v41 }
 0x189   : > { %v1374_v33 = vadd.f32 %v1342_v18, %v1306_v37  ;;  %v1617_v9 = vadd.f32 %v1513_v48, %v1373_v49  ;;  %v1757_v20 = vsel %vm1188_vm5, %v1755_v44, %v1756_v45  ;;  %v1759_v18 = vsel %vm1188_vm5, %v1756_v45, %v1758_v16 }
 0x18a   : > { %v2067_v2 = vrot.slane %v1967_v56, 1  ;;  %v2068_v55 = vrot.slane %v1968_v1, 1  ;;  %v2070_v35 = vrot.slane %v1969_v62, 1  ;;  %v2211_v31 = vmul.f32 %v5993_v8, %v6228_v52 }
 0x18b   : > { %v1618_v50 = vadd.f32 %v1515_v23, %v1374_v33  ;;  %v1861_v61 = vadd.f32 %v1757_v20, %v1617_v9  ;;  %v2212_v51 = vmul.f32 %v5993_v8, %v6235_v29  ;;  %v2213_v46 = vmul.f32 %v5993_v8, %v6237_v41 }
 0x18c   : > { %v2069_v5 = vsel %vm943_vm4, %v2067_v2, %v2068_v55  ;;  %v2071_v28 = vsel %vm943_vm4, %v2068_v55, %v2070_v35  ;;  %v2311_v59 = vrot.slane %v2211_v31, 2  ;;  %v555_v60 = vadd.f32 %v5920_v12, %v554_v54 }
 0x18d   : > { %v1862_v19 = vadd.f32 %v1759_v18, %v1618_v50  ;;  %v1929_v6 = vadd.f32 %v1897_v57, %v1861_v61  ;;  %v2312_v37 = vrot.slane %v2212_v51, 2  ;;  %v2314_v11 = vrot.slane %v2213_v46, 2 }
 0x18e   : > { %v619_v26 = vmax.f32 %v555_v60, 0.0  ;;  %v576_v48 = vadd.f32 %v5020_v47, %v5920_v12  ;;  %v568_v23 = vadd.f32 %v5920_v12, %v567_v58  ;;  %v785_v44 = vmul.f32 %v5923_v0, %v6161_v39 }
 0x18f   : > { %v1930_v4 = vadd.f32 %v1898_v34, %v1862_v19  ;;  %v2173_v49 = vadd.f32 %v2069_v5, %v1929_v6  ;;  %v2313_v45 = vsel %vm1188_vm5, %v2311_v59, %v2312_v37  ;;  %v2315_v16 = vsel %vm1188_vm5, %v2312_v37, %v2314_v11 }
 0x190   : > { %710 = vst.msk [vmem:[#allocation2 + $0x111] sm:$0xff] %vm384_vm1, %v619_v26  ;;  %v624_v54 = vmax.f32 %v576_v48, 0.0  ;;  %v622_v57 = vmax.f32 %v568_v23, 0.0  ;;  %v786_v34 = vmul.f32 %v5923_v0, %v6163_v24  ;;  %v856_v47 = vmul.f32 %v5851_v63, %v6161_v39  ;;  %v6309_v23 = vld [vmem:[#allocation2 + $0x80] sm:$0xff] }
 0x191   : > { %v2174_v33 = vadd.f32 %v2071_v28, %v1930_v4  ;;  %v2417_v56 = vadd.f32 %v2313_v45, %v2173_v49  ;;  %v857_v62 = vmul.f32 %v5851_v63, %v6163_v24  ;;  %v858_v9 = vmul.f32 %v5851_v63, %v6171_v43  ;;  %v6301_v28 = vld [vmem:[#allocation2 + $0x78] sm:$0xff] }
 0x192   : > { %715 = vst.msk [vmem:[#allocation2 + $0x151] sm:$0xff] %vm384_vm1, %v624_v54  ;;  %713 = vst.msk [vmem:[#allocation2 + $0x139] sm:$0xff] %vm384_vm1, %v622_v57  ;;  %v959_v50 = vrot.slane %v856_v47, 1  ;;  %v1101_v20 = vmul.f32 %v5886_v42, %v6161_v39  ;;  %v1102_v18 = vmul.f32 %v5886_v42, %v6163_v24  ;;  %v1103_v2 = vmul.f32 %v5886_v42, %v6171_v43  ;;  %v6318_v47 = vld [vmem:[#allocation2 + $0x88] sm:$0x3] }
 0x193   : > { %v2418_v1 = vadd.f32 %v2315_v16, %v2174_v33  ;;  %v960_v35 = vrot.slane %v857_v62, 1  ;;  %v962_v31 = vrot.slane %v858_v9, 1  ;;  %v1343_v61 = vmul.f32 %v5984_v14, %v6228_v52 }
 0x194   : > { %v1204_v19 = vrot.slane %v1101_v20, 2  ;;  %v1205_v51 = vrot.slane %v1102_v18, 2  ;;  %v1207_v46 = vrot.slane %v1103_v2, 2  ;;  %v1344_v58 = vmul.f32 %v5984_v14, %v6235_v29 }
 0x195   : > { %v2447_v55 = vpack.c.bf16 %v2418_v1, %v2417_v56  ;;  %v961_v39 = vsel %vm943_vm4, %v959_v50, %v960_v35  ;;  %v963_v24 = vsel %vm943_vm4, %v960_v35, %v962_v31  ;;  %v1414_v43 = vmul.f32 %v5987_v38, %v6228_v52 }
 0x196   : > { %v1415_v5 = vmul.f32 %v5987_v38, %v6235_v29  ;;  %v1062_v59 = vadd.f32 %v961_v39, %v785_v44  ;;  %v1063_v60 = vadd.f32 %v963_v24, %v786_v34  ;;  %v1206_v6 = vsel %vm1188_vm5, %v1204_v19, %v1205_v51  ;;  %v5021_v19 = vpop.f32.mrf.mxu0 }
 0x197   : > { %5032 = vmatprep.mubr.msk.bf16.mxu1 %vm384_vm1, %v2447_v55  ;;  %v1208_v4 = vsel %vm1188_vm5, %v1205_v51, %v1207_v46  ;;  %v1416_v37 = vmul.f32 %v5987_v38, %v6237_v41  ;;  %v1516_v11 = vrot.slane %v1414_v43, 1  ;;  %v1658_v48 = vmul.f32 %v5990_v53, %v6228_v52 }
 0x198   : > { %v1517_v26 = vrot.slane %v1415_v5, 1  ;;  %v1307_v49 = vadd.f32 %v1206_v6, %v1062_v59  ;;  %v1308_v33 = vadd.f32 %v1208_v4, %v1063_v60  ;;  %v1659_v44 = vmul.f32 %v5990_v53, %v6235_v29 }
 0x199   : > { %v1660_v45 = vmul.f32 %v5990_v53, %v6237_v41  ;;  %v1519_v54 = vrot.slane %v1416_v37, 1  ;;  %v1760_v57 = vrot.slane %v1658_v48, 2  ;;  %v1899_v34 = vmul.f32 %v5975_v36, %v6301_v28 }
 0x19a   : > { %v1518_v16 = vsel %vm943_vm4, %v1516_v11, %v1517_v26  ;;  %v1375_v56 = vadd.f32 %v1343_v61, %v1307_v49  ;;  %v1376_v1 = vadd.f32 %v1344_v58, %v1308_v33  ;;  %v1761_v62 = vrot.slane %v1659_v44, 2 }
 0x19b   : > { %v1763_v9 = vrot.slane %v1660_v45, 2  ;;  %v1520_v50 = vsel %vm943_vm4, %v1517_v26, %v1519_v54  ;;  %v1900_v20 = vmul.f32 %v5975_v36, %v6309_v23  ;;  %v1970_v18 = vmul.f32 %v5981_v21, %v6301_v28 }
 0x19c   : > { %v1971_v2 = vmul.f32 %v5981_v21, %v6309_v23  ;;  %v1619_v55 = vadd.f32 %v1518_v16, %v1375_v56  ;;  %v1620_v35 = vadd.f32 %v1520_v50, %v1376_v1  ;;  %v1762_v31 = vsel %vm1188_vm5, %v1760_v57, %v1761_v62 }
 0x19d   : > { %v1764_v61 = vsel %vm1188_vm5, %v1761_v62, %v1763_v9  ;;  %v1972_v51 = vmul.f32 %v5981_v21, %v6318_v47  ;;  %v2072_v46 = vrot.slane %v1970_v18, 1  ;;  %v2214_v39 = vmul.f32 %v5993_v8, %v6301_v28 }
 0x19e   : > { %v2073_v58 = vrot.slane %v1971_v2, 1  ;;  %v1863_v24 = vadd.f32 %v1762_v31, %v1619_v55  ;;  %v1864_v43 = vadd.f32 %v1764_v61, %v1620_v35  ;;  %v2215_v5 = vmul.f32 %v5993_v8, %v6309_v23 }
 0x19f   : > { %v2216_v59 = vmul.f32 %v5993_v8, %v6318_v47  ;;  %v2075_v6 = vrot.slane %v1972_v51, 1  ;;  %v2316_v4 = vrot.slane %v2214_v39, 2  ;;  %v579_v37 = vadd.f32 %v5021_v19, %v5920_v12 }
 0x1a0   : > { %v2074_v60 = vsel %vm943_vm4, %v2072_v46, %v2073_v58  ;;  %v1931_v11 = vadd.f32 %v1899_v34, %v1863_v24  ;;  %v1932_v26 = vadd.f32 %v1900_v20, %v1864_v43  ;;  %v2317_v48 = vrot.slane %v2215_v5, 2  ;;  %v6368_v43 = vld [vmem:[#allocation2 + $0x90] sm:$0xff] }
 0x1a1   : > { %v2319_v49 = vrot.slane %v2216_v59, 2  ;;  %v2076_v33 = vsel %vm943_vm4, %v2073_v58, %v2075_v6  ;;  %v625_v44 = vmax.f32 %v579_v37, 0.0  ;;  %v787_v45 = vmul.f32 %v5923_v0, %v6228_v52 }
 0x1a2   : > { %v788_v16 = vmul.f32 %v5923_v0, %v6235_v29  ;;  %v2175_v54 = vadd.f32 %v2074_v60, %v1931_v11  ;;  %v2176_v57 = vadd.f32 %v2076_v33, %v1932_v26  ;;  %v2318_v56 = vsel %vm1188_vm5, %v2316_v4, %v2317_v48 }
 0x1a3   : > { %v2320_v1 = vsel %vm1188_vm5, %v2317_v48, %v2319_v49  ;;  %716 = vst.msk [vmem:[#allocation2 + $0x159] sm:$0xff] %vm384_vm1, %v625_v44  ;;  %v859_v34 = vmul.f32 %v5851_v63, %v6228_v52  ;;  %v860_v62 = vmul.f32 %v5851_v63, %v6235_v29  ;;  %v861_v9 = vmul.f32 %v5851_v63, %v6237_v41  ;;  %v6378_v48 = vld [vmem:[#allocation2 + $0x98] sm:$0xff] }
 0x1a4   : > { %v1104_v50 = vmul.f32 %v5886_v42, %v6228_v52  ;;  %v2419_v20 = vadd.f32 %v2318_v56, %v2175_v54  ;;  %v2420_v18 = vadd.f32 %v2320_v1, %v2176_v57  ;;  %v1105_v2 = vmul.f32 %v5886_v42, %v6235_v29 }
 0x1a5   : > { %v1106_v55 = vmul.f32 %v5886_v42, %v6237_v41  ;;  %v964_v35 = vrot.slane %v859_v34, 1  ;;  %v965_v31 = vrot.slane %v860_v62, 1  ;;  %v967_v61 = vrot.slane %v861_v9, 1  ;;  %v6386_v34 = vld [vmem:[#allocation2 + $0xa0] sm:$0x3] }
 0x1a6   : > { %v1209_v19 = vrot.slane %v1104_v50, 2  ;;  %v2448_v51 = vpack.c.bf16 %v2420_v18, %v2419_v20  ;;  %v1210_v46 = vrot.slane %v1105_v2, 2  ;;  %v1345_v39 = vmul.f32 %v5984_v14, %v6301_v28 }
 0x1a7   : > { %v1212_v58 = vrot.slane %v1106_v55, 2  ;;  %v966_v52 = vsel %vm943_vm4, %v964_v35, %v965_v31  ;;  %v968_v24 = vsel %vm943_vm4, %v965_v31, %v967_v61  ;;  %v1346_v29 = vmul.f32 %v5984_v14, %v6309_v23 }
 0x1a8   : > { %v1417_v41 = vmul.f32 %v5987_v38, %v6301_v28  ;;  %5033 = vmatmul.mubr.msk.bf16.gmra.mxu1 %vm384_vm1, %v2448_v51  ;;  %v1064_v5 = vadd.f32 %v966_v52, %v787_v45  ;;  %v1065_v59 = vadd.f32 %v968_v24, %v788_v16  ;;  %v1211_v60 = vsel %vm1188_vm5, %v1209_v19, %v1210_v46  ;;  %v570_v16 = vpop.f32.mrf.mxu0 }
 0x1a9   : > { %v1213_v6 = vsel %vm1188_vm5, %v1210_v46, %v1212_v58  ;;  %v1418_v4 = vmul.f32 %v5987_v38, %v6309_v23  ;;  %v1419_v37 = vmul.f32 %v5987_v38, %v6318_v47  ;;  %v1661_v26 = vmul.f32 %v5990_v53, %v6301_v28 }
 0x1aa   : > { %v1521_v11 = vrot.slane %v1417_v41, 1  ;;  %v1309_v49 = vadd.f32 %v1211_v60, %v1064_v5  ;;  %v1310_v33 = vadd.f32 %v1213_v6, %v1065_v59  ;;  %v1662_v44 = vmul.f32 %v5990_v53, %v6309_v23  ;;  %v5024_v46 = vpop.f32.mrf.mxu0 }
 0x1ab   : > { %v1663_v45 = vmul.f32 %v5990_v53, %v6318_v47  ;;  %v1522_v54 = vrot.slane %v1418_v4, 1  ;;  %v1524_v57 = vrot.slane %v1419_v37, 1  ;;  %v1765_v56 = vrot.slane %v1661_v26, 2 }
 0x1ac   : > { %v1901_v1 = vmul.f32 %v5975_v36, %v6368_v43  ;;  %v1377_v62 = vadd.f32 %v1345_v39, %v1309_v49  ;;  %v1378_v9 = vadd.f32 %v1346_v29, %v1310_v33  ;;  %v1766_v50 = vrot.slane %v1662_v44, 2  ;;  %v583_v44 = vpop.f32.mrf.mxu0 }
 0x1ad   : > { %v1768_v20 = vrot.slane %v1663_v45, 2  ;;  %v1523_v18 = vsel %vm943_vm4, %v1521_v11, %v1522_v54  ;;  %v1525_v2 = vsel %vm943_vm4, %v1522_v54, %v1524_v57  ;;  %v1902_v55 = vmul.f32 %v5975_v36, %v6378_v48 }
 0x1ae   : > { %v1973_v35 = vmul.f32 %v5981_v21, %v6368_v43  ;;  %v1621_v31 = vadd.f32 %v1523_v18, %v1377_v62  ;;  %v1622_v61 = vadd.f32 %v1525_v2, %v1378_v9  ;;  %v1767_v19 = vsel %vm1188_vm5, %v1765_v56, %v1766_v50  ;;  %v6412_v56 = vld [vmem:[%s8099_s2] ss:$0 sm:$0xff] }
 0x1af   : > { %v1769_v51 = vsel %vm1188_vm5, %v1766_v50, %v1768_v20  ;;  %v1974_v58 = vmul.f32 %v5981_v21, %v6378_v48  ;;  %v1975_v39 = vmul.f32 %v5981_v21, %v6386_v34  ;;  %v2217_v24 = vmul.f32 %v5993_v8, %v6368_v43 }
 0x1b0   : > { %v2077_v52 = vrot.slane %v1973_v35, 1  ;;  %v1865_v29 = vadd.f32 %v1767_v19, %v1621_v31  ;;  %v1866_v41 = vadd.f32 %v1769_v51, %v1622_v61  ;;  %v2218_v5 = vmul.f32 %v5993_v8, %v6378_v48 }
 0x1b1   : > { %v2219_v59 = vmul.f32 %v5993_v8, %v6386_v34  ;;  %v2078_v60 = vrot.slane %v1974_v58, 1  ;;  %v2080_v6 = vrot.slane %v1975_v39, 1  ;;  %v2321_v4 = vrot.slane %v2217_v24, 2 }
 0x1b2   : > { %v571_v37 = vadd.f32 %v5920_v12, %v570_v16  ;;  %v1933_v11 = vadd.f32 %v1901_v1, %v1865_v29  ;;  %v1934_v26 = vadd.f32 %v1902_v55, %v1866_v41  ;;  %v2322_v49 = vrot.slane %v2218_v5, 2 }
 0x1b3   : > { %v2324_v33 = vrot.slane %v2219_v59, 2  ;;  %v2079_v45 = vsel %vm943_vm4, %v2077_v52, %v2078_v60  ;;  %v2081_v54 = vsel %vm943_vm4, %v2078_v60, %v2080_v6  ;;  %v592_v62 = vadd.f32 %v6412_v56, %v5024_v46 }
 0x1b4   : > { %v623_v57 = vmax.f32 %v571_v37, 0.0  ;;  %v2177_v9 = vadd.f32 %v2079_v45, %v1933_v11  ;;  %v2178_v50 = vadd.f32 %v2081_v54, %v1934_v26  ;;  %v2323_v12 = vsel %vm1188_vm5, %v2321_v4, %v2322_v49 }
 0x1b5   : > { %v2325_v16 = vsel %vm1188_vm5, %v2322_v49, %v2324_v33  ;;  %v628_v1 = vmax.f32 %v592_v62, 0.0  ;;  %v584_v20 = vadd.f32 %v6412_v56, %v583_v44  ;;  %v789_v18 = vmul.f32 %v5923_v0, %v6301_v28 }
 0x1b6   : > { %714 = vst.msk [vmem:[#allocation2 + $0x141] sm:$0xff] %vm384_vm1, %v623_v57  ;;  %v790_v2 = vmul.f32 %v5923_v0, %v6309_v23  ;;  %v2421_v55 = vadd.f32 %v2323_v12, %v2177_v9  ;;  %v2422_v35 = vadd.f32 %v2325_v16, %v2178_v50  ;;  %v862_v31 = vmul.f32 %v5851_v63, %v6301_v28  ;;  %v6454_v57 = vld [vmem:[#allocation2 + $0xb0] sm:$0xff] }
 0x1b7   : > { %v863_v61 = vmul.f32 %v5851_v63, %v6309_v23  ;;  %719 = vst.msk [vmem:[#allocation2 + $0x181] sm:$0xff] %vm384_vm1, %v628_v1  ;;  %v626_v19 = vmax.f32 %v584_v20, 0.0  ;;  %v864_v51 = vmul.f32 %v5851_v63, %v6318_v47  ;;  %v1107_v46 = vmul.f32 %v5886_v42, %v6301_v28 }
 0x1b8   : > { %v1108_v58 = vmul.f32 %v5886_v42, %v6309_v23  ;;  %v2449_v39 = vpack.c.bf16 %v2422_v35, %v2421_v55  ;;  %v969_v52 = vrot.slane %v862_v31, 1  ;;  %v1109_v29 = vmul.f32 %v5886_v42, %v6318_v47  ;;  %v6445_v47 = vld [vmem:[#allocation2 + $0xa8] sm:$0xff] }
 0x1b9   : > { %v970_v24 = vrot.slane %v863_v61, 1  ;;  %717 = vst.msk [vmem:[#allocation2 + $0x169] sm:$0xff] %vm384_vm1, %v626_v19  ;;  %v972_v41 = vrot.slane %v864_v51, 1  ;;  %v1214_v5 = vrot.slane %v1107_v46, 2  ;;  %v1347_v60 = vmul.f32 %v5984_v14, %v6368_v43 }
 0x1ba   : > { %v1215_v59 = vrot.slane %v1108_v58, 2  ;;  %5036 = vmatprep.mubr.msk.bf16.mxu1 %vm384_vm1, %v2449_v39  ;;  %v1217_v6 = vrot.slane %v1109_v29, 2  ;;  %v1348_v23 = vmul.f32 %v5984_v14, %v6378_v48  ;;  %v1420_v4 = vmul.f32 %v5987_v38, %v6368_v43 }
 0x1bb   : > { %v971_v28 = vsel %vm943_vm4, %v969_v52, %v970_v24  ;;  %v973_v37 = vsel %vm943_vm4, %v970_v24, %v972_v41  ;;  %v1421_v49 = vmul.f32 %v5987_v38, %v6378_v48  ;;  %v1422_v45 = vmul.f32 %v5987_v38, %v6386_v34 }
 0x1bc   : > { %v1066_v11 = vadd.f32 %v971_v28, %v789_v18  ;;  %v1216_v26 = vsel %vm1188_vm5, %v1214_v5, %v1215_v59  ;;  %v1067_v33 = vadd.f32 %v973_v37, %v790_v2  ;;  %v1218_v44 = vsel %vm1188_vm5, %v1215_v59, %v1217_v6  ;;  %v6464_v2 = vld [vmem:[#allocation2 + $0xb8] sm:$0x3]  ;;  %v5025_v28 = vpop.f32.mrf.mxu0 }
 0x1bd   : > { %v1526_v54 = vrot.slane %v1420_v4, 1  ;;  %v1527_v9 = vrot.slane %v1421_v49, 1  ;;  %v1664_v50 = vmul.f32 %v5990_v53, %v6368_v43  ;;  %v1665_v12 = vmul.f32 %v5990_v53, %v6378_v48 }
 0x1be   : > { %v1311_v62 = vadd.f32 %v1216_v26, %v1066_v11  ;;  %v1312_v16 = vadd.f32 %v1218_v44, %v1067_v33  ;;  %v1529_v1 = vrot.slane %v1422_v45, 1  ;;  %v1666_v20 = vmul.f32 %v5990_v53, %v6386_v34 }
 0x1bf   : > { %v1903_v18 = vmul.f32 %v5975_v36, %v6445_v47  ;;  %v1528_v35 = vsel %vm943_vm4, %v1526_v54, %v1527_v9  ;;  %v1770_v31 = vrot.slane %v1664_v50, 2  ;;  %v1771_v61 = vrot.slane %v1665_v12, 2 }
 0x1c0   : > { %v1379_v55 = vadd.f32 %v1347_v60, %v1311_v62  ;;  %v1380_v19 = vadd.f32 %v1348_v23, %v1312_v16  ;;  %v1530_v51 = vsel %vm943_vm4, %v1527_v9, %v1529_v1  ;;  %v1773_v46 = vrot.slane %v1666_v20, 2 }
 0x1c1   : > { %v1904_v58 = vmul.f32 %v5975_v36, %v6454_v57  ;;  %v1772_v52 = vsel %vm1188_vm5, %v1770_v31, %v1771_v61  ;;  %v1976_v24 = vmul.f32 %v5981_v21, %v6445_v47  ;;  %v1977_v29 = vmul.f32 %v5981_v21, %v6454_v57 }
 0x1c2   : > { %v1623_v39 = vadd.f32 %v1528_v35, %v1379_v55  ;;  %v1624_v41 = vadd.f32 %v1530_v51, %v1380_v19  ;;  %v1774_v5 = vsel %vm1188_vm5, %v1771_v61, %v1773_v46  ;;  %v1978_v59 = vmul.f32 %v5981_v21, %v6464_v2 }
 0x1c3   : > { %v2220_v60 = vmul.f32 %v5993_v8, %v6445_v47  ;;  %v2082_v23 = vrot.slane %v1976_v24, 1  ;;  %v2083_v4 = vrot.slane %v1977_v29, 1  ;;  %v2221_v37 = vmul.f32 %v5993_v8, %v6454_v57 }
 0x1c4   : > { %v1867_v6 = vadd.f32 %v1772_v52, %v1623_v39  ;;  %v1868_v11 = vadd.f32 %v1774_v5, %v1624_v41  ;;  %v2085_v26 = vrot.slane %v1978_v59, 1  ;;  %v2222_v49 = vmul.f32 %v5993_v8, %v6464_v2 }
 0x1c5   : > { %v2326_v33 = vrot.slane %v2220_v60, 2  ;;  %v2084_v45 = vsel %vm943_vm4, %v2082_v23, %v2083_v4  ;;  %v2327_v54 = vrot.slane %v2221_v37, 2  ;;  %v595_v62 = vadd.f32 %v6412_v56, %v5025_v28 }
 0x1c6   : > { %v1935_v44 = vadd.f32 %v1903_v18, %v1867_v6  ;;  %v1936_v9 = vadd.f32 %v1904_v58, %v1868_v11  ;;  %v2086_v50 = vsel %vm943_vm4, %v2083_v4, %v2085_v26  ;;  %v2329_v12 = vrot.slane %v2222_v49, 2  ;;  %v6516_v26 = vld [vmem:[#allocation2 + $0xc0] sm:$0xff] }
 0x1c7   : > { %v791_v16 = vmul.f32 %v5923_v0, %v6368_v43  ;;  %v2328_v20 = vsel %vm1188_vm5, %v2326_v33, %v2327_v54  ;;  %v629_v55 = vmax.f32 %v595_v62, 0.0  ;;  %v792_v35 = vmul.f32 %v5923_v0, %v6378_v48 }
 0x1c8   : > { %v2179_v1 = vadd.f32 %v2084_v45, %v1935_v44  ;;  %v2180_v18 = vadd.f32 %v2086_v50, %v1936_v9  ;;  %v2330_v31 = vsel %vm1188_vm5, %v2327_v54, %v2329_v12  ;;  %v865_v61 = vmul.f32 %v5851_v63, %v6368_v43  ;;  %v6527_v12 = vld [vmem:[#allocation2 + $0xc8] sm:$0xff] }
 0x1c9   : > { %v866_v19 = vmul.f32 %v5851_v63, %v6378_v48  ;;  %720 = vst.msk [vmem:[#allocation2 + $0x189] sm:$0xff] %vm384_vm1, %v629_v55  ;;  %v867_v46 = vmul.f32 %v5851_v63, %v6386_v34  ;;  %v1110_v58 = vmul.f32 %v5886_v42, %v6368_v43  ;;  %v1111_v39 = vmul.f32 %v5886_v42, %v6378_v48 }
 0x1ca   : > { %v2423_v51 = vadd.f32 %v2328_v20, %v2179_v1  ;;  %v2424_v52 = vadd.f32 %v2330_v31, %v2180_v18  ;;  %v974_v24 = vrot.slane %v865_v61, 1  ;;  %v1112_v41 = vmul.f32 %v5886_v42, %v6386_v34 }
 0x1cb   : > { %v975_v29 = vrot.slane %v866_v19, 1  ;;  %v977_v5 = vrot.slane %v867_v46, 1  ;;  %v1219_v59 = vrot.slane %v1110_v58, 2  ;;  %v1220_v60 = vrot.slane %v1111_v39, 2 }
 0x1cc   : > { %v1349_v28 = vmul.f32 %v5984_v14, %v6445_v47  ;;  %v2450_v6 = vpack.c.bf16 %v2424_v52, %v2423_v51  ;;  %v1222_v4 = vrot.slane %v1112_v41, 2  ;;  %v1350_v43 = vmul.f32 %v5984_v14, %v6454_v57 }
 0x1cd   : > { %v976_v23 = vsel %vm943_vm4, %v974_v24, %v975_v29  ;;  %v978_v48 = vsel %vm943_vm4, %v975_v29, %v977_v5  ;;  %v1221_v11 = vsel %vm1188_vm5, %v1219_v59, %v1220_v60  ;;  %v1423_v34 = vmul.f32 %v5987_v38, %v6445_v47 }
 0x1ce   : > { %v1068_v37 = vadd.f32 %v976_v23, %v791_v16  ;;  %5037 = vmatmul.mubr.msk.bf16.gmra.mxu1 %vm384_vm1, %v2450_v6  ;;  %v1069_v49 = vadd.f32 %v978_v48, %v792_v35  ;;  %v1223_v33 = vsel %vm1188_vm5, %v1220_v60, %v1222_v4  ;;  %v1424_v44 = vmul.f32 %v5987_v38, %v6454_v57  ;;  %v6531_v35 = vld [vmem:[#allocation2 + $0xd0] sm:$0x3] }
 0x1cf   : > { %v1425_v45 = vmul.f32 %v5987_v38, %v6464_v2  ;;  %v1531_v62 = vrot.slane %v1423_v34, 1  ;;  %v1667_v9 = vmul.f32 %v5990_v53, %v6445_v47  ;;  %v1668_v50 = vmul.f32 %v5990_v53, %v6454_v57 }
 0x1d0   : > { %v1313_v54 = vadd.f32 %v1221_v11, %v1068_v37  ;;  %v1314_v16 = vadd.f32 %v1223_v33, %v1069_v49  ;;  %v1532_v1 = vrot.slane %v1424_v44, 1  ;;  %v1669_v55 = vmul.f32 %v5990_v53, %v6464_v2  ;;  %v586_v49 = vpop.f32.mrf.mxu0 }
 0x1d1   : > { %v1534_v20 = vrot.slane %v1425_v45, 1  ;;  %v1775_v31 = vrot.slane %v1667_v9, 2  ;;  %v1776_v61 = vrot.slane %v1668_v50, 2  ;;  %v1905_v19 = vmul.f32 %v5975_v36, %v6516_v26 }
 0x1d2   : > { %v1381_v18 = vadd.f32 %v1349_v28, %v1313_v54  ;;  %v1382_v51 = vadd.f32 %v1350_v43, %v1314_v16  ;;  %v1533_v46 = vsel %vm943_vm4, %v1531_v62, %v1532_v1  ;;  %v1778_v39 = vrot.slane %v1669_v55, 2 }
 0x1d3   : > { %v1535_v58 = vsel %vm943_vm4, %v1532_v1, %v1534_v20  ;;  %v1777_v24 = vsel %vm1188_vm5, %v1775_v31, %v1776_v61  ;;  %v1906_v29 = vmul.f32 %v5975_v36, %v6527_v12  ;;  %v1979_v41 = vmul.f32 %v5981_v21, %v6516_v26 }
 0x1d4   : > { %v1625_v52 = vadd.f32 %v1533_v46, %v1381_v18  ;;  %v1626_v5 = vadd.f32 %v1535_v58, %v1382_v51  ;;  %v1779_v59 = vsel %vm1188_vm5, %v1776_v61, %v1778_v39  ;;  %v1980_v60 = vmul.f32 %v5981_v21, %v6527_v12 }
 0x1d5   : > { %v1981_v28 = vmul.f32 %v5981_v21, %v6531_v35  ;;  %v2087_v23 = vrot.slane %v1979_v41, 1  ;;  %v2223_v4 = vmul.f32 %v5993_v8, %v6516_v26  ;;  %v2224_v43 = vmul.f32 %v5993_v8, %v6527_v12 }
 0x1d6   : > { %v1869_v6 = vadd.f32 %v1777_v24, %v1625_v52  ;;  %v1870_v48 = vadd.f32 %v1779_v59, %v1626_v5  ;;  %v2088_v37 = vrot.slane %v1980_v60, 1  ;;  %v2225_v34 = vmul.f32 %v5993_v8, %v6531_v35 }
 0x1d7   : > { %v2090_v11 = vrot.slane %v1981_v28, 1  ;;  %v2331_v44 = vrot.slane %v2223_v4, 2  ;;  %v2332_v45 = vrot.slane %v2224_v43, 2  ;;  %v8231_v54 = vand.u32 4294901760, %v5793_v22 }
 0x1d8   : > { %v1937_v33 = vadd.f32 %v1905_v19, %v1869_v6  ;;  %v1938_v62 = vadd.f32 %v1906_v29, %v1870_v48  ;;  %v2089_v9 = vsel %vm943_vm4, %v2087_v23, %v2088_v37  ;;  %v2334_v16 = vrot.slane %v2225_v34, 2 }
 0x1d9   : > { %v2091_v50 = vsel %vm943_vm4, %v2088_v37, %v2090_v11  ;;  %v2333_v20 = vsel %vm1188_vm5, %v2331_v44, %v2332_v45  ;;  %v2973_v55 = vsub.f32 %v5793_v22, %v8231_v54  ;;  %v587_v18 = vadd.f32 %v6412_v56, %v586_v49  ;;  %v8347_v54 = vld [vmem:[#allocation51_spill] sm:$0xff] }
 0x1da   : > { %v2181_v1 = vadd.f32 %v2089_v9, %v1937_v33  ;;  %v2182_v31 = vadd.f32 %v2091_v50, %v1938_v62  ;;  %v2335_v61 = vsel %vm1188_vm5, %v2332_v45, %v2334_v16  ;;  %v8230_v19 = vand.u32 4294901760, %v5796_v7  ;;  %v6596_v9 = vld [vmem:[#allocation2 + $0xd8] sm:$0xff] }
 0x1db   : > { %v8229_v51 = vand.u32 4294901760, %v5799_v3  ;;  %v2974_v58 = vand.u32 4294901760, %v2973_v55  ;;  %v627_v39 = vmax.f32 %v587_v18, 0.0  ;;  %v793_v52 = vmul.f32 %v5923_v0, %v6445_v47 }
 0x1dc   : > { %v2425_v46 = vadd.f32 %v2333_v20, %v2181_v1  ;;  %v2426_v24 = vadd.f32 %v2335_v61, %v2182_v31  ;;  %v2983_v29 = vsub.f32 %v5796_v7, %v8230_v19  ;;  %v794_v41 = vmul.f32 %v5923_v0, %v6454_v57  ;;  %v8346_v19 = vld [vmem:[#allocation50_spill] sm:$0xff] }
 0x1dd   : > { %v2993_v56 = vsub.f32 %v5799_v3, %v8229_v51  ;;  %5075 = vmatmul.mubr.f32.gmra.mxu0 %v2974_v58  ;;  %718 = vst.msk [vmem:[#allocation2 + $0x171] sm:$0xff] %vm384_vm1, %v627_v39  ;;  %v868_v5 = vmul.f32 %v5851_v63, %v6445_v47  ;;  %v869_v59 = vmul.f32 %v5851_v63, %v6454_v57  ;;  %v8345_v51 = vld [vmem:[#allocation49_spill] sm:$0xff] }
 0x1de   : > { %v870_v60 = vmul.f32 %v5851_v63, %v6464_v2  ;;  %v1113_v28 = vmul.f32 %v5886_v42, %v6445_v47  ;;  %v2451_v6 = vpack.c.bf16 %v2426_v24, %v2425_v46  ;;  %v2984_v23 = vand.u32 4294901760, %v2983_v29  ;;  %v6606_v46 = vld [vmem:[#allocation2 + $0xe0] sm:$0xff] }
 0x1df   : > { %v2994_v4 = vand.u32 4294901760, %v2993_v56  ;;  %v1114_v43 = vmul.f32 %v5886_v42, %v6454_v57  ;;  %v979_v48 = vrot.slane %v868_v5, 1  ;;  %v980_v37 = vrot.slane %v869_v59, 1  ;;  %v6614_v59 = vld [vmem:[#allocation2 + $0xe8] sm:$0x3] }
 0x1e0   : > { %v982_v11 = vrot.slane %v870_v60, 1  ;;  %v1115_v34 = vmul.f32 %v5886_v42, %v6464_v2  ;;  %5040 = vmatprep.mubr.msk.bf16.mxu1 %vm384_vm1, %v2451_v6  ;;  %5077 = vmatprep.mubr.f32.mxu0 %v2984_v23  ;;  %v1224_v49 = vrot.slane %v1113_v28, 2  ;;  %v1351_v47 = vmul.f32 %v5984_v14, %v6516_v26 }
 0x1e1   : > { %v1225_v33 = vrot.slane %v1114_v43, 2  ;;  %v1352_v44 = vmul.f32 %v5984_v14, %v6527_v12  ;;  %5078 = vmatmul.mubr.f32.gmra.mxu0 %v2994_v4  ;;  %v981_v57 = vsel %vm943_vm4, %v979_v48, %v980_v37  ;;  %v1426_v2 = vmul.f32 %v5987_v38, %v6516_v26 }
 0x1e2   : > { %v983_v45 = vsel %vm943_vm4, %v980_v37, %v982_v11  ;;  %v1227_v62 = vrot.slane %v1115_v34, 2  ;;  %v1070_v50 = vadd.f32 %v981_v57, %v793_v52  ;;  %v1427_v20 = vmul.f32 %v5987_v38, %v6527_v12 }
 0x1e3   : > { %v1071_v16 = vadd.f32 %v983_v45, %v794_v41  ;;  %v1226_v1 = vsel %vm1188_vm5, %v1224_v49, %v1225_v33  ;;  %v1428_v18 = vmul.f32 %v5987_v38, %v6531_v35  ;;  %v1536_v31 = vrot.slane %v1426_v2, 1 }
 0x1e4   : > { %v1228_v55 = vsel %vm1188_vm5, %v1225_v33, %v1227_v62  ;;  %v1670_v61 = vmul.f32 %v5990_v53, %v6516_v26  ;;  %v1315_v58 = vadd.f32 %v1226_v1, %v1070_v50  ;;  %v1537_v52 = vrot.slane %v1427_v20, 1 }
 0x1e5   : > { %v1316_v39 = vadd.f32 %v1228_v55, %v1071_v16  ;;  %v1671_v24 = vmul.f32 %v5990_v53, %v6527_v12  ;;  %v1539_v29 = vrot.slane %v1428_v18, 1  ;;  %v1672_v56 = vmul.f32 %v5990_v53, %v6531_v35 }
 0x1e6   : > { %v1780_v41 = vrot.slane %v1670_v61, 2  ;;  %v1907_v5 = vmul.f32 %v5975_v36, %v6596_v9  ;;  %v1383_v60 = vadd.f32 %v1351_v47, %v1315_v58  ;;  %v1538_v6 = vsel %vm943_vm4, %v1536_v31, %v1537_v52 }
 0x1e7   : > { %v1384_v28 = vadd.f32 %v1352_v44, %v1316_v39  ;;  %v1781_v23 = vrot.slane %v1671_v24, 2  ;;  %v1540_v4 = vsel %vm943_vm4, %v1537_v52, %v1539_v29  ;;  %v1783_v43 = vrot.slane %v1672_v56, 2 }
 0x1e8   : > { %v1908_v48 = vmul.f32 %v5975_v36, %v6606_v46  ;;  %v1982_v37 = vmul.f32 %v5981_v21, %v6596_v9  ;;  %v1627_v11 = vadd.f32 %v1538_v6, %v1383_v60  ;;  %v1983_v33 = vmul.f32 %v5981_v21, %v6606_v46 }
 0x1e9   : > { %v1628_v34 = vadd.f32 %v1540_v4, %v1384_v28  ;;  %v1782_v49 = vsel %vm1188_vm5, %v1780_v41, %v1781_v23  ;;  %v1784_v47 = vsel %vm1188_vm5, %v1781_v23, %v1783_v43  ;;  %v1984_v44 = vmul.f32 %v5981_v21, %v6614_v59 }
 0x1ea   : > { %v2092_v57 = vrot.slane %v1982_v37, 1  ;;  %v2226_v45 = vmul.f32 %v5993_v8, %v6596_v9  ;;  %v1871_v62 = vadd.f32 %v1782_v49, %v1627_v11  ;;  %v2093_v50 = vrot.slane %v1983_v33, 1 }
 0x1eb   : > { %v1872_v2 = vadd.f32 %v1784_v47, %v1628_v34  ;;  %v2227_v16 = vmul.f32 %v5993_v8, %v6606_v46  ;;  %v2095_v1 = vrot.slane %v1984_v44, 1  ;;  %v2228_v20 = vmul.f32 %v5993_v8, %v6614_v59 }
 0x1ec   : > { %v2336_v55 = vrot.slane %v2226_v45, 2  ;;  %v8228_v18 = vand.u32 4294901760, %v5815_v10  ;;  %v1939_v31 = vadd.f32 %v1907_v5, %v1871_v62  ;;  %v2094_v58 = vsel %vm943_vm4, %v2092_v57, %v2093_v50 }
 0x1ed   : > { %v1940_v61 = vadd.f32 %v1908_v48, %v1872_v2  ;;  %v2337_v39 = vrot.slane %v2227_v16, 2  ;;  %v2096_v52 = vsel %vm943_vm4, %v2093_v50, %v2095_v1  ;;  %v2339_v24 = vrot.slane %v2228_v20, 2 }
 0x1ee   : > { %v3003_v29 = vsub.f32 %v5815_v10, %v8228_v18  ;;  %v795_v56 = vmul.f32 %v5923_v0, %v6516_v26  ;;  %v2183_v41 = vadd.f32 %v2094_v58, %v1939_v31  ;;  %v796_v5 = vmul.f32 %v5923_v0, %v6527_v12  ;;  %v6669_v31 = vld [vmem:[#allocation2 + $0xf0] sm:$0xff]  ;;  %v8344_v18 = vld [vmem:[#allocation45_spill] sm:$0xff] }
 0x1ef   : > { %v2184_v60 = vadd.f32 %v2096_v52, %v1940_v61  ;;  %v2338_v28 = vsel %vm1188_vm5, %v2336_v55, %v2337_v39  ;;  %v2340_v6 = vsel %vm1188_vm5, %v2337_v39, %v2339_v24  ;;  %v871_v4 = vmul.f32 %v5851_v63, %v6516_v26 }
 0x1f0   : > { %v3004_v23 = vand.u32 4294901760, %v3003_v29  ;;  %v872_v43 = vmul.f32 %v5851_v63, %v6527_v12  ;;  %v2427_v48 = vadd.f32 %v2338_v28, %v2183_v41  ;;  %v873_v11 = vmul.f32 %v5851_v63, %v6531_v35 }
 0x1f1   : > { %v2428_v37 = vadd.f32 %v2340_v6, %v2184_v60  ;;  %v1116_v34 = vmul.f32 %v5886_v42, %v6516_v26  ;;  %v984_v49 = vrot.slane %v871_v4, 1  ;;  %v1117_v47 = vmul.f32 %v5886_v42, %v6527_v12  ;;  %v6677_v60 = vld [vmem:[#allocation2 + $0xf8] sm:$0xff]  ;;  %v6683_v4 = vld [vmem:[#allocation2 + $0x100] sm:$0x3] }
 0x1f2   : > { %5080 = vmatprep.mubr.f32.mxu0 %v3004_v23  ;;  %v985_v33 = vrot.slane %v872_v43, 1  ;;  %v1118_v44 = vmul.f32 %v5886_v42, %v6531_v35  ;;  %v987_v45 = vrot.slane %v873_v11, 1  ;;  %v1353_v2 = vmul.f32 %v5984_v14, %v6596_v9 }
 0x1f3   : > { %v2452_v57 = vpack.c.bf16 %v2428_v37, %v2427_v48  ;;  %v1229_v62 = vrot.slane %v1116_v34, 2  ;;  %v1230_v16 = vrot.slane %v1117_v47, 2  ;;  %v1354_v26 = vmul.f32 %v5984_v14, %v6606_v46 }
 0x1f4   : > { %v986_v50 = vsel %vm943_vm4, %v984_v49, %v985_v33  ;;  %v1232_v1 = vrot.slane %v1118_v44, 2  ;;  %v988_v12 = vsel %vm943_vm4, %v985_v33, %v987_v45  ;;  %v1429_v35 = vmul.f32 %v5987_v38, %v6596_v9 }
 0x1f5   : > { %5041 = vmatmul.mubr.msk.bf16.gmra.mxu1 %vm384_vm1, %v2452_v57  ;;  %v1072_v20 = vadd.f32 %v986_v50, %v795_v56  ;;  %v1430_v55 = vmul.f32 %v5987_v38, %v6606_v46  ;;  %v1073_v61 = vadd.f32 %v988_v12, %v796_v5  ;;  %v1231_v58 = vsel %vm1188_vm5, %v1229_v62, %v1230_v16 }
 0x1f6   : > { %v1233_v39 = vsel %vm1188_vm5, %v1230_v16, %v1232_v1  ;;  %v1431_v52 = vmul.f32 %v5987_v38, %v6614_v59  ;;  %v1541_v29 = vrot.slane %v1429_v35, 1  ;;  %v1673_v56 = vmul.f32 %v5990_v53, %v6596_v9 }
 0x1f7   : > { %v1317_v24 = vadd.f32 %v1231_v58, %v1072_v20  ;;  %v1542_v41 = vrot.slane %v1430_v55, 1  ;;  %v1318_v28 = vadd.f32 %v1233_v39, %v1073_v61  ;;  %v1674_v5 = vmul.f32 %v5990_v53, %v6606_v46 }
 0x1f8   : > { %v1544_v6 = vrot.slane %v1431_v52, 1  ;;  %v1675_v23 = vmul.f32 %v5990_v53, %v6614_v59  ;;  %v1785_v37 = vrot.slane %v1673_v56, 2  ;;  %v1909_v11 = vmul.f32 %v5975_v36, %v6669_v31 }
 0x1f9   : > { %v1385_v43 = vadd.f32 %v1353_v2, %v1317_v24  ;;  %v1543_v48 = vsel %vm943_vm4, %v1541_v29, %v1542_v41  ;;  %v1386_v34 = vadd.f32 %v1354_v26, %v1318_v28  ;;  %v1786_v33 = vrot.slane %v1674_v5, 2 }
 0x1fa   : > { %v1545_v49 = vsel %vm943_vm4, %v1542_v41, %v1544_v6  ;;  %v1788_v47 = vrot.slane %v1675_v23, 2  ;;  %v1910_v57 = vmul.f32 %v5975_v36, %v6677_v60  ;;  %v1985_v45 = vmul.f32 %v5981_v21, %v6669_v31 }
 0x1fb   : > { %v1629_v44 = vadd.f32 %v1543_v48, %v1385_v43  ;;  %v1986_v62 = vmul.f32 %v5981_v21, %v6677_v60  ;;  %v1630_v2 = vadd.f32 %v1545_v49, %v1386_v34  ;;  %v1787_v50 = vsel %vm1188_vm5, %v1785_v37, %v1786_v33 }
 0x1fc   : > { %v1789_v16 = vsel %vm1188_vm5, %v1786_v33, %v1788_v47  ;;  %v1987_v1 = vmul.f32 %v5981_v21, %v6683_v4  ;;  %v2097_v12 = vrot.slane %v1985_v45, 1  ;;  %v2229_v35 = vmul.f32 %v5993_v8, %v6669_v31 }
 0x1fd   : > { %v1873_v26 = vadd.f32 %v1787_v50, %v1629_v44  ;;  %v2098_v20 = vrot.slane %v1986_v62, 1  ;;  %v1874_v55 = vadd.f32 %v1789_v16, %v1630_v2  ;;  %v2230_v58 = vmul.f32 %v5993_v8, %v6677_v60 }
 0x1fe   : > { %v2100_v61 = vrot.slane %v1987_v1, 1  ;;  %v2231_v39 = vmul.f32 %v5993_v8, %v6683_v4  ;;  %v2341_v29 = vrot.slane %v2229_v35, 2  ;;  %v8227_v41 = vand.u32 4294901760, %v5818_v25 }
 0x1ff   : > { %v1941_v52 = vadd.f32 %v1909_v11, %v1873_v26  ;;  %v2099_v24 = vsel %vm943_vm4, %v2097_v12, %v2098_v20  ;;  %v1942_v56 = vadd.f32 %v1910_v57, %v1874_v55  ;;  %v2342_v6 = vrot.slane %v2230_v58, 2 }
 0x200   : > { %v2101_v28 = vsel %vm943_vm4, %v2098_v20, %v2100_v61  ;;  %v2344_v5 = vrot.slane %v2231_v39, 2  ;;  %v3013_v43 = vsub.f32 %v5818_v25, %v8227_v41  ;;  %v8226_v48 = vand.u32 4294901760, %v5825_v15  ;;  %v8343_v41 = vld [vmem:[#allocation44_spill] sm:$0xff] }
 0x201   : > { %v2185_v23 = vadd.f32 %v2099_v24, %v1941_v52  ;;  %v8218_v37 = vand.u32 4294901760, %v5856_v32  ;;  %v2186_v11 = vadd.f32 %v2101_v28, %v1942_v56  ;;  %v2343_v34 = vsel %vm1188_vm5, %v2341_v29, %v2342_v6 }
 0x202   : > { %v2345_v49 = vsel %vm1188_vm5, %v2342_v6, %v2344_v5  ;;  %v797_v33 = vmul.f32 %v5923_v0, %v6596_v9  ;;  %v3014_v44 = vand.u32 4294901760, %v3013_v43  ;;  %v3023_v57 = vsub.f32 %v5825_v15, %v8226_v48  ;;  %v6748_v43 = vld [vmem:[#allocation2 + $0x108] sm:$0xff] }
 0x203   : > { %v2429_v47 = vadd.f32 %v2343_v34, %v2185_v23  ;;  %v3033_v45 = vsub.f32 %v5856_v32, %v8218_v37  ;;  %v2430_v62 = vadd.f32 %v2345_v49, %v2186_v11  ;;  %v798_v2 = vmul.f32 %v5923_v0, %v6606_v46  ;;  %v8342_v48 = vld [vmem:[#allocation38_spill] sm:$0xff] }
 0x204   : > { %v874_v50 = vmul.f32 %v5851_v63, %v6596_v9  ;;  %v875_v16 = vmul.f32 %v5851_v63, %v6606_v46  ;;  %5081 = vmatmul.mubr.f32.gmra.mxu0 %v3014_v44  ;;  %v3024_v1 = vand.u32 4294901760, %v3023_v57  ;;  %v876_v12 = vmul.f32 %v5851_v63, %v6614_v59 }
 0x205   : > { %v3034_v26 = vand.u32 4294901760, %v3033_v45  ;;  %v1119_v20 = vmul.f32 %v5886_v42, %v6596_v9  ;;  %v2453_v35 = vpack.c.bf16 %v2430_v62, %v2429_v47  ;;  %v1120_v58 = vmul.f32 %v5886_v42, %v6606_v46  ;;  %v6756_v62 = vld [vmem:[#allocation2 + $0x110] sm:$0xff] }
 0x206   : > { %v989_v55 = vrot.slane %v874_v50, 1  ;;  %v990_v61 = vrot.slane %v875_v16, 1  ;;  %5083 = vmatprep.mubr.f32.mxu0 %v3024_v1  ;;  %v992_v39 = vrot.slane %v876_v12, 1  ;;  %v1121_v52 = vmul.f32 %v5886_v42, %v6614_v59 }
 0x207   : > { %v1234_v24 = vrot.slane %v1119_v20, 2  ;;  %v1355_v29 = vmul.f32 %v5984_v14, %v6669_v31  ;;  %5044 = vmatprep.mubr.msk.bf16.mxu1 %vm384_vm1, %v2453_v35  ;;  %v1235_v9 = vrot.slane %v1120_v58, 2  ;;  %v1356_v28 = vmul.f32 %v5984_v14, %v6677_v60 }
 0x208   : > { %v991_v56 = vsel %vm943_vm4, %v989_v55, %v990_v61  ;;  %v1432_v46 = vmul.f32 %v5987_v38, %v6669_v31  ;;  %5084 = vmatmul.mubr.f32.gmra.mxu0 %v3034_v26  ;;  %v993_v6 = vsel %vm943_vm4, %v990_v61, %v992_v39  ;;  %v1237_v59 = vrot.slane %v1121_v52, 2  ;;  %v6762_v26 = vld [vmem:[#allocation2 + $0x118] sm:$0x3] }
 0x209   : > { %v1074_v5 = vadd.f32 %v991_v56, %v797_v33  ;;  %v1433_v23 = vmul.f32 %v5987_v38, %v6677_v60  ;;  %v1075_v11 = vadd.f32 %v993_v6, %v798_v2  ;;  %v1236_v34 = vsel %vm1188_vm5, %v1234_v24, %v1235_v9 }
 0x20a   : > { %v1434_v49 = vmul.f32 %v5987_v38, %v6683_v4  ;;  %v1546_v47 = vrot.slane %v1432_v46, 1  ;;  %v1238_v44 = vsel %vm1188_vm5, %v1235_v9, %v1237_v59  ;;  %v1676_v33 = vmul.f32 %v5990_v53, %v6669_v31 }
 0x20b   : > { %v1319_v57 = vadd.f32 %v1236_v34, %v1074_v5  ;;  %v1547_v45 = vrot.slane %v1433_v23, 1  ;;  %v1320_v50 = vadd.f32 %v1238_v44, %v1075_v11  ;;  %v1677_v2 = vmul.f32 %v5990_v53, %v6677_v60 }
 0x20c   : > { %v1549_v16 = vrot.slane %v1434_v49, 1  ;;  %v1678_v1 = vmul.f32 %v5990_v53, %v6683_v4  ;;  %v1790_v35 = vrot.slane %v1676_v33, 2  ;;  %v1911_v55 = vmul.f32 %v5975_v36, %v6748_v43 }
 0x20d   : > { %v1387_v12 = vadd.f32 %v1355_v29, %v1319_v57  ;;  %v1548_v20 = vsel %vm943_vm4, %v1546_v47, %v1547_v45  ;;  %v1388_v61 = vadd.f32 %v1356_v28, %v1320_v50  ;;  %v1791_v39 = vrot.slane %v1677_v2, 2 }
 0x20e   : > { %v1550_v58 = vsel %vm943_vm4, %v1547_v45, %v1549_v16  ;;  %v1793_v52 = vrot.slane %v1678_v1, 2  ;;  %v1912_v56 = vmul.f32 %v5975_v36, %v6756_v62  ;;  %v1988_v9 = vmul.f32 %v5981_v21, %v6748_v43 }
 0x20f   : > { %v1631_v24 = vadd.f32 %v1548_v20, %v1387_v12  ;;  %v1989_v29 = vmul.f32 %v5981_v21, %v6756_v62  ;;  %v1632_v46 = vadd.f32 %v1550_v58, %v1388_v61  ;;  %v1792_v6 = vsel %vm1188_vm5, %v1790_v35, %v1791_v39 }
 0x210   : > { %v1794_v5 = vsel %vm1188_vm5, %v1791_v39, %v1793_v52  ;;  %v1990_v28 = vmul.f32 %v5981_v21, %v6762_v26  ;;  %v2102_v23 = vrot.slane %v1988_v9, 1  ;;  %v2232_v34 = vmul.f32 %v5993_v8, %v6748_v43 }
 0x211   : > { %v1875_v59 = vadd.f32 %v1792_v6, %v1631_v24  ;;  %v2103_v11 = vrot.slane %v1989_v29, 1  ;;  %v1876_v49 = vadd.f32 %v1794_v5, %v1632_v46  ;;  %v2233_v44 = vmul.f32 %v5993_v8, %v6756_v62 }
 0x212   : > { %v2105_v47 = vrot.slane %v1990_v28, 1  ;;  %v2234_v57 = vmul.f32 %v5993_v8, %v6762_v26  ;;  %v2346_v50 = vrot.slane %v2232_v34, 2  ;;  %v8217_v16 = vand.u32 4294901760, %v5865_v17 }
 0x213   : > { %v1943_v45 = vadd.f32 %v1911_v55, %v1875_v59  ;;  %v2104_v33 = vsel %vm943_vm4, %v2102_v23, %v2103_v11  ;;  %v1944_v2 = vadd.f32 %v1912_v56, %v1876_v49  ;;  %v2347_v12 = vrot.slane %v2233_v44, 2 }
 0x214   : > { %v2106_v1 = vsel %vm943_vm4, %v2103_v11, %v2105_v47  ;;  %v2349_v20 = vrot.slane %v2234_v57, 2  ;;  %v3043_v61 = vsub.f32 %v5865_v17, %v8217_v16  ;;  %v799_v58 = vmul.f32 %v5923_v0, %v6669_v31  ;;  %v8302_v16 = vld [vmem:[#allocation48_spill] sm:$0xff] }
 0x215   : > { %v2187_v35 = vadd.f32 %v2104_v33, %v1943_v45  ;;  %v800_v55 = vmul.f32 %v5923_v0, %v6677_v60  ;;  %v2188_v39 = vadd.f32 %v2106_v1, %v1944_v2  ;;  %v2348_v52 = vsel %vm1188_vm5, %v2346_v50, %v2347_v12 }
 0x216   : > { %v2350_v24 = vsel %vm1188_vm5, %v2347_v12, %v2349_v20  ;;  %v877_v56 = vmul.f32 %v5851_v63, %v6669_v31  ;;  %v3044_v29 = vand.u32 4294901760, %v3043_v61  ;;  %v878_v46 = vmul.f32 %v5851_v63, %v6677_v60 }
 0x217   : > { %v2431_v9 = vadd.f32 %v2348_v52, %v2187_v35  ;;  %v879_v6 = vmul.f32 %v5851_v63, %v6683_v4  ;;  %v2432_v5 = vadd.f32 %v2350_v24, %v2188_v39  ;;  %v1122_v59 = vmul.f32 %v5886_v42, %v6669_v31 }
 0x218   : > { %v994_v28 = vrot.slane %v877_v56, 1  ;;  %v1123_v23 = vmul.f32 %v5886_v42, %v6677_v60  ;;  %5086 = vmatprep.mubr.f32.mxu0 %v3044_v29  ;;  %v995_v11 = vrot.slane %v878_v46, 1  ;;  %v1124_v49 = vmul.f32 %v5886_v42, %v6683_v4  ;;  %v6817_v4 = vld [vmem:[#allocation2 + $0x120] sm:$0xff]  ;;  %v6827_v56 = vld [vmem:[#allocation2 + $0x128] sm:$0xff] }
 0x219   : > { %v997_v34 = vrot.slane %v879_v6, 1  ;;  %v1357_v47 = vmul.f32 %v5984_v14, %v6748_v43  ;;  %v2454_v44 = vpack.c.bf16 %v2432_v5, %v2431_v9  ;;  %v1239_v57 = vrot.slane %v1122_v59, 2  ;;  %v6835_v59 = vld [vmem:[#allocation2 + $0x130] sm:$0x3] }
 0x21a   : > { %v1240_v45 = vrot.slane %v1123_v23, 2  ;;  %v1358_v33 = vmul.f32 %v5984_v14, %v6756_v62  ;;  %v996_v31 = vsel %vm943_vm4, %v994_v28, %v995_v11  ;;  %v1242_v60 = vrot.slane %v1124_v49, 2 }
 0x21b   : > { %v998_v50 = vsel %vm943_vm4, %v995_v11, %v997_v34  ;;  %v1435_v2 = vmul.f32 %v5987_v38, %v6748_v43  ;;  %5045 = vmatmul.mubr.msk.bf16.gmra.mxu1 %vm384_vm1, %v2454_v44  ;;  %v1076_v1 = vadd.f32 %v996_v31, %v799_v58  ;;  %v1436_v35 = vmul.f32 %v5987_v38, %v6756_v62 }
 0x21c   : > { %v1077_v12 = vadd.f32 %v998_v50, %v800_v55  ;;  %v1241_v20 = vsel %vm1188_vm5, %v1239_v57, %v1240_v45  ;;  %v1243_v61 = vsel %vm1188_vm5, %v1240_v45, %v1242_v60  ;;  %v1437_v39 = vmul.f32 %v5987_v38, %v6762_v26 }
 0x21d   : > { %v1551_v52 = vrot.slane %v1435_v2, 1  ;;  %v1679_v24 = vmul.f32 %v5990_v53, %v6748_v43  ;;  %v1321_v9 = vadd.f32 %v1241_v20, %v1076_v1  ;;  %v1552_v58 = vrot.slane %v1436_v35, 1 }
 0x21e   : > { %v1322_v29 = vadd.f32 %v1243_v61, %v1077_v12  ;;  %v1680_v55 = vmul.f32 %v5990_v53, %v6756_v62  ;;  %v1554_v46 = vrot.slane %v1437_v39, 1  ;;  %v1681_v6 = vmul.f32 %v5990_v53, %v6762_v26 }
 0x21f   : > { %v1795_v5 = vrot.slane %v1679_v24, 2  ;;  %v1913_v28 = vmul.f32 %v5975_v36, %v6817_v4  ;;  %v1389_v23 = vadd.f32 %v1357_v47, %v1321_v9  ;;  %v1553_v34 = vsel %vm943_vm4, %v1551_v52, %v1552_v58 }
 0x220   : > { %v1390_v11 = vadd.f32 %v1358_v33, %v1322_v29  ;;  %v1796_v49 = vrot.slane %v1680_v55, 2  ;;  %v1555_v44 = vsel %vm943_vm4, %v1552_v58, %v1554_v46  ;;  %v1798_v57 = vrot.slane %v1681_v6, 2 }
 0x221   : > { %v1914_v45 = vmul.f32 %v5975_v36, %v6827_v56  ;;  %v1991_v31 = vmul.f32 %v5981_v21, %v6817_v4  ;;  %v1633_v50 = vadd.f32 %v1553_v34, %v1389_v23  ;;  %v1992_v47 = vmul.f32 %v5981_v21, %v6827_v56 }
 0x222   : > { %v1634_v60 = vadd.f32 %v1555_v44, %v1390_v11  ;;  %v1797_v2 = vsel %vm1188_vm5, %v1795_v5, %v1796_v49  ;;  %v1799_v33 = vsel %vm1188_vm5, %v1796_v49, %v1798_v57  ;;  %v1993_v1 = vmul.f32 %v5981_v21, %v6835_v59 }
 0x223   : > { %v2107_v12 = vrot.slane %v1991_v31, 1  ;;  %v2235_v20 = vmul.f32 %v5993_v8, %v6817_v4  ;;  %v1877_v35 = vadd.f32 %v1797_v2, %v1633_v50  ;;  %v2108_v39 = vrot.slane %v1992_v47, 1 }
 0x224   : > { %v1878_v61 = vadd.f32 %v1799_v33, %v1634_v60  ;;  %v2236_v52 = vmul.f32 %v5993_v8, %v6827_v56  ;;  %v2110_v24 = vrot.slane %v1993_v1, 1  ;;  %v2237_v9 = vmul.f32 %v5993_v8, %v6835_v59 }
 0x225   : > { %v2351_v29 = vrot.slane %v2235_v20, 2  ;;  %v8216_v58 = vand.u32 4294901760, %v5889_v13  ;;  %v1945_v55 = vadd.f32 %v1913_v28, %v1877_v35  ;;  %v2109_v6 = vsel %vm943_vm4, %v2107_v12, %v2108_v39 }
 0x226   : > { %v1946_v46 = vadd.f32 %v1914_v45, %v1878_v61  ;;  %v2352_v5 = vrot.slane %v2236_v52, 2  ;;  %v2111_v23 = vsel %vm943_vm4, %v2108_v39, %v2110_v24  ;;  %v2354_v11 = vrot.slane %v2237_v9, 2 }
 0x227   : > { %v3053_v34 = vsub.f32 %v5889_v13, %v8216_v58  ;;  %v8215_v49 = vand.u32 4294901760, %v5892_v30  ;;  %v2189_v44 = vadd.f32 %v2109_v6, %v1945_v55  ;;  %v8213_v50 = vand.u32 4294901760, %v5895_v40 }
 0x228   : > { %v2190_v57 = vadd.f32 %v2111_v23, %v1946_v46  ;;  %v2353_v31 = vsel %vm1188_vm5, %v2351_v29, %v2352_v5  ;;  %v2355_v28 = vsel %vm1188_vm5, %v2352_v5, %v2354_v11  ;;  %v801_v2 = vmul.f32 %v5923_v0, %v6748_v43 }
 0x229   : > { %v3054_v45 = vand.u32 4294901760, %v3053_v34  ;;  %v3063_v60 = vsub.f32 %v5892_v30, %v8215_v49  ;;  %v2433_v47 = vadd.f32 %v2353_v31, %v2189_v44  ;;  %v3073_v1 = vsub.f32 %v5895_v40, %v8213_v50 }
 0x22a   : > { %v2434_v33 = vadd.f32 %v2355_v28, %v2190_v57  ;;  %v802_v12 = vmul.f32 %v5923_v0, %v6756_v62  ;;  %v880_v35 = vmul.f32 %v5851_v63, %v6748_v43  ;;  %v881_v61 = vmul.f32 %v5851_v63, %v6756_v62 }
 0x22b   : > { %5087 = vmatmul.mubr.f32.gmra.mxu0 %v3054_v45  ;;  %v3064_v20 = vand.u32 4294901760, %v3063_v60  ;;  %v882_v39 = vmul.f32 %v5851_v63, %v6762_v26  ;;  %v3074_v24 = vand.u32 4294901760, %v3073_v1  ;;  %v1125_v9 = vmul.f32 %v5886_v42, %v6748_v43 }
 0x22c   : > { %v2455_v52 = vpack.c.bf16 %v2434_v33, %v2433_v47  ;;  %v1126_v29 = vmul.f32 %v5886_v42, %v6756_v62  ;;  %v999_v55 = vrot.slane %v880_v35, 1  ;;  %v1000_v46 = vrot.slane %v881_v61, 1  ;;  %v6906_v61 = vld [vmem:[#allocation2 + $0x140] sm:$0xff] }
 0x22d   : > { %5089 = vmatprep.mubr.f32.mxu0 %v3064_v20  ;;  %v1002_v6 = vrot.slane %v882_v39, 1  ;;  %v1127_v5 = vmul.f32 %v5886_v42, %v6762_v26  ;;  %v1244_v23 = vrot.slane %v1125_v9, 2  ;;  %v1359_v34 = vmul.f32 %v5984_v14, %v6817_v4  ;;  %v6896_v26 = vld [vmem:[#allocation2 + $0x138] sm:$0xff] }
 0x22e   : > { %5048 = vmatprep.mubr.msk.bf16.mxu1 %vm384_vm1, %v2455_v52  ;;  %v1245_v11 = vrot.slane %v1126_v29, 2  ;;  %v1360_v43 = vmul.f32 %v5984_v14, %v6827_v56  ;;  %v1001_v62 = vsel %vm943_vm4, %v999_v55, %v1000_v46  ;;  %v1438_v31 = vmul.f32 %v5987_v38, %v6817_v4 }
 0x22f   : > { %5090 = vmatmul.mubr.f32.gmra.mxu0 %v3074_v24  ;;  %v1003_v44 = vsel %vm943_vm4, %v1000_v46, %v1002_v6  ;;  %v1247_v57 = vrot.slane %v1127_v5, 2  ;;  %v1078_v28 = vadd.f32 %v1001_v62, %v801_v2  ;;  %v1439_v47 = vmul.f32 %v5987_v38, %v6827_v56  ;;  %v6914_v46 = vld [vmem:[#allocation2 + $0x148] sm:$0x3] }
 0x230   : > { %v1079_v45 = vadd.f32 %v1003_v44, %v802_v12  ;;  %v1246_v60 = vsel %vm1188_vm5, %v1244_v23, %v1245_v11  ;;  %v1440_v1 = vmul.f32 %v5987_v38, %v6835_v59  ;;  %v1556_v20 = vrot.slane %v1438_v31, 1 }
 0x231   : > { %v1248_v33 = vsel %vm1188_vm5, %v1245_v11, %v1247_v57  ;;  %v1682_v35 = vmul.f32 %v5990_v53, %v6817_v4  ;;  %v1323_v39 = vadd.f32 %v1246_v60, %v1078_v28  ;;  %v1557_v2 = vrot.slane %v1439_v47, 1 }
 0x232   : > { %v1324_v52 = vadd.f32 %v1248_v33, %v1079_v45  ;;  %v1683_v12 = vmul.f32 %v5990_v53, %v6827_v56  ;;  %v1559_v24 = vrot.slane %v1440_v1, 1  ;;  %v1684_v9 = vmul.f32 %v5990_v53, %v6835_v59 }
 0x233   : > { %v1800_v29 = vrot.slane %v1682_v35, 2  ;;  %v1915_v55 = vmul.f32 %v5975_v36, %v6896_v26  ;;  %v1391_v6 = vadd.f32 %v1359_v34, %v1323_v39  ;;  %v1558_v23 = vsel %vm943_vm4, %v1556_v20, %v1557_v2 }
 0x234   : > { %v1392_v5 = vadd.f32 %v1360_v43, %v1324_v52  ;;  %v1801_v11 = vrot.slane %v1683_v12, 2  ;;  %v1560_v62 = vsel %vm943_vm4, %v1557_v2, %v1559_v24  ;;  %v1803_v44 = vrot.slane %v1684_v9, 2  ;;  %v8295_v9 = vld [vmem:[#allocation39_spill] sm:$0xff] }
 0x235   : > { %v1916_v57 = vmul.f32 %v5975_v36, %v6906_v61  ;;  %v1994_v31 = vmul.f32 %v5981_v21, %v6896_v26  ;;  %v1635_v28 = vadd.f32 %v1558_v23, %v1391_v6  ;;  %v1995_v34 = vmul.f32 %v5981_v21, %v6906_v61 }
 0x236   : > { %v1636_v45 = vadd.f32 %v1560_v62, %v1392_v5  ;;  %v1802_v60 = vsel %vm1188_vm5, %v1800_v29, %v1801_v11  ;;  %v1804_v43 = vsel %vm1188_vm5, %v1801_v11, %v1803_v44  ;;  %v1996_v47 = vmul.f32 %v5981_v21, %v6914_v46 }
 0x237   : > { %v2112_v33 = vrot.slane %v1994_v31, 1  ;;  %v2238_v1 = vmul.f32 %v5993_v8, %v6896_v26  ;;  %v1879_v20 = vadd.f32 %v1802_v60, %v1635_v28  ;;  %v2113_v39 = vrot.slane %v1995_v34, 1 }
 0x238   : > { %v1880_v35 = vadd.f32 %v1804_v43, %v1636_v45  ;;  %v2239_v52 = vmul.f32 %v5993_v8, %v6906_v61  ;;  %v2115_v2 = vrot.slane %v1996_v47, 1  ;;  %v2240_v12 = vmul.f32 %v5993_v8, %v6914_v46 }
 0x239   : > { %v2356_v24 = vrot.slane %v2238_v1, 2  ;;  %v8209_v29 = vand.u32 4294901760, %v8295_v9  ;;  %v1947_v6 = vadd.f32 %v1915_v55, %v1879_v20  ;;  %v2114_v23 = vsel %vm943_vm4, %v2112_v33, %v2113_v39 }
 0x23a   : > { %v1948_v5 = vadd.f32 %v1916_v57, %v1880_v35  ;;  %v2357_v11 = vrot.slane %v2239_v52, 2  ;;  %v2116_v62 = vsel %vm943_vm4, %v2113_v39, %v2115_v2  ;;  %v2359_v44 = vrot.slane %v2240_v12, 2 }
 0x23b   : > { %v3083_v31 = vsub.f32 %v8295_v9, %v8209_v29  ;;  %v803_v28 = vmul.f32 %v5923_v0, %v6817_v4  ;;  %v2191_v45 = vadd.f32 %v2114_v23, %v1947_v6  ;;  %v804_v55 = vmul.f32 %v5923_v0, %v6827_v56 }
 0x23c   : > { %v2192_v60 = vadd.f32 %v2116_v62, %v1948_v5  ;;  %v2358_v34 = vsel %vm1188_vm5, %v2356_v24, %v2357_v11  ;;  %v2360_v57 = vsel %vm1188_vm5, %v2357_v11, %v2359_v44  ;;  %v883_v47 = vmul.f32 %v5851_v63, %v6817_v4 }
 0x23d   : > { %v3084_v43 = vand.u32 4294901760, %v3083_v31  ;;  %v884_v33 = vmul.f32 %v5851_v63, %v6827_v56  ;;  %v2435_v1 = vadd.f32 %v2358_v34, %v2191_v45  ;;  %v885_v35 = vmul.f32 %v5851_v63, %v6835_v59  ;;  %v6969_v34 = vld [vmem:[#allocation2 + $0x150] sm:$0xff] }
 0x23e   : > { %v2436_v20 = vadd.f32 %v2360_v57, %v2192_v60  ;;  %v1128_v39 = vmul.f32 %v5886_v42, %v6817_v4  ;;  %v1004_v52 = vrot.slane %v883_v47, 1  ;;  %v1129_v12 = vmul.f32 %v5886_v42, %v6827_v56 }
 0x23f   : > { %5092 = vmatprep.mubr.f32.mxu0 %v3084_v43  ;;  %v1005_v2 = vrot.slane %v884_v33, 1  ;;  %v1130_v24 = vmul.f32 %v5886_v42, %v6835_v59  ;;  %v1007_v5 = vrot.slane %v885_v35, 1  ;;  %v1361_v11 = vmul.f32 %v5984_v14, %v6896_v26 }
 0x240   : > { %v2456_v6 = vpack.c.bf16 %v2436_v20, %v2435_v1  ;;  %v1249_v23 = vrot.slane %v1128_v39, 2  ;;  %v1250_v44 = vrot.slane %v1129_v12, 2  ;;  %v1362_v4 = vmul.f32 %v5984_v14, %v6906_v61  ;;  %v6977_v39 = vld [vmem:[#allocation2 + $0x158] sm:$0xff] }
 0x241   : > { %v1006_v62 = vsel %vm943_vm4, %v1004_v52, %v1005_v2  ;;  %v1252_v31 = vrot.slane %v1130_v24, 2  ;;  %v1008_v56 = vsel %vm943_vm4, %v1005_v2, %v1007_v5  ;;  %v1441_v59 = vmul.f32 %v5987_v38, %v6896_v26  ;;  %v6983_v24 = vld [vmem:[#allocation2 + $0x160] sm:$0x3] }
 0x242   : > { %5049 = vmatmul.mubr.msk.bf16.gmra.mxu1 %vm384_vm1, %v2456_v6  ;;  %v1080_v45 = vadd.f32 %v1006_v62, %v803_v28  ;;  %v1442_v60 = vmul.f32 %v5987_v38, %v6906_v61  ;;  %v1081_v57 = vadd.f32 %v1008_v56, %v804_v55  ;;  %v1251_v43 = vsel %vm1188_vm5, %v1249_v23, %v1250_v44 }
 0x243   : > { %v1253_v47 = vsel %vm1188_vm5, %v1250_v44, %v1252_v31  ;;  %v1443_v33 = vmul.f32 %v5987_v38, %v6914_v46  ;;  %v1561_v20 = vrot.slane %v1441_v59, 1  ;;  %v1685_v28 = vmul.f32 %v5990_v53, %v6896_v26 }
 0x244   : > { %v1325_v1 = vadd.f32 %v1251_v43, %v1080_v45  ;;  %v1562_v35 = vrot.slane %v1442_v60, 1  ;;  %v1326_v52 = vadd.f32 %v1253_v47, %v1081_v57  ;;  %v1686_v55 = vmul.f32 %v5990_v53, %v6906_v61 }
 0x245   : > { %v1564_v2 = vrot.slane %v1443_v33, 1  ;;  %v1687_v12 = vmul.f32 %v5990_v53, %v6914_v46  ;;  %v1805_v23 = vrot.slane %v1685_v28, 2  ;;  %v1917_v62 = vmul.f32 %v5975_v36, %v6969_v34 }
 0x246   : > { %v1393_v6 = vadd.f32 %v1361_v11, %v1325_v1  ;;  %v1563_v5 = vsel %vm943_vm4, %v1561_v20, %v1562_v35  ;;  %v1394_v44 = vadd.f32 %v1362_v4, %v1326_v52  ;;  %v1806_v56 = vrot.slane %v1686_v55, 2 }
 0x247   : > { %v1565_v31 = vsel %vm943_vm4, %v1562_v35, %v1564_v2  ;;  %v1808_v45 = vrot.slane %v1687_v12, 2  ;;  %v1918_v60 = vmul.f32 %v5975_v36, %v6977_v39  ;;  %v1997_v57 = vmul.f32 %v5981_v21, %v6969_v34 }
 0x248   : > { %v1637_v59 = vadd.f32 %v1563_v5, %v1393_v6  ;;  %v1998_v11 = vmul.f32 %v5981_v21, %v6977_v39  ;;  %v1638_v43 = vadd.f32 %v1565_v31, %v1394_v44  ;;  %v1807_v47 = vsel %vm1188_vm5, %v1805_v23, %v1806_v56  ;;  %v8296_v44 = vld [vmem:[#allocation40_spill] sm:$0xff] }
 0x249   : > { %v1809_v33 = vsel %vm1188_vm5, %v1806_v56, %v1808_v45  ;;  %v1999_v4 = vmul.f32 %v5981_v21, %v6983_v24  ;;  %v2117_v20 = vrot.slane %v1997_v57, 1  ;;  %v2241_v28 = vmul.f32 %v5993_v8, %v6969_v34 }
 0x24a   : > { %v1881_v1 = vadd.f32 %v1807_v47, %v1637_v59  ;;  %v2118_v35 = vrot.slane %v1998_v11, 1  ;;  %v1882_v52 = vadd.f32 %v1809_v33, %v1638_v43  ;;  %v2242_v55 = vmul.f32 %v5993_v8, %v6977_v39  ;;  %v8297_v47 = vld [vmem:[#allocation41_spill] sm:$0xff] }
 0x24b   : > { %v2120_v2 = vrot.slane %v1999_v4, 1  ;;  %v2243_v12 = vmul.f32 %v5993_v8, %v6983_v24  ;;  %v2361_v23 = vrot.slane %v2241_v28, 2  ;;  %v8212_v31 = vand.u32 4294901760, %v8296_v44  ;;  %v8298_v4 = vld [vmem:[#allocation42_spill] sm:$0xff] }
 0x24c   : > { %v1949_v6 = vadd.f32 %v1917_v62, %v1881_v1  ;;  %v2119_v5 = vsel %vm943_vm4, %v2117_v20, %v2118_v35  ;;  %v1950_v56 = vadd.f32 %v1918_v60, %v1882_v52  ;;  %v2362_v59 = vrot.slane %v2242_v55, 2 }
 0x24d   : > { %v2121_v45 = vsel %vm943_vm4, %v2118_v35, %v2120_v2  ;;  %v2364_v57 = vrot.slane %v2243_v12, 2  ;;  %v3093_v43 = vsub.f32 %v8296_v44, %v8212_v31  ;;  %v8211_v33 = vand.u32 4294901760, %v8297_v47 }
 0x24e   : > { %v2193_v11 = vadd.f32 %v2119_v5, %v1949_v6  ;;  %v8210_v29 = vand.u32 4294901760, %v8298_v4  ;;  %v2194_v62 = vadd.f32 %v2121_v45, %v1950_v56  ;;  %v2363_v1 = vsel %vm1188_vm5, %v2361_v23, %v2362_v59 }
 0x24f   : > { %v2365_v20 = vsel %vm1188_vm5, %v2362_v59, %v2364_v57  ;;  %v805_v60 = vmul.f32 %v5923_v0, %v6896_v26  ;;  %v3094_v28 = vand.u32 4294901760, %v3093_v43  ;;  %v3103_v52 = vsub.f32 %v8297_v47, %v8211_v33 }
 0x250   : > { %v2437_v35 = vadd.f32 %v2363_v1, %v2193_v11  ;;  %v3113_v2 = vsub.f32 %v8298_v4, %v8210_v29  ;;  %v2438_v55 = vadd.f32 %v2365_v20, %v2194_v62  ;;  %v806_v12 = vmul.f32 %v5923_v0, %v6906_v61 }
 0x251   : > { %v886_v6 = vmul.f32 %v5851_v63, %v6896_v26  ;;  %v887_v5 = vmul.f32 %v5851_v63, %v6906_v61  ;;  %5093 = vmatmul.mubr.f32.gmra.mxu0 %v3094_v28  ;;  %v3104_v23 = vand.u32 4294901760, %v3103_v52  ;;  %v888_v45 = vmul.f32 %v5851_v63, %v6914_v46 }
 0x252   : > { %v3114_v56 = vand.u32 4294901760, %v3113_v2  ;;  %v1131_v59 = vmul.f32 %v5886_v42, %v6896_v26  ;;  %v2457_v57 = vpack.c.bf16 %v2438_v55, %v2437_v35  ;;  %v1132_v62 = vmul.f32 %v5886_v42, %v6906_v61 }
 0x253   : > { %v1009_v11 = vrot.slane %v886_v6, 1  ;;  %v1010_v43 = vrot.slane %v887_v5, 1  ;;  %5095 = vmatprep.mubr.f32.mxu0 %v3104_v23  ;;  %v1012_v1 = vrot.slane %v888_v45, 1  ;;  %v1133_v20 = vmul.f32 %v5886_v42, %v6914_v46  ;;  %v7048_v23 = vld [vmem:[#allocation2 + $0x168] sm:$0xff] }
 0x254   : > { %v1254_v28 = vrot.slane %v1131_v59, 2  ;;  %v1363_v52 = vmul.f32 %v5984_v14, %v6969_v34  ;;  %5052 = vmatprep.mubr.msk.bf16.mxu1 %vm384_vm1, %v2457_v57  ;;  %v1255_v26 = vrot.slane %v1132_v62, 2  ;;  %v1364_v35 = vmul.f32 %v5984_v14, %v6977_v39 }
 0x255   : > { %v1011_v2 = vsel %vm943_vm4, %v1009_v11, %v1010_v43  ;;  %v1444_v61 = vmul.f32 %v5987_v38, %v6969_v34  ;;  %5096 = vmatmul.mubr.f32.gmra.mxu0 %v3114_v56  ;;  %v1013_v55 = vsel %vm943_vm4, %v1010_v43, %v1012_v1  ;;  %v1257_v46 = vrot.slane %v1133_v20, 2  ;;  %v7056_v43 = vld [vmem:[#allocation2 + $0x170] sm:$0xff] }
 0x256   : > { %v1082_v6 = vadd.f32 %v1011_v2, %v805_v60  ;;  %v1445_v5 = vmul.f32 %v5987_v38, %v6977_v39  ;;  %v1083_v45 = vadd.f32 %v1013_v55, %v806_v12  ;;  %v1256_v59 = vsel %vm1188_vm5, %v1254_v28, %v1255_v26  ;;  %v7062_v2 = vld [vmem:[#allocation2 + $0x178] sm:$0x3] }
 0x257   : > { %v1446_v57 = vmul.f32 %v5987_v38, %v6983_v24  ;;  %v1566_v11 = vrot.slane %v1444_v61, 1  ;;  %v1258_v62 = vsel %vm1188_vm5, %v1255_v26, %v1257_v46  ;;  %v1688_v60 = vmul.f32 %v5990_v53, %v6969_v34 }
 0x258   : > { %v1327_v29 = vadd.f32 %v1256_v59, %v1082_v6  ;;  %v1567_v56 = vrot.slane %v1445_v5, 1  ;;  %v1328_v1 = vadd.f32 %v1258_v62, %v1083_v45  ;;  %v1689_v12 = vmul.f32 %v5990_v53, %v6977_v39 }
 0x259   : > { %v1569_v20 = vrot.slane %v1446_v57, 1  ;;  %v1690_v28 = vmul.f32 %v5990_v53, %v6983_v24  ;;  %v1810_v55 = vrot.slane %v1688_v60, 2  ;;  %v1919_v6 = vmul.f32 %v5975_v36, %v7048_v23 }
 0x25a   : > { %v1395_v61 = vadd.f32 %v1363_v52, %v1327_v29  ;;  %v1568_v26 = vsel %vm943_vm4, %v1566_v11, %v1567_v56  ;;  %v1396_v46 = vadd.f32 %v1364_v35, %v1328_v1  ;;  %v1811_v45 = vrot.slane %v1689_v12, 2 }
 0x25b   : > { %v1570_v5 = vsel %vm943_vm4, %v1567_v56, %v1569_v20  ;;  %v1813_v59 = vrot.slane %v1690_v28, 2  ;;  %v1920_v62 = vmul.f32 %v5975_v36, %v7056_v43  ;;  %v2000_v33 = vmul.f32 %v5981_v21, %v7048_v23 }
 0x25c   : > { %v1639_v57 = vadd.f32 %v1568_v26, %v1395_v61  ;;  %v2001_v29 = vmul.f32 %v5981_v21, %v7056_v43  ;;  %v1640_v52 = vadd.f32 %v1570_v5, %v1396_v46  ;;  %v1812_v11 = vsel %vm1188_vm5, %v1810_v55, %v1811_v45 }
 0x25d   : > { %v1814_v60 = vsel %vm1188_vm5, %v1811_v45, %v1813_v59  ;;  %v2002_v35 = vmul.f32 %v5981_v21, %v7062_v2  ;;  %v2122_v1 = vrot.slane %v2000_v33, 1  ;;  %v2244_v12 = vmul.f32 %v5993_v8, %v7048_v23  ;;  %v8299_v59 = vld [vmem:[#allocation43_spill] sm:$0xff] }
 0x25e   : > { %v1883_v56 = vadd.f32 %v1812_v11, %v1639_v57  ;;  %v2123_v20 = vrot.slane %v2001_v29, 1  ;;  %v1884_v28 = vadd.f32 %v1814_v60, %v1640_v52  ;;  %v2245_v26 = vmul.f32 %v5993_v8, %v7056_v43 }
 0x25f   : > { %v2125_v61 = vrot.slane %v2002_v35, 1  ;;  %v2246_v46 = vmul.f32 %v5993_v8, %v7062_v2  ;;  %v2366_v45 = vrot.slane %v2244_v12, 2  ;;  %v8214_v31 = vand.u32 4294901760, %v8299_v59 }
 0x260   : > { %v1951_v55 = vadd.f32 %v1919_v6, %v1883_v56  ;;  %v2124_v5 = vsel %vm943_vm4, %v2122_v1, %v2123_v20  ;;  %v1952_v57 = vadd.f32 %v1920_v62, %v1884_v28  ;;  %v2367_v29 = vrot.slane %v2245_v26, 2 }
 0x261   : > { %v2126_v33 = vsel %vm943_vm4, %v2123_v20, %v2125_v61  ;;  %v2369_v11 = vrot.slane %v2246_v46, 2  ;;  %v3123_v52 = vsub.f32 %v8299_v59, %v8214_v31  ;;  %v807_v60 = vmul.f32 %v5923_v0, %v6969_v34 }
 0x262   : > { %v2195_v50 = vadd.f32 %v2124_v5, %v1951_v55  ;;  %v808_v6 = vmul.f32 %v5923_v0, %v6977_v39  ;;  %v2196_v35 = vadd.f32 %v2126_v33, %v1952_v57  ;;  %v2368_v56 = vsel %vm1188_vm5, %v2366_v45, %v2367_v29 }
 0x263   : > { %v2370_v62 = vsel %vm1188_vm5, %v2367_v29, %v2369_v11  ;;  %v889_v1 = vmul.f32 %v5851_v63, %v6969_v34  ;;  %v3124_v12 = vand.u32 4294901760, %v3123_v52  ;;  %v890_v28 = vmul.f32 %v5851_v63, %v6977_v39 }
 0x264   : > { %v2439_v20 = vadd.f32 %v2368_v56, %v2195_v50  ;;  %v891_v61 = vmul.f32 %v5851_v63, %v6983_v24  ;;  %v2440_v26 = vadd.f32 %v2370_v62, %v2196_v35  ;;  %v1134_v55 = vmul.f32 %v5886_v42, %v6969_v34 }
 0x265   : > { %v1014_v46 = vrot.slane %v889_v1, 1  ;;  %v1135_v5 = vmul.f32 %v5886_v42, %v6977_v39  ;;  %5098 = vmatprep.mubr.f32.mxu0 %v3124_v12  ;;  %v1015_v45 = vrot.slane %v890_v28, 1  ;;  %v1136_v50 = vmul.f32 %v5886_v42, %v6983_v24  ;;  %v7117_v24 = vld [vmem:[#allocation2 + $0x180] sm:$0xff] }
 0x266   : > { %v1017_v57 = vrot.slane %v891_v61, 1  ;;  %v1365_v33 = vmul.f32 %v5984_v14, %v7048_v23  ;;  %v2458_v29 = vpack.c.bf16 %v2440_v26, %v2439_v20  ;;  %v1259_v11 = vrot.slane %v1134_v55, 2 }
 0x267   : > { %v1260_v52 = vrot.slane %v1135_v5, 2  ;;  %v1366_v35 = vmul.f32 %v5984_v14, %v7056_v43  ;;  %v1016_v34 = vsel %vm943_vm4, %v1014_v46, %v1015_v45  ;;  %v1262_v39 = vrot.slane %v1136_v50, 2  ;;  %v7127_v5 = vld [vmem:[#allocation2 + $0x188] sm:$0xff] }
 0x268   : > { %v1018_v56 = vsel %vm943_vm4, %v1015_v45, %v1017_v57  ;;  %v1447_v62 = vmul.f32 %v5987_v38, %v7048_v23  ;;  %5053 = vmatmul.mubr.msk.bf16.gmra.mxu1 %vm384_vm1, %v2458_v29  ;;  %v1084_v1 = vadd.f32 %v1016_v34, %v807_v60  ;;  %v1448_v28 = vmul.f32 %v5987_v38, %v7056_v43  ;;  %v7135_v34 = vld [vmem:[#allocation2 + $0x190] sm:$0x3] }
 0x269   : > { %v1085_v12 = vadd.f32 %v1018_v56, %v808_v6  ;;  %v1261_v20 = vsel %vm1188_vm5, %v1259_v11, %v1260_v52  ;;  %v1263_v61 = vsel %vm1188_vm5, %v1260_v52, %v1262_v39  ;;  %v1449_v26 = vmul.f32 %v5987_v38, %v7062_v2 }
 0x26a   : > { %v1571_v46 = vrot.slane %v1447_v62, 1  ;;  %v1691_v55 = vmul.f32 %v5990_v53, %v7048_v23  ;;  %v1329_v45 = vadd.f32 %v1261_v20, %v1084_v1  ;;  %v1572_v60 = vrot.slane %v1448_v28, 1 }
 0x26b   : > { %v1330_v57 = vadd.f32 %v1263_v61, %v1085_v12  ;;  %v1692_v6 = vmul.f32 %v5990_v53, %v7056_v43  ;;  %v1574_v50 = vrot.slane %v1449_v26, 1  ;;  %v1693_v29 = vmul.f32 %v5990_v53, %v7062_v2 }
 0x26c   : > { %v1815_v11 = vrot.slane %v1691_v55, 2  ;;  %v1921_v52 = vmul.f32 %v5975_v36, %v7117_v24  ;;  %v1397_v56 = vadd.f32 %v1365_v33, %v1329_v45  ;;  %v1573_v62 = vsel %vm943_vm4, %v1571_v46, %v1572_v60 }
 0x26d   : > { %v1398_v39 = vadd.f32 %v1366_v35, %v1330_v57  ;;  %v1816_v1 = vrot.slane %v1692_v6, 2  ;;  %v1575_v12 = vsel %vm943_vm4, %v1572_v60, %v1574_v50  ;;  %v1818_v20 = vrot.slane %v1693_v29, 2 }
 0x26e   : > { %v1922_v28 = vmul.f32 %v5975_v36, %v7127_v5  ;;  %v2003_v61 = vmul.f32 %v5981_v21, %v7117_v24  ;;  %v1641_v26 = vadd.f32 %v1573_v62, %v1397_v56  ;;  %v2004_v33 = vmul.f32 %v5981_v21, %v7127_v5  ;;  %v8300_v62 = vld [vmem:[#allocation46_spill] sm:$0xff] }
 0x26f   : > { %v1642_v55 = vadd.f32 %v1575_v12, %v1398_v39  ;;  %v1817_v31 = vsel %vm1188_vm5, %v1815_v11, %v1816_v1  ;;  %v1819_v35 = vsel %vm1188_vm5, %v1816_v1, %v1818_v20  ;;  %v2005_v46 = vmul.f32 %v5981_v21, %v7135_v34 }
 0x270   : > { %v2127_v45 = vrot.slane %v2003_v61, 1  ;;  %v2247_v57 = vmul.f32 %v5993_v8, %v7117_v24  ;;  %v1885_v60 = vadd.f32 %v1817_v31, %v1641_v26  ;;  %v2128_v50 = vrot.slane %v2004_v33, 1 }
 0x271   : > { %v1886_v6 = vadd.f32 %v1819_v35, %v1642_v55  ;;  %v2248_v29 = vmul.f32 %v5993_v8, %v7127_v5  ;;  %v2130_v56 = vrot.slane %v2005_v46, 1  ;;  %v2249_v11 = vmul.f32 %v5993_v8, %v7135_v34  ;;  %v8301_v55 = vld [vmem:[#allocation47_spill] sm:$0xff] }
 0x272   : > { %v2371_v39 = vrot.slane %v2247_v57, 2  ;;  %v8225_v1 = vand.u32 4294901760, %v8300_v62  ;;  %v1953_v12 = vadd.f32 %v1921_v52, %v1885_v60  ;;  %v2129_v61 = vsel %vm943_vm4, %v2127_v45, %v2128_v50 }
 0x273   : > { %v1954_v20 = vadd.f32 %v1922_v28, %v1886_v6  ;;  %v2372_v49 = vrot.slane %v2248_v29, 2  ;;  %v2131_v58 = vsel %vm943_vm4, %v2128_v50, %v2130_v56  ;;  %v2374_v31 = vrot.slane %v2249_v11, 2 }
 0x274   : > { %v3133_v26 = vsub.f32 %v8300_v62, %v8225_v1  ;;  %v8224_v33 = vand.u32 4294901760, %v8301_v55  ;;  %v2197_v35 = vadd.f32 %v2129_v61, %v1953_v12  ;;  %v8223_v37 = vand.u32 4294901760, %v8302_v16  ;;  %v8341_v1 = vld [vmem:[#allocation37_spill] sm:$0xff] }
 0x275   : > { %v2198_v46 = vadd.f32 %v2131_v58, %v1954_v20  ;;  %v2373_v57 = vsel %vm1188_vm5, %v2371_v39, %v2372_v49  ;;  %v2375_v52 = vsel %vm1188_vm5, %v2372_v49, %v2374_v31  ;;  %v809_v60 = vmul.f32 %v5923_v0, %v7048_v23 }
 0x276   : > { %v3134_v28 = vand.u32 4294901760, %v3133_v26  ;;  %v3143_v45 = vsub.f32 %v8301_v55, %v8224_v33  ;;  %v2441_v6 = vadd.f32 %v2373_v57, %v2197_v35  ;;  %v3153_v58 = vsub.f32 %v8302_v16, %v8223_v37  ;;  %v8339_v37 = vld [vmem:[#allocation35_spill] sm:$0xff]  ;;  %v8340_v33 = vld [vmem:[#allocation36_spill] sm:$0xff] }
 0x277   : > { %v2442_v50 = vadd.f32 %v2375_v52, %v2198_v46  ;;  %v810_v29 = vmul.f32 %v5923_v0, %v7056_v43  ;;  %v892_v49 = vmul.f32 %v5851_v63, %v7048_v23  ;;  %v893_v11 = vmul.f32 %v5851_v63, %v7056_v43 }
 0x278   : > { %5099 = vmatmul.mubr.f32.gmra.mxu0 %v3134_v28  ;;  %v3144_v56 = vand.u32 4294901760, %v3143_v45  ;;  %v894_v39 = vmul.f32 %v5851_v63, %v7062_v2  ;;  %v3154_v20 = vand.u32 4294901760, %v3153_v58  ;;  %v1137_v61 = vmul.f32 %v5886_v42, %v7048_v23 }
 0x279   : > { %v2459_v12 = vpack.c.bf16 %v2442_v50, %v2441_v6  ;;  %v1138_v31 = vmul.f32 %v5886_v42, %v7056_v43  ;;  %v1019_v0 = vrot.slane %v892_v49, 1  ;;  %v1020_v26 = vrot.slane %v893_v11, 1 }
 0x27a   : > { %5101 = vmatprep.mubr.f32.mxu0 %v3144_v56  ;;  %v1022_v35 = vrot.slane %v894_v39, 1  ;;  %v1139_v46 = vmul.f32 %v5886_v42, %v7062_v2  ;;  %v1264_v57 = vrot.slane %v1137_v61, 2  ;;  %v1367_v63 = vmul.f32 %v5984_v14, %v7117_v24  ;;  %v772_v42 = vld [vmem:[#allocation2 + $0x198] sm:$0xff] }
 0x27b   : > { %5056 = vmatprep.mubr.msk.bf16.mxu1 %vm384_vm1, %v2459_v12  ;;  %v1265_v52 = vrot.slane %v1138_v31, 2  ;;  %v1368_v23 = vmul.f32 %v5984_v14, %v7127_v5  ;;  %v1021_v43 = vsel %vm943_vm4, %v1019_v0, %v1020_v26  ;;  %v1450_v6 = vmul.f32 %v5987_v38, %v7117_v24  ;;  %v773_v12 = vld [vmem:[#allocation2 + $0x1a0] sm:$0xff] }
 0x27c   : > { %5102 = vmatmul.mubr.f32.gmra.mxu0 %v3154_v20  ;;  %v1023_v28 = vsel %vm943_vm4, %v1020_v26, %v1022_v35  ;;  %v1267_v45 = vrot.slane %v1139_v46, 2  ;;  %v1086_v2 = vadd.f32 %v1021_v43, %v809_v60  ;;  %v1451_v56 = vmul.f32 %v5987_v38, %v7127_v5  ;;  %v774_v46 = vld [vmem:[#allocation2 + $0x1a8] sm:$0x3] }
 0x27d   : > { %v1087_v50 = vadd.f32 %v1023_v28, %v810_v29  ;;  %v1266_v58 = vsel %vm1188_vm5, %v1264_v57, %v1265_v52  ;;  %v1452_v14 = vmul.f32 %v5987_v38, %v7135_v34  ;;  %v1576_v11 = vrot.slane %v1450_v6, 1 }
 0x27e   : > { %v1268_v49 = vsel %vm1188_vm5, %v1265_v52, %v1267_v45  ;;  %v1694_v39 = vmul.f32 %v5990_v53, %v7117_v24  ;;  %v1331_v20 = vadd.f32 %v1266_v58, %v1086_v2  ;;  %v1577_v31 = vrot.slane %v1451_v56, 1 }
 0x27f   : > { %v1332_v61 = vadd.f32 %v1268_v49, %v1087_v50  ;;  %v1695_v60 = vmul.f32 %v5990_v53, %v7127_v5  ;;  %v1579_v29 = vrot.slane %v1452_v14, 1  ;;  %v1696_v0 = vmul.f32 %v5990_v53, %v7135_v34 }
 0x280   : > { %v1820_v26 = vrot.slane %v1694_v39, 2  ;;  %v1923_v35 = vmul.f32 %v5975_v36, %v772_v42  ;;  %v1399_v38 = vadd.f32 %v1367_v63, %v1331_v20  ;;  %v1578_v52 = vsel %vm943_vm4, %v1576_v11, %v1577_v31 }
 0x281   : > { %v1400_v57 = vadd.f32 %v1368_v23, %v1332_v61  ;;  %v1821_v24 = vrot.slane %v1695_v60, 2  ;;  %v1580_v43 = vsel %vm943_vm4, %v1577_v31, %v1579_v29  ;;  %v1823_v28 = vrot.slane %v1696_v0, 2  ;;  %v8303_v61 = vld [vmem:[#allocation53_spill] sm:$0xff] }
 0x282   : > { %v1924_v45 = vmul.f32 %v5975_v36, %v773_v12  ;;  %v2006_v5 = vmul.f32 %v5981_v21, %v772_v42  ;;  %v1643_v6 = vadd.f32 %v1578_v52, %v1399_v38  ;;  %v2007_v34 = vmul.f32 %v5981_v21, %v773_v12 }
 0x283   : > { %v1644_v2 = vadd.f32 %v1580_v43, %v1400_v57  ;;  %v1822_v53 = vsel %vm1188_vm5, %v1820_v26, %v1821_v24  ;;  %v1824_v50 = vsel %vm1188_vm5, %v1821_v24, %v1823_v28  ;;  %v2008_v63 = vmul.f32 %v5981_v21, %v774_v46  ;;  %v8304_v57 = vld [vmem:[#allocation54_spill] sm:$0xff] }
 0x284   : > { %v2132_v23 = vrot.slane %v2006_v5, 1  ;;  %v2250_v58 = vmul.f32 %v5993_v8, %v772_v42  ;;  %v1887_v56 = vadd.f32 %v1822_v53, %v1643_v6  ;;  %v2133_v14 = vrot.slane %v2007_v34, 1  ;;  %v8306_v5 = vld [vmem:[#allocation56_spill] sm:$0xff] }
 0x285   : > { %v1888_v49 = vadd.f32 %v1824_v50, %v1644_v2  ;;  %v2251_v36 = vmul.f32 %v5993_v8, %v773_v12  ;;  %v2135_v11 = vrot.slane %v2008_v63, 1  ;;  %v2252_v39 = vmul.f32 %v5993_v8, %v774_v46  ;;  %v8305_v46 = vld [vmem:[#allocation55_spill] sm:$0xff] }
 0x286   : > { %v2376_v20 = vrot.slane %v2250_v58, 2  ;;  %v8222_v31 = vand.u32 4294901760, %v8303_v61  ;;  %v1955_v60 = vadd.f32 %v1923_v35, %v1887_v56  ;;  %v2134_v0 = vsel %vm943_vm4, %v2132_v23, %v2133_v14 }
 0x287   : > { %v1956_v29 = vadd.f32 %v1924_v45, %v1888_v49  ;;  %v2377_v26 = vrot.slane %v2251_v36, 2  ;;  %v2136_v21 = vsel %vm943_vm4, %v2133_v14, %v2135_v11  ;;  %v2379_v38 = vrot.slane %v2252_v39, 2  ;;  %v8307_v49 = vld [vmem:[#allocation6_spill] sm:$0xff]  ;;  %v8308_v14 = vld [vmem:[#allocation7_spill] sm:$0xff]  ;;  %v8309_v36 = vld [vmem:[#allocation4_spill] sm:$0xff] }
 0x288   : > { %v3163_v42 = vsub.f32 %v8303_v61, %v8222_v31  ;;  %v8221_v12 = vand.u32 4294901760, %v8304_v57  ;;  %v2199_v52 = vadd.f32 %v2134_v0, %v1955_v60  ;;  %v8220_v43 = vand.u32 4294901760, %v8305_v46  ;;  %v8310_v11 = vld [vmem:[#allocation3_spill] sm:$0xff]  ;;  %v8311_v39 = vld [vmem:[#allocation10_spill] sm:$0xff]  ;;  %v8313_v60 = vld [vmem:[#allocation5_spill] sm:$0xff] }
 0x289   : > { %v2200_v24 = vadd.f32 %v2136_v21, %v1956_v29  ;;  %v2378_v8 = vsel %vm1188_vm5, %v2376_v20, %v2377_v26  ;;  %v2380_v35 = vsel %vm1188_vm5, %v2377_v26, %v2379_v38  ;;  %v8219_v6 = vand.u32 4294901760, %v8306_v5  ;;  %v8312_v20 = vld [vmem:[#allocation8_spill] sm:$0xff]  ;;  %v8314_v29 = vld [vmem:[#allocation11_spill] sm:$0xff]  ;;  %v8315_v0 = vld [vmem:[#allocation9_spill] sm:$0xff] }
 0x28a   : > { %v3164_v28 = vand.u32 4294901760, %v3163_v42  ;;  %v3173_v45 = vsub.f32 %v8304_v57, %v8221_v12  ;;  %v2443_v2 = vadd.f32 %v2378_v8, %v2199_v52  ;;  %v3183_v34 = vsub.f32 %v8305_v46, %v8220_v43  ;;  %v8316_v26 = vld [vmem:[#allocation13_spill] sm:$0xff]  ;;  %v8317_v21 = vld [vmem:[#allocation12_spill] sm:$0xff]  ;;  %v8318_v38 = vld [vmem:[#allocation18_spill] sm:$0xff] }
 0x28b   : > { %v2444_v53 = vadd.f32 %v2380_v35, %v2200_v24  ;;  %v3193_v63 = vsub.f32 %v8306_v5, %v8219_v6  ;;  %v8319_v42 = vld [vmem:[#allocation14_spill] sm:$0xff]  ;;  %v8320_v52 = vld [vmem:[#allocation19_spill] sm:$0xff]  ;;  %v8322_v8 = vld [vmem:[#allocation20_spill] sm:$0xff] }
 0x28c   : > { %5104 = vmatprep.mubr.f32.mxu0 %v3164_v28  ;;  %v3174_v50 = vand.u32 4294901760, %v3173_v45  ;;  %v3184_v58 = vand.u32 4294901760, %v3183_v34  ;;  %v8321_v24 = vld [vmem:[#allocation15_spill] sm:$0xff]  ;;  %v8323_v35 = vld [vmem:[#allocation16_spill] sm:$0xff]  ;;  %v8325_v45 = vld [vmem:[#allocation17_spill] sm:$0xff] }
 0x28d   : > { %v2460_v23 = vpack.c.bf16 %v2444_v53, %v2443_v2  ;;  %v3194_v56 = vand.u32 4294901760, %v3193_v63  ;;  %v8324_v28 = vld [vmem:[#allocation24_spill] sm:$0xff]  ;;  %v8326_v2 = vld [vmem:[#allocation21_spill] sm:$0xff]  ;;  %v8327_v53 = vld [vmem:[#allocation22_spill] sm:$0xff] }
 0x28e   : > { %5105 = vmatmul.mubr.f32.gmra.mxu0 %v3174_v50  ;;  %v8328_v34 = vld [vmem:[#allocation23_spill] sm:$0xff]  ;;  %v8329_v50 = vld [vmem:[#allocation25_spill] sm:$0xff]  ;;  %v8330_v63 = vld [vmem:[#allocation26_spill] sm:$0xff] }
 0x28f   : > { %5057 = vmatmul.mubr.msk.bf16.gmra.mxu1 %vm384_vm1, %v2460_v23  ;;  %5107 = vmatprep.mubr.f32.mxu0 %v3184_v58  ;;  %v8331_v23 = vld [vmem:[#allocation27_spill] sm:$0xff]  ;;  %v8332_v58 = vld [vmem:[#allocation28_spill] sm:$0xff]  ;;  %v8337_v12 = vld [vmem:[#allocation33_spill] sm:$0xff] }
 0x290   : > { %5112 = vmatprep.mubr.f32.mxu1 %v8307_v49  ;;  %v8335_v6 = vld [vmem:[#allocation31_spill] sm:$0xff]  ;;  %v8336_v43 = vld [vmem:[#allocation32_spill] sm:$0xff]  ;;  %v8338_v31 = vld [vmem:[#allocation34_spill] sm:$0xff] }
 0x292   : > { %5108 = vmatmul.mubr.f32.gmra.mxu0 %v3194_v56  ;;  %v8333_v56 = vld [vmem:[#allocation29_spill] sm:$0xff] }
 0x293   : > { %5162 = vmatprep.mubr.f32.mxu0 %v8308_v14 }
 0x296   : > { %5163 = vmatmul.mubr.f32.vlgmr.msra.gmra.mxu0 %v8309_v36 }
 0x297   : > { %5113 = vmatmul.mubr.f32.vlgmr.msra.gmra.mxu1 %v8310_v11  ;;  %5165 = vmatprep.mubr.f32.mxu0 %v8311_v39 }
 0x298   : > { %5211 = vmatpush3.msra.mxu1 %v5672_v27  ;;  %5115 = vmatprep.mubr.f32.mxu1 %v8312_v20 }
 0x299   : > { %5261 = vmatpush3.msra.mxu0 %v8313_v60  ;;  %5310 = vmatprep.subr.mxu1 %v5672_v27  ;;  %v8334_v60 = vld [vmem:[#allocation30_spill] sm:$0xff] }
 0x29a   : > { %5166 = vmatmul.mubr.f32.gmra.mxu0 %v8314_v29 }
 0x29b   : > { %5116 = vmatmul.mubr.f32.gmra.mxu1 %v8315_v0  ;;  %5168 = vmatprep.mubr.f32.mxu0 %v8316_v26 }
 0x29c   : > { %5118 = vmatprep.mubr.f32.mxu1 %v8317_v21 }
 0x29e   : > { %5169 = vmatmul.mubr.f32.gmra.mxu0 %v8318_v38 }
 0x29f   : > { %5119 = vmatmul.mubr.f32.gmra.mxu1 %v8319_v42  ;;  %5171 = vmatprep.mubr.f32.mxu0 %v8320_v52 }
 0x2a0   : > { %5121 = vmatprep.mubr.f32.mxu1 %v8321_v24 }
 0x2a2   : > { %5172 = vmatmul.mubr.f32.gmra.mxu0 %v8322_v8 }
 0x2a3   : > { %5122 = vmatmul.mubr.f32.gmra.mxu1 %v8323_v35  ;;  %5174 = vmatprep.mubr.f32.mxu0 %v8324_v28 }
 0x2a4   : > { %5124 = vmatprep.mubr.f32.mxu1 %v8325_v45 }
 0x2a6   : > { %5175 = vmatmul.mubr.f32.gmra.mxu0 %v5793_v22 }
 0x2a7   : > { %5125 = vmatmul.mubr.f32.gmra.mxu1 %v8326_v2  ;;  %5177 = vmatprep.mubr.f32.mxu0 %v5796_v7 }
 0x2a8   : > { %5127 = vmatprep.mubr.f32.mxu1 %v8327_v53 }
 0x2aa   : > { %5178 = vmatmul.mubr.f32.gmra.mxu0 %v5799_v3 }
 0x2ab   : > { %5128 = vmatmul.mubr.f32.gmra.mxu1 %v8328_v34  ;;  %5180 = vmatprep.mubr.f32.mxu0 %v5815_v10 }
 0x2ac   : > { %5130 = vmatprep.mubr.f32.mxu1 %v8329_v50 }
 0x2ae   : > { %5181 = vmatmul.mubr.f32.gmra.mxu0 %v5818_v25 }
 0x2af   : > { %5131 = vmatmul.mubr.f32.gmra.mxu1 %v8330_v63  ;;  %5183 = vmatprep.mubr.f32.mxu0 %v5825_v15 }
 0x2b0   : > { %5133 = vmatprep.mubr.f32.mxu1 %v8331_v23 }
 0x2b2   : > { %5184 = vmatmul.mubr.f32.gmra.mxu0 %v5856_v32 }
 0x2b3   : > { %5134 = vmatmul.mubr.f32.gmra.mxu1 %v8332_v58  ;;  %5186 = vmatprep.mubr.f32.mxu0 %v5865_v17 }
 0x2b4   : > { %5136 = vmatprep.mubr.f32.mxu1 %v8333_v56 }
 0x2b6   : > { %5187 = vmatmul.mubr.f32.gmra.mxu0 %v5889_v13 }
 0x2b7   : > { %5137 = vmatmul.mubr.f32.gmra.mxu1 %v8334_v60  ;;  %5189 = vmatprep.mubr.f32.mxu0 %v5892_v30 }
 0x2b8   : > { %5139 = vmatprep.mubr.f32.mxu1 %v8335_v6 }
 0x2ba   : > { %5190 = vmatmul.mubr.f32.gmra.mxu0 %v5895_v40 }
 0x2bb   : > { %5140 = vmatmul.mubr.f32.gmra.mxu1 %v8336_v43  ;;  %5192 = vmatprep.mubr.f32.mxu0 %v8295_v9 }
 0x2bc   : > { %5142 = vmatprep.mubr.f32.mxu1 %v8337_v12 }
 0x2be   : > { %5193 = vmatmul.mubr.f32.gmra.mxu0 %v8296_v44 }
 0x2bf   : > { %5143 = vmatmul.mubr.f32.gmra.mxu1 %v8338_v31  ;;  %5195 = vmatprep.mubr.f32.mxu0 %v8297_v47 }
 0x2c0   : > { %5145 = vmatprep.mubr.f32.mxu1 %v8339_v37 }
 0x2c2   : > { %5196 = vmatmul.mubr.f32.gmra.mxu0 %v8298_v4 }
 0x2c3   : > { %5146 = vmatmul.mubr.f32.gmra.mxu1 %v8340_v33  ;;  %5198 = vmatprep.mubr.f32.mxu0 %v8299_v59 }
 0x2c4   : > { %5148 = vmatprep.mubr.f32.mxu1 %v8341_v1 }
 0x2c6   : > { %5199 = vmatmul.mubr.f32.gmra.mxu0 %v8300_v62 }
 0x2c7   : > { %5149 = vmatmul.mubr.f32.gmra.mxu1 %v8342_v48  ;;  %5201 = vmatprep.mubr.f32.mxu0 %v8301_v55  ;;  %v8348_v55 = vld [vmem:[#allocation52_spill] sm:$0xff] }
 0x2c8   : > { %5151 = vmatprep.mubr.f32.mxu1 %v8343_v41 }
 0x2ca   : > { %5202 = vmatmul.mubr.f32.gmra.mxu0 %v8302_v16  ;;  %v8349_v16 = vand.u32 4294901760, %v8308_v14  ;;  %v8354_v14 = vand.u32 4294901760, %v8318_v38  ;;  %v8358_v38 = vand.u32 4294901760, %v5793_v22  ;;  %v8361_v22 = vand.u32 4294901760, %v5815_v10 }
 0x2cb   : > { %5152 = vmatmul.mubr.f32.gmra.mxu1 %v8344_v18  ;;  %5204 = vmatprep.mubr.f32.mxu0 %v8303_v61  ;;  %v8350_v61 = vand.u32 4294901760, %v8309_v36  ;;  %v8356_v36 = vand.u32 4294901760, %v8322_v8  ;;  %v8359_v8 = vand.u32 4294901760, %v5796_v7  ;;  %v8362_v7 = vand.u32 4294901760, %v5818_v25 }
 0x2cc   : > { %5154 = vmatprep.mubr.f32.mxu1 %v8345_v51  ;;  %v8364_v10 = vand.u32 4294901760, %v5856_v32  ;;  %v8365_v25 = vand.u32 4294901760, %v5865_v17  ;;  %v8367_v32 = vand.u32 4294901760, %v5892_v30  ;;  %v8368_v17 = vand.u32 4294901760, %v5895_v40 }
 0x2cd   : > { %v8370_v30 = vand.u32 4294901760, %v8296_v44  ;;  %v8372_v40 = vand.u32 4294901760, %v8297_v47  ;;  %v8375_v44 = vand.u32 4294901760, %v8299_v59  ;;  %v8376_v47 = vand.u32 4294901760, %v8300_v62  ;;  %v8381_v59 = vld [vmem:[#allocation48_spill] sm:$0xff]  ;;  %v8384_v62 = vld [vmem:[#allocation53_spill] sm:$0xff] }
 0x2ce   : > { %5205 = vmatmul.mubr.f32.gmra.mxu0 %v8304_v57 }
 0x2cf   : > { %5155 = vmatmul.mubr.f32.gmra.mxu1 %v8346_v19  ;;  %5207 = vmatprep.mubr.f32.mxu0 %v8305_v46  ;;  %v8351_v46 = vand.u32 4294901760, %v8311_v39 }
 0x2d0   : > { %5157 = vmatprep.mubr.f32.mxu1 %v8347_v54 }
 0x2d2   : > { %5208 = vmatmul.mubr.f32.gmra.mxu0 %v8306_v5  ;;  %v8352_v5 = vand.u32 4294901760, %v8314_v29  ;;  %v8357_v29 = vand.u32 4294901760, %v8324_v28  ;;  %v8360_v28 = vand.u32 4294901760, %v5799_v3  ;;  %v8363_v3 = vand.u32 4294901760, %v5825_v15 }
 0x2d3   : > { %5158 = vmatmul.mubr.f32.gmra.mxu1 %v8348_v55  ;;  %5262 = vmatprep.mubr.f32.mxu0 %v8307_v49  ;;  %v8366_v15 = vand.u32 4294901760, %v5889_v13  ;;  %v8369_v13 = vand.u32 4294901760, %v8295_v9  ;;  %v8373_v9 = vand.u32 4294901760, %v8298_v4  ;;  %v8378_v4 = vld [vmem:[#allocation47_spill] sm:$0xff] }
 0x2d4   : > { %5212 = vmatprep.mubr.f32.mxu1 %v8349_v16  ;;  %v8353_v16 = vand.u32 4294901760, %v8316_v26 }
 0x2d6   : > { %5263 = vmatmul.mubr.f32.vlgmr.msra.gmra.mxu0 %v8310_v11 }
 0x2d7   : > { %5213 = vmatmul.mubr.f32.vlgmr.msra.gmra.mxu1 %v8350_v61  ;;  %5265 = vmatprep.mubr.f32.mxu0 %v8312_v20  ;;  %v7325_v61 = vpop.f32.mrf.mxu0 }
 0x2d8   : > { %5311 = vmatpush3.msra.mxu1 %v5672_v27  ;;  %5215 = vmatprep.mubr.f32.mxu1 %v8351_v46  ;;  %v7330_v27 = vpop.f32.mrf.mxu1  ;;  %v8355_v46 = vand.u32 4294901760, %v8320_v52 }
 0x2da   : > { %5266 = vmatmul.mubr.f32.gmra.mxu0 %v8315_v0  ;;  %v7340_v39 = vpop.f32.mrf.mxu1 }
 0x2db   : > { %5216 = vmatmul.mubr.f32.gmra.mxu1 %v8352_v5  ;;  %5268 = vmatprep.mubr.f32.mxu0 %v8317_v21  ;;  %v7335_v5 = vpop.f32.mrf.mxu0 }
 0x2dc   : > { %5218 = vmatprep.mubr.f32.mxu1 %v8353_v16  ;;  %v7350_v52 = vpop.f32.mrf.mxu1 }
 0x2dd   : > { %v7345_v26 = vpop.f32.mrf.mxu0 }
 0x2de   : > { %5269 = vmatmul.mubr.f32.gmra.mxu0 %v8319_v42 }
 0x2df   : > { %5219 = vmatmul.mubr.f32.gmra.mxu1 %v8354_v14  ;;  %5271 = vmatprep.mubr.f32.mxu0 %v8321_v24  ;;  %v7355_v16 = vpop.f32.mrf.mxu0  ;;  %v7360_v14 = vpop.f32.mrf.mxu1 }
 0x2e0   : > { %5221 = vmatprep.mubr.f32.mxu1 %v8355_v46 }
 0x2e1   : > { %v7365_v46 = vpop.f32.mrf.mxu0 }
 0x2e2   : > { %5272 = vmatmul.mubr.f32.gmra.mxu0 %v8323_v35 }
 0x2e3   : > { %5222 = vmatmul.mubr.f32.gmra.mxu1 %v8356_v36  ;;  %5274 = vmatprep.mubr.f32.mxu0 %v8325_v45  ;;  %v7370_v36 = vpop.f32.mrf.mxu1 }
 0x2e4   : > { %5224 = vmatprep.mubr.f32.mxu1 %v8357_v29  ;;  %v7375_v29 = vpop.f32.mrf.mxu0 }
 0x2e6   : > { %5275 = vmatmul.mubr.f32.gmra.mxu0 %v8326_v2 }
 0x2e7   : > { %5225 = vmatmul.mubr.f32.gmra.mxu1 %v8358_v38  ;;  %5277 = vmatprep.mubr.f32.mxu0 %v8327_v53  ;;  %v7380_v38 = vpop.f32.mrf.mxu1 }
 0x2e8   : > { %5227 = vmatprep.mubr.f32.mxu1 %v8359_v8  ;;  %v7385_v8 = vpop.f32.mrf.mxu0 }
 0x2ea   : > { %5278 = vmatmul.mubr.f32.gmra.mxu0 %v8328_v34 }
 0x2eb   : > { %5228 = vmatmul.mubr.f32.gmra.mxu1 %v8360_v28  ;;  %5280 = vmatprep.mubr.f32.mxu0 %v8329_v50  ;;  %v7390_v28 = vpop.f32.mrf.mxu1 }
 0x2ec   : > { %5230 = vmatprep.mubr.f32.mxu1 %v8361_v22  ;;  %v7395_v22 = vpop.f32.mrf.mxu0 }
 0x2ee   : > { %5281 = vmatmul.mubr.f32.gmra.mxu0 %v8330_v63 }
 0x2ef   : > { %5231 = vmatmul.mubr.f32.gmra.mxu1 %v8362_v7  ;;  %5283 = vmatprep.mubr.f32.mxu0 %v8331_v23  ;;  %v7400_v7 = vpop.f32.mrf.mxu1 }
 0x2f0   : > { %5233 = vmatprep.mubr.f32.mxu1 %v8363_v3  ;;  %v7405_v3 = vpop.f32.mrf.mxu0 }
 0x2f2   : > { %5284 = vmatmul.mubr.f32.gmra.mxu0 %v8332_v58 }
 0x2f3   : > { %5234 = vmatmul.mubr.f32.gmra.mxu1 %v8364_v10  ;;  %5286 = vmatprep.mubr.f32.mxu0 %v8333_v56  ;;  %v7410_v10 = vpop.f32.mrf.mxu1 }
 0x2f4   : > { %5236 = vmatprep.mubr.f32.mxu1 %v8365_v25  ;;  %8371 = vst [vmem:[#allocation39_spill] sm:$0xff] %v7410_v10  ;;  %v7415_v25 = vpop.f32.mrf.mxu0 }
 0x2f6   : > { %5287 = vmatmul.mubr.f32.gmra.mxu0 %v8334_v60 }
 0x2f7   : > { %5237 = vmatmul.mubr.f32.gmra.mxu1 %v8366_v15  ;;  %5289 = vmatprep.mubr.f32.mxu0 %v8335_v6  ;;  %v7420_v15 = vpop.f32.mrf.mxu1 }
 0x2f8   : > { %5239 = vmatprep.mubr.f32.mxu1 %v8367_v32  ;;  %8374 = vst [vmem:[#allocation40_spill] sm:$0xff] %v7420_v15  ;;  %v7425_v32 = vpop.f32.mrf.mxu0 }
 0x2fa   : > { %5290 = vmatmul.mubr.f32.gmra.mxu0 %v8336_v43 }
 0x2fb   : > { %5240 = vmatmul.mubr.f32.gmra.mxu1 %v8368_v17  ;;  %5292 = vmatprep.mubr.f32.mxu0 %v8337_v12  ;;  %v7430_v17 = vpop.f32.mrf.mxu1 }
 0x2fc   : > { %5242 = vmatprep.mubr.f32.mxu1 %v8369_v13  ;;  %8377 = vst [vmem:[#allocation41_spill] sm:$0xff] %v7430_v17  ;;  %v8379_v13 = vand.u32 4294901760, %v8378_v4  ;;  %v8387_v4 = vand.u32 4294901760, %v8304_v57 }
 0x2fe   : > { %5293 = vmatmul.mubr.f32.gmra.mxu0 %v8338_v31 }
 0x2ff   : > { %5243 = vmatmul.mubr.f32.gmra.mxu1 %v8370_v30  ;;  %5295 = vmatprep.mubr.f32.mxu0 %v8339_v37  ;;  %v7435_v30 = vpop.f32.mrf.mxu0 }
 0x300   : > { %5245 = vmatprep.mubr.f32.mxu1 %v8372_v40  ;;  %8380 = vst [vmem:[#allocation42_spill] sm:$0xff] %v7435_v30  ;;  %v8382_v40 = vand.u32 4294901760, %v8381_v59  ;;  %v8389_v59 = vld [vmem:[#allocation55_spill] sm:$0xff] }
 0x302   : > { %5296 = vmatmul.mubr.f32.gmra.mxu0 %v8340_v33 }
 0x303   : > { %5246 = vmatmul.mubr.f32.gmra.mxu1 %v8373_v9  ;;  %5298 = vmatprep.mubr.f32.mxu0 %v8341_v1  ;;  %v7440_v9 = vpop.f32.mrf.mxu1 }
 0x304   : > { %5248 = vmatprep.mubr.f32.mxu1 %v8375_v44  ;;  %8383 = vst [vmem:[#allocation43_spill] sm:$0xff] %v7440_v9  ;;  %v8385_v44 = vand.u32 4294901760, %v8384_v62  ;;  %v8392_v62 = vld [vmem:[#allocation56_spill] sm:$0xff] }
 0x306   : > { %5299 = vmatmul.mubr.f32.gmra.mxu0 %v8342_v48 }
 0x307   : > { %5249 = vmatmul.mubr.f32.gmra.mxu1 %v8376_v47  ;;  %5301 = vmatprep.mubr.f32.mxu0 %v8343_v41  ;;  %v7445_v47 = vpop.f32.mrf.mxu0 }
 0x308   : > { %5251 = vmatprep.mubr.f32.mxu1 %v8379_v13  ;;  %8386 = vst [vmem:[#allocation46_spill] sm:$0xff] %v7445_v47  ;;  %v7450_v13 = vpop.f32.mrf.mxu1 }
 0x309   : > { %8388 = vst [vmem:[#allocation54_spill] sm:$0xff] %v7450_v13  ;;  %v7455_v10 = vpop.f32.mrf.mxu0 }
 0x30a   : > { %5302 = vmatmul.mubr.f32.gmra.mxu0 %v8344_v18  ;;  %8391 = vst [vmem:[#allocation6_spill] sm:$0xff] %v7455_v10  ;;  %v7459_v17 = vpop.f32.mrf.mxu1 }
 0x30b   : > { %5252 = vmatmul.mubr.f32.gmra.mxu1 %v8382_v40  ;;  %5304 = vmatprep.mubr.f32.mxu0 %v8345_v51  ;;  %v8390_v40 = vand.u32 4294901760, %v8389_v59  ;;  %8394 = vst [vmem:[#allocation7_spill] sm:$0xff] %v7459_v17  ;;  %v7462_v57 = vpop.f32.mrf.mxu0 }
 0x30c   : > { %5254 = vmatprep.mubr.f32.mxu1 %v8385_v44  ;;  %v8393_v44 = vand.u32 4294901760, %v8392_v62  ;;  %8395 = vst [vmem:[#allocation4_spill] sm:$0xff] %v7462_v57 }
 0x30d   : > { %v7468_v59 = vpop.f32.mrf.mxu0 }
 0x30e   : > { %5305 = vmatmul.mubr.f32.gmra.mxu0 %v8346_v19  ;;  %8397 = vst [vmem:[#allocation10_spill] sm:$0xff] %v7468_v59 }
 0x30f   : > { %5255 = vmatmul.mubr.f32.gmra.mxu1 %v8387_v4  ;;  %5307 = vmatprep.mubr.f32.mxu0 %v8347_v54  ;;  %v7465_v4 = vpop.f32.mrf.mxu1  ;;  %v7474_v62 = vpop.f32.mrf.mxu0 }
 0x310   : > { %5257 = vmatprep.mubr.f32.mxu1 %v8390_v40  ;;  %8396 = vst [vmem:[#allocation3_spill] sm:$0xff] %v7465_v4  ;;  %8399 = vst [vmem:[#allocation5_spill] sm:$0xff] %v7474_v62 }
 0x311   : > { %v7471_v40 = vpop.f32.mrf.mxu1 }
 0x312   : > { %5308 = vmatmul.mubr.f32.gmra.mxu0 %v8348_v55  ;;  %8398 = vst [vmem:[#allocation8_spill] sm:$0xff] %v7471_v40 }
 0x313   : > { %5258 = vmatmul.mubr.f32.gmra.mxu1 %v8393_v44 }
 0x314   : > { %5312 = vmatprep.mubr.f32.mxu1 %v8307_v49  ;;  %v7477_v49 = vpop.f32.mrf.mxu1 }
 0x315   : > { %8400 = vst [vmem:[#allocation11_spill] sm:$0xff] %v7477_v49 }
 0x317   : > { %5313 = vmatmul.mubr.f32.vlgmr.msra.gmra.mxu1 %v8310_v11  ;;  %v7480_v11 = vpop.f32.mrf.mxu0 }
 0x318   : > { %5315 = vmatprep.mubr.f32.mxu1 %v8312_v20  ;;  %8401 = vst [vmem:[#allocation9_spill] sm:$0xff] %v7480_v11  ;;  %v7483_v20 = vpop.f32.mrf.mxu1 }
 0x319   : > { %8402 = vst [vmem:[#allocation13_spill] sm:$0xff] %v7483_v20 }
 0x31b   : > { %5316 = vmatmul.mubr.f32.gmra.mxu1 %v8315_v0  ;;  %v7486_v0 = vpop.f32.mrf.mxu0 }
 0x31c   : > { %5318 = vmatprep.mubr.f32.mxu1 %v8317_v21  ;;  %8403 = vst [vmem:[#allocation12_spill] sm:$0xff] %v7486_v0  ;;  %v7489_v21 = vpop.f32.mrf.mxu1 }
 0x31d   : > { %8404 = vst [vmem:[#allocation18_spill] sm:$0xff] %v7489_v21 }
 0x31f   : > { %5319 = vmatmul.mubr.f32.gmra.mxu1 %v8319_v42  ;;  %v7492_v42 = vpop.f32.mrf.mxu0 }
 0x320   : > { %5321 = vmatprep.mubr.f32.mxu1 %v8321_v24  ;;  %8405 = vst [vmem:[#allocation14_spill] sm:$0xff] %v7492_v42  ;;  %v7495_v24 = vpop.f32.mrf.mxu1 }
 0x321   : > { %8406 = vst [vmem:[#allocation19_spill] sm:$0xff] %v7495_v24 }
 0x323   : > { %5322 = vmatmul.mubr.f32.gmra.mxu1 %v8323_v35  ;;  %v7498_v35 = vpop.f32.mrf.mxu0 }
 0x324   : > { %5324 = vmatprep.mubr.f32.mxu1 %v8325_v45  ;;  %8407 = vst [vmem:[#allocation15_spill] sm:$0xff] %v7498_v35  ;;  %v7501_v45 = vpop.f32.mrf.mxu1 }
 0x325   : > { %8408 = vst [vmem:[#allocation20_spill] sm:$0xff] %v7501_v45 }
 0x327   : > { %5325 = vmatmul.mubr.f32.gmra.mxu1 %v8326_v2  ;;  %v7504_v2 = vpop.f32.mrf.mxu0 }
 0x328   : > { %5327 = vmatprep.mubr.f32.mxu1 %v8327_v53  ;;  %8409 = vst [vmem:[#allocation16_spill] sm:$0xff] %v7504_v2  ;;  %v7507_v53 = vpop.f32.mrf.mxu1 }
 0x329   : > { %8410 = vst [vmem:[#allocation24_spill] sm:$0xff] %v7507_v53 }
 0x32b   : > { %5328 = vmatmul.mubr.f32.gmra.mxu1 %v8328_v34  ;;  %v7510_v34 = vpop.f32.mrf.mxu0 }
 0x32c   : > { %5330 = vmatprep.mubr.f32.mxu1 %v8329_v50  ;;  %8411 = vst [vmem:[#allocation17_spill] sm:$0xff] %v7510_v34  ;;  %v7513_v50 = vpop.f32.mrf.mxu1 }
 0x32d   : > { %8412 = vst [vmem:[#allocation21_spill] sm:$0xff] %v7513_v50 }
 0x32f   : > { %5331 = vmatmul.mubr.f32.gmra.mxu1 %v8330_v63  ;;  %v7516_v63 = vpop.f32.mrf.mxu0 }
 0x330   : > { %5333 = vmatprep.mubr.f32.mxu1 %v8331_v23  ;;  %8413 = vst [vmem:[#allocation22_spill] sm:$0xff] %v7516_v63  ;;  %v7519_v23 = vpop.f32.mrf.mxu1 }
 0x331   : > { %8414 = vst [vmem:[#allocation23_spill] sm:$0xff] %v7519_v23 }
 0x333   : > { %5334 = vmatmul.mubr.f32.gmra.mxu1 %v8332_v58 }
 0x334   : > { %5336 = vmatprep.mubr.f32.mxu1 %v8333_v56  ;;  %v7525_v56 = vpop.f32.mrf.mxu1 }
 0x335   : > { %8416 = vst [vmem:[#allocation26_spill] sm:$0xff] %v7525_v56 }
 0x337   : > { %5337 = vmatmul.mubr.f32.gmra.mxu1 %v8334_v60 }
 0x338   : > { %5339 = vmatprep.mubr.f32.mxu1 %v8335_v6  ;;  %v7522_v58 = vpop.f32.mrf.mxu0  ;;  %v7531_v6 = vpop.f32.mrf.mxu1 }
 0x339   : > { %8415 = vst [vmem:[#allocation25_spill] sm:$0xff] %v7522_v58  ;;  %8418 = vst [vmem:[#allocation28_spill] sm:$0xff] %v7531_v6 }
 0x33a   : > { %v7528_v60 = vpop.f32.mrf.mxu0 }
 0x33b   : > { %5340 = vmatmul.mubr.f32.gmra.mxu1 %v8336_v43  ;;  %8417 = vst [vmem:[#allocation27_spill] sm:$0xff] %v7528_v60 }
 0x33c   : > { %5342 = vmatprep.mubr.f32.mxu1 %v8337_v12  ;;  %v7534_v43 = vpop.f32.mrf.mxu0  ;;  %v7537_v12 = vpop.f32.mrf.mxu1 }
 0x33d   : > { %8419 = vst [vmem:[#allocation29_spill] sm:$0xff] %v7534_v43  ;;  %8420 = vst [vmem:[#allocation30_spill] sm:$0xff] %v7537_v12 }
 0x33f   : > { %5343 = vmatmul.mubr.f32.gmra.mxu1 %v8338_v31  ;;  %v7540_v31 = vpop.f32.mrf.mxu0 }
 0x340   : > { %5345 = vmatprep.mubr.f32.mxu1 %v8339_v37  ;;  %v7543_v37 = vpop.f32.mrf.mxu1 }
 0x341   : > { %8421 = vst [vmem:[#allocation31_spill] sm:$0xff] %v7543_v37 }
 0x343   : > { %5346 = vmatmul.mubr.f32.gmra.mxu1 %v8340_v33 }
 0x344   : > { %5348 = vmatprep.mubr.f32.mxu1 %v8341_v1 }
 0x347   : > { %5349 = vmatmul.mubr.f32.gmra.mxu1 %v8342_v48 }
 0x348   : > { %5351 = vmatprep.mubr.f32.mxu1 %v8343_v41 }
 0x34b   : > { %5352 = vmatmul.mubr.f32.gmra.mxu1 %v8344_v18 }
 0x34c   : > { %5354 = vmatprep.mubr.f32.mxu1 %v8345_v51 }
 0x34e   : > { %v7546_v33 = vpop.f32.mrf.mxu0 }
 0x34f   : > { %v7548_v44 = vpop.f32.mrf.mxu1  ;;  %5355 = vmatmul.mubr.f32.gmra.mxu1 %v8346_v19 }
 0x350   : > { %8422 = vst [vmem:[#allocation32_spill] sm:$0xff] %v7548_v44  ;;  %5357 = vmatprep.mubr.f32.mxu1 %v8347_v54  ;;  %v7552_v48 = vpop.f32.mrf.mxu0 }
 0x351   : > { %v7554_v1 = vpop.f32.mrf.mxu1 }
 0x352   : > { %8423 = vst [vmem:[#allocation33_spill] sm:$0xff] %v7554_v1  ;;  %v7556_v41 = vpop.f32.mrf.mxu0 }
 0x353   : > { %v7558_v56 = vpop.f32.mrf.mxu1  ;;  %5358 = vmatmul.mubr.f32.gmra.mxu1 %v8348_v55 }
 0x354   : > { %8424 = vst [vmem:[#allocation34_spill] sm:$0xff] %v7558_v56  ;;  %v7561_v18 = vpop.f32.mrf.mxu0 }
 0x355   : > { %v7563_v51 = vpop.f32.mrf.mxu1 }
 0x356   : > { %8425 = vst [vmem:[#allocation35_spill] sm:$0xff] %v7563_v51  ;;  %v7565_v12 = vpop.f32.mrf.mxu0 }
 0x357   : > { %v7567_v44 = vpop.f32.mrf.mxu1 }
 0x358   : > { %v7569_v19 = vpop.f32.mrf.mxu0 }
 0x359   : > { %v7571_v54 = vpop.f32.mrf.mxu1 }
 0x35a   : > { %v7573_v6 = vpop.f32.mrf.mxu0 }
 0x35b   : > { %v7575_v1 = vpop.f32.mrf.mxu1 }
 0x35c   : > { %v7577_v37 = vpop.f32.mrf.mxu0 }
 0x35d   : > { %v7579_v56 = vpop.f32.mrf.mxu1 }
 0x35e   : > { %v7581_v55 = vpop.f32.mrf.mxu0 }
 0x35f   : > { %v7583_v45 = vpop.f32.mrf.mxu1 }
 0x360   : > { %v7585_v51 = vpop.f32.mrf.mxu0 }
 0x361   : > { %v7587_v43 = vpop.f32.mrf.mxu1 }
 0x362   : > { %v7589_v50 = vpop.f32.mrf.mxu0 }
 0x363   : > { %v7591_v60 = vpop.f32.mrf.mxu1 }
 0x364   : > { %v7593_v53 = vpop.f32.mrf.mxu0 }
 0x365   : > { %v7595_v58 = vpop.f32.mrf.mxu1 }
 0x366   : > { %v7597_v23 = vpop.f32.mrf.mxu0 }
 0x367   : > { %v7599_v63 = vpop.f32.mrf.mxu1 }
 0x368   : > { %v7601_v49 = vpop.f32.mrf.mxu0 }
 0x369   : > { %8426 = vst [vmem:[#allocation36_spill] sm:$0xff] %v7601_v49  ;;  %v7603_v34 = vpop.f32.mrf.mxu1 }
 0x36a   : > { %v7605_v21 = vpop.f32.mrf.mxu0 }
 0x36b   : > { %8427 = vst [vmem:[#allocation37_spill] sm:$0xff] %v7605_v21  ;;  %v7607_v2 = vpop.f32.mrf.mxu1 }
 0x36c   : > { %v7609_v20 = vpop.f32.mrf.mxu0 }
 0x36d   : > { %8428 = vst [vmem:[#allocation38_spill] sm:$0xff] %v7609_v20  ;;  %v7611_v35 = vpop.f32.mrf.mxu1 }
 0x36e   : > { %8429 = vst [vmem:[#allocation44_spill] sm:$0xff] %v7611_v35  ;;  %v7613_v24 = vpop.f32.mrf.mxu0 }
 0x36f   : > { %8430 = vst [vmem:[#allocation45_spill] sm:$0xff] %v7613_v24  ;;  %v7615_v42 = vpop.f32.mrf.mxu1 }
 0x370   : > { %8431 = vst [vmem:[#allocation49_spill] sm:$0xff] %v7615_v42  ;;  %v7617_v13 = vpop.f32.mrf.mxu0 }
 0x371   : > { %8432 = vst [vmem:[#allocation50_spill] sm:$0xff] %v7617_v13  ;;  %v7619_v0 = vpop.f32.mrf.mxu1 }
 0x372   : > { %8433 = vst [vmem:[#allocation51_spill] sm:$0xff] %v7619_v0  ;;  %v7621_v4 = vpop.f32.mrf.mxu0 }
 0x373   : > { %8434 = vst [vmem:[#allocation52_spill] sm:$0xff] %v7621_v4  ;;  %v7623_v11 = vpop.f32.mrf.mxu1 }
 0x374   : > { %8435 = vst [vmem:[#allocation47_spill] sm:$0xff] %v7623_v11  ;;  %v7625_v17 = vpop.f32.mrf.mxu0 }
 0x375   : > { %8436 = vst [vmem:[#allocation48_spill] sm:$0xff] %v7625_v17  ;;  %v7627_v62 = vpop.f32.mrf.mxu1 }
 0x376   : > { %8437 = vst [vmem:[#allocation53_spill] sm:$0xff] %v7627_v62  ;;  %v7629_v40 = vpop.f32.mrf.mxu0 }
 0x377   : > { %8438 = vst [vmem:[#allocation55_spill] sm:$0xff] %v7629_v40  ;;  %v7631_v59 = vpop.f32.mrf.mxu1 }
 0x378   : > { %8439 = vst [vmem:[#allocation56_spill] sm:$0xff] %v7631_v59  ;;  %v7633_v57 = vpop.f32.mrf.mxu0 }
 0x379   : > { %8440 = vst [vmem:[#allocation57_spill] sm:$0xff] %v7633_v57  ;;  %v7635_v24 = vpop.f32.mrf.mxu1 }
 0x37a   : > { %8441 = vst [vmem:[#allocation58_spill] sm:$0xff] %v7635_v24  ;;  %v7637_v10 = vpop.f32.mrf.mxu0 }
 0x37b   : > { %8442 = vst [vmem:[#allocation59_spill] sm:$0xff] %v7637_v10  ;;  %v7639_v13 = vpop.f32.mrf.mxu1 }
 0x37c   : > { %8443 = vst [vmem:[#allocation60_spill] sm:$0xff] %v7639_v13  ;;  %v7641_v0 = vpop.f32.mrf.mxu0 }
 0x37d   : > { %8444 = vst [vmem:[#allocation61_spill] sm:$0xff] %v7641_v0  ;;  %v7643_v4 = vpop.f32.mrf.mxu1 }
 0x37e   : > { %8445 = vst [vmem:[#allocation62_spill] sm:$0xff] %v7643_v4  ;;  %v7645_v11 = vpop.f32.mrf.mxu0 }
 0x37f   : > { %8446 = vst [vmem:[#allocation63_spill] sm:$0xff] %v7645_v11  ;;  %v7647_v17 = vpop.f32.mrf.mxu1 }
 0x380   : > { %8447 = vst [vmem:[#allocation64_spill] sm:$0xff] %v7647_v17  ;;  %v7649_v62 = vpop.f32.mrf.mxu0 }
 0x381   : > { %8448 = vst [vmem:[#allocation65_spill] sm:$0xff] %v7649_v62  ;;  %v7651_v40 = vpop.f32.mrf.mxu1 }
 0x382   : > { %8449 = vst [vmem:[#allocation66_spill] sm:$0xff] %v7651_v40  ;;  %v7653_v59 = vpop.f32.mrf.mxu0 }
 0x383   : > { %8450 = vst [vmem:[#allocation67_spill] sm:$0xff] %v7653_v59  ;;  %v7655_v57 = vpop.f32.mrf.mxu1 }
 0x384   : > { %8451 = vst [vmem:[#allocation68_spill] sm:$0xff] %v7655_v57  ;;  %v7657_v24 = vpop.f32.mrf.mxu0 }
 0x385   : > { %8452 = vst [vmem:[#allocation69_spill] sm:$0xff] %v7657_v24  ;;  %v7659_v10 = vpop.f32.mrf.mxu1 }
 0x386   : > { %8453 = vst [vmem:[#allocation70_spill] sm:$0xff] %v7659_v10  ;;  %v7661_v13 = vpop.f32.mrf.mxu0 }
 0x387   : > { %8454 = vst [vmem:[#allocation71_spill] sm:$0xff] %v7661_v13  ;;  %v7663_v0 = vpop.f32.mrf.mxu1 }
 0x388   : > { %8455 = vst [vmem:[#allocation72_spill] sm:$0xff] %v7663_v0  ;;  %v7665_v4 = vpop.f32.mrf.mxu0 }
 0x389   : > { %8456 = vst [vmem:[#allocation73_spill] sm:$0xff] %v7665_v4  ;;  %v7667_v11 = vpop.f32.mrf.mxu1 }
 0x38a   : > { %8457 = vst [vmem:[#allocation74_spill] sm:$0xff] %v7667_v11  ;;  %v7669_v17 = vpop.f32.mrf.mxu0 }
 0x38b   : > { %8458 = vst [vmem:[#allocation75_spill] sm:$0xff] %v7669_v17  ;;  %v7671_v62 = vpop.f32.mrf.mxu1 }
 0x38c   : > { %8459 = vst [vmem:[#allocation76_spill] sm:$0xff] %v7671_v62  ;;  %v7673_v40 = vpop.f32.mrf.mxu0 }
 0x38d   : > { %8460 = vst [vmem:[#allocation77_spill] sm:$0xff] %v7673_v40  ;;  %v3428_v59 = vpop.f32.mrf.mxu1 }
 0x38e   : > { %v7676_v57 = vadd.f32 %v3428_v59, %v7540_v31  ;;  %v7678_v24 = vpop.f32.mrf.mxu0 }
 0x38f   : > { %8462 = vst [vmem:[#allocation79_spill] sm:$0xff] %v7678_v24  ;;  %v5156_v10 = vpop.f32.mrf.mxu1 }
 0x390   : > { %8461 = vst [vmem:[#allocation78_spill] sm:$0xff] %v7676_v57  ;;  %v7681_v13 = vadd.f32 %v5156_v10, %v7546_v33  ;;  %v7683_v0 = vpop.f32.mrf.mxu0 }
 0x391   : > { %8464 = vst [vmem:[#allocation81_spill] sm:$0xff] %v7683_v0  ;;  %v3440_v4 = vpop.f32.mrf.mxu1 }
 0x392   : > { %8463 = vst [vmem:[#allocation80_spill] sm:$0xff] %v7681_v13  ;;  %v7686_v11 = vadd.f32 %v3440_v4, %v7552_v48  ;;  %v7688_v17 = vpop.f32.mrf.mxu0 }
 0x393   : > { %8466 = vst [vmem:[#allocation83_spill] sm:$0xff] %v7688_v17  ;;  %v5159_v62 = vpop.f32.mrf.mxu1 }
 0x394   : > { %8465 = vst [vmem:[#allocation82_spill] sm:$0xff] %v7686_v11  ;;  %v7691_v40 = vadd.f32 %v5159_v62, %v7556_v41  ;;  %v7693_v59 = vpop.f32.mrf.mxu0 }
 0x395   : > { %8468 = vst [vmem:[#allocation85_spill] sm:$0xff] %v7693_v59  ;;  %v3452_v31 = vpop.f32.mrf.mxu1 }
 0x396   : > { %8467 = vst [vmem:[#allocation84_spill] sm:$0xff] %v7691_v40  ;;  %v7696_v24 = vadd.f32 %v3452_v31, %v7561_v18  ;;  %v7698_v10 = vpop.f32.mrf.mxu0 }
 0x397   : > { %v5214_v33 = vpop.f32.mrf.mxu1 }
 0x398   : > { %8469 = vst [vmem:[#allocation86_spill] sm:$0xff] %v7696_v24  ;;  %v7700_v13 = vpop.f32.mrf.mxu0 }
 0x399   : > { %v3823_v0 = vpop.f32.mrf.mxu1 }
 0x39a   : > { %v7704_v17 = vpop.f32.mrf.mxu0 }
 0x39b   : > { %v5217_v4 = vpop.f32.mrf.mxu1 }
 0x39c   : > { %v7708_v62 = vpop.f32.mrf.mxu0 }
 0x39d   : > { %v7702_v48 = vpop.f32.mrf.mxu1 }
 0x39e   : > { %v7714_v18 = vpop.f32.mrf.mxu0 }
 0x39f   : > { %v7706_v11 = vpop.f32.mrf.mxu1 }
 0x3a0   : > { %v7720_v40 = vpop.f32.mrf.mxu0 }
 0x3a1   : > { %v7710_v41 = vpop.f32.mrf.mxu1 }
 0x3a2   : > { %v7726_v15 = vpop.f32.mrf.mxu0 }
 0x3a3   : > { %v7712_v59 = vpop.f32.mrf.mxu1  ;;  %8473 = vst [vmem:[#allocation90_spill] sm:$0xff] %v7726_v15 }
 0x3a4   : > { %v7732_v21 = vpop.f32.mrf.mxu0 }
 0x3a5   : > { %v7716_v31 = vpop.f32.mrf.mxu1  ;;  %8476 = vst [vmem:[#allocation93_spill] sm:$0xff] %v7732_v21 }
 0x3a6   : > { %v7738_v30 = vpop.f32.mrf.mxu0 }
 0x3a7   : > { %v7718_v24 = vpop.f32.mrf.mxu1  ;;  %8479 = vst [vmem:[#allocation96_spill] sm:$0xff] %v7738_v30 }
 0x3a8   : > { %8470 = vst [vmem:[#allocation87_spill] sm:$0xff] %v7718_v24 }
 0x3a9   : > { %v7722_v57 = vpop.f32.mrf.mxu1 }
 0x3aa   : > { %8471 = vst [vmem:[#allocation88_spill] sm:$0xff] %v7722_v57  ;;  %v7744_v57 = vpop.f32.mrf.mxu0 }
 0x3ab   : > { %v7724_v20 = vpop.f32.mrf.mxu1  ;;  %8482 = vst [vmem:[#allocation99_spill] sm:$0xff] %v7744_v57 }
 0x3ac   : > { %8472 = vst [vmem:[#allocation89_spill] sm:$0xff] %v7724_v20 }
 0x3ad   : > { %v7728_v42 = vpop.f32.mrf.mxu1 }
 0x3ae   : > { %8474 = vst [vmem:[#allocation91_spill] sm:$0xff] %v7728_v42  ;;  %v7750_v42 = vpop.f32.mrf.mxu0 }
 0x3af   : > { %v7730_v47 = vpop.f32.mrf.mxu1  ;;  %8485 = vst [vmem:[#allocation102_spill] sm:$0xff] %v7750_v42 }
 0x3b0   : > { %8475 = vst [vmem:[#allocation92_spill] sm:$0xff] %v7730_v47 }
 0x3b1   : > { %v7734_v9 = vpop.f32.mrf.mxu1 }
 0x3b2   : > { %8477 = vst [vmem:[#allocation94_spill] sm:$0xff] %v7734_v9  ;;  %v7756_v9 = vpop.f32.mrf.mxu0 }
 0x3b3   : > { %v7736_v35 = vpop.f32.mrf.mxu1 }
 0x3b4   : > { %8478 = vst [vmem:[#allocation95_spill] sm:$0xff] %v7736_v35 }
 0x3b5   : > { %v7740_v24 = vpop.f32.mrf.mxu1 }
 0x3b6   : > { %8480 = vst [vmem:[#allocation97_spill] sm:$0xff] %v7740_v24  ;;  %v7762_v24 = vpop.f32.mrf.mxu0 }
 0x3b7   : > { %v7742_v49 = vpop.f32.mrf.mxu1  ;;  %8490 = vst [vmem:[#allocation107_spill] sm:$0xff] %v7762_v24 }
 0x3b8   : > { %8481 = vst [vmem:[#allocation98_spill] sm:$0xff] %v7742_v49 }
 0x3b9   : > { %v7746_v20 = vpop.f32.mrf.mxu1 }
 0x3ba   : > { %8483 = vst [vmem:[#allocation100_spill] sm:$0xff] %v7746_v20  ;;  %v7768_v20 = vpop.f32.mrf.mxu0 }
 0x3bb   : > { %v7748_v15 = vpop.f32.mrf.mxu1 }
 0x3bc   : > { %8484 = vst [vmem:[#allocation101_spill] sm:$0xff] %v7748_v15 }
 0x3bd   : > { %v7752_v47 = vpop.f32.mrf.mxu1 }
 0x3be   : > { %8486 = vst [vmem:[#allocation103_spill] sm:$0xff] %v7752_v47  ;;  %v7776_v47 = vpop.f32.mrf.mxu0 }
 0x3bf   : > { %v7754_v21 = vpop.f32.mrf.mxu1 }
 0x3c0   : > { %8487 = vst [vmem:[#allocation104_spill] sm:$0xff] %v7754_v21  ;;  %v3279_v21 = vadd.f32 %v7567_v44, %v7325_v61  ;;  %v7794_v61 = vld [vmem:[%s8103_s6] ss:$0 sm:$0xff] }
 0x3c1   : > { %v7758_v35 = vpop.f32.mrf.mxu1 }
 0x3c2   : > { %8488 = vst [vmem:[#allocation105_spill] sm:$0xff] %v7758_v35 }
 0x3c3   : > { %v7760_v30 = vpop.f32.mrf.mxu1 }
 0x3c4   : > { %8489 = vst [vmem:[#allocation106_spill] sm:$0xff] %v7760_v30  ;;  %v3273_v30 = vadd.f32 %v7571_v54, %v7335_v5  ;;  %v3285_v5 = vadd.f32 %v7579_v56, %v7355_v16 }
 0x3c5   : > { %v7764_v49 = vpop.f32.mrf.mxu1 }
 0x3c6   : > { %8491 = vst [vmem:[#allocation108_spill] sm:$0xff] %v7764_v49  ;;  %v3291_v49 = vadd.f32 %v7575_v1, %v7345_v26  ;;  %v3533_v44 = vadd.f32 %v7569_v19, %v3273_v30  ;;  %v3303_v1 = vadd.f32 %v7583_v45, %v7365_v46  ;;  %v3297_v30 = vadd.f32 %v7587_v43, %v7375_v29 }
 0x3c7   : > { %v7766_v57 = vpop.f32.mrf.mxu1  ;;  %v2563_v46 = vadd.f32 %v7330_v27, %v7794_v61  ;;  %v3315_v45 = vadd.f32 %v7591_v60, %v7385_v8  ;;  %v3309_v8 = vadd.f32 %v7595_v58, %v7395_v22  ;;  %v3327_v22 = vadd.f32 %v7599_v63, %v7405_v3 }
 0x3c8   : > { %8492 = vst [vmem:[#allocation109_spill] sm:$0xff] %v7766_v57  ;;  %v3540_v57 = vadd.f32 %v7565_v12, %v3279_v21  ;;  %v2558_v21 = vadd.f32 %v7794_v61, %v7360_v14  ;;  %v3554_v26 = vadd.f32 %v7573_v6, %v3291_v49  ;;  %v3547_v14 = vadd.f32 %v7577_v37, %v3285_v5 }
 0x3c9   : > { %v7770_v15 = vpop.f32.mrf.mxu1  ;;  %v3568_v6 = vadd.f32 %v7581_v55, %v3303_v1  ;;  %v2683_v5 = vmax.f32 %v2563_v46, 0.0 }
 0x3ca   : > { %8493 = vst [vmem:[#allocation110_spill] sm:$0xff] %v7770_v15  ;;  %v7787_v15 = vpop.f32.mrf.mxu0  ;;  %v3832_v54 = vadd.f32 %v5214_v33, %v3540_v57  ;;  %v3848_v49 = vadd.f32 %v5217_v4, %v3554_v26  ;;  %v3840_v37 = vadd.f32 %v7702_v48, %v3547_v14 }
 0x3cb   : > { %v7772_v42 = vpop.f32.mrf.mxu1  ;;  %v3864_v55 = vadd.f32 %v7706_v11, %v3568_v6 }
 0x3cc   : > { %8494 = vst [vmem:[#allocation111_spill] sm:$0xff] %v7772_v42  ;;  %v7810_v16 = vpop.f32.mrf.mxu0  ;;  %v4152_v56 = vadd.f32 %v7698_v10, %v3832_v54  ;;  %v4158_v48 = vadd.f32 %v7708_v62, %v3840_v37  ;;  %v2571_v54 = vadd.f32 %v7794_v61, %v7380_v38  ;;  %v2582_v38 = vadd.f32 %v7390_v28, %v7794_v61 }
 0x3cd   : > { %v7778_v35 = vpop.f32.mrf.mxu1  ;;  %v4176_v62 = vadd.f32 %v7714_v18, %v3864_v55 }
 0x3ce   : > { %v7835_v60 = vpop.f32.mrf.mxu0  ;;  %v2685_v28 = vmax.f32 %v2571_v54, 0.0  ;;  %v2688_v37 = vmax.f32 %v2582_v38, 0.0  ;;  %v8511_v54 = vld [vmem:[#allocation51_spill] sm:$0xff] }
 0x3cf   : > { %v7782_v24 = vpop.f32.mrf.mxu1 }
 0x3d0   : > { %8495 = vst [vmem:[#allocation112_spill] sm:$0xff] %v7782_v24  ;;  %v2555_v24 = vadd.f32 %v7794_v61, %v7340_v39  ;;  %v2682_v39 = vmax.f32 %v2558_v21, 0.0  ;;  %v7853_v3 = vpop.f32.mrf.mxu0 }
 0x3d1   : > { %v7789_v42 = vpop.f32.mrf.mxu1 }
 0x3d2   : > { %8496 = vst [vmem:[#allocation113_spill] sm:$0xff] %v7789_v42  ;;  %v3824_v42 = vadd.f32 %v3823_v0, %v3533_v44  ;;  %v2566_v0 = vadd.f32 %v7350_v52, %v7794_v61  ;;  %v2681_v27 = vmax.f32 %v2555_v24, 0.0  ;;  %v3561_v52 = vadd.f32 %v7585_v51, %v3297_v30 }
 0x3d3   : > { %v7801_v12 = vpop.f32.mrf.mxu1  ;;  %v2574_v24 = vadd.f32 %v7794_v61, %v7400_v7  ;;  %v3582_v51 = vadd.f32 %v7589_v50, %v3315_v45  ;;  %v3575_v7 = vadd.f32 %v7593_v53, %v3309_v8  ;;  %v3321_v50 = vadd.f32 %v7603_v34, %v7415_v25  ;;  %v8504_v8 = vld [vmem:[#allocation46_spill] sm:$0xff] }
 0x3d4   : > { %v4146_v43 = vadd.f32 %v7700_v13, %v3824_v42  ;;  %v4164_v42 = vadd.f32 %v7704_v17, %v3848_v49  ;;  %v2684_v4 = vmax.f32 %v2566_v0, 0.0  ;;  %v3856_v44 = vadd.f32 %v7710_v41, %v3561_v52  ;;  %v8497_v49 = vld [vmem:[#allocation36_spill] sm:$0xff] }
 0x3d5   : > { %v7812_v57 = vpop.f32.mrf.mxu1  ;;  %v3880_v41 = vadd.f32 %v7712_v59, %v3582_v51  ;;  %v2686_v1 = vmax.f32 %v2574_v24, 0.0  ;;  %v3596_v53 = vadd.f32 %v7597_v23, %v3327_v22  ;;  %v3339_v25 = vadd.f32 %v7607_v2, %v7425_v32  ;;  %v8498_v23 = vld [vmem:[#allocation42_spill] sm:$0xff]  ;;  %v8499_v0 = vld [vmem:[#allocation44_spill] sm:$0xff]  ;;  %v7873_v32 = vpop.f32.mrf.mxu0 }
 0x3d6   : > { %v4170_v30 = vadd.f32 %v7720_v40, %v3856_v44  ;;  %v3872_v18 = vadd.f32 %v7716_v31, %v3575_v7  ;;  %v3589_v46 = vadd.f32 %v8497_v49, %v3321_v50  ;;  %v8500_v40 = vld [vmem:[#allocation90_spill] sm:$0xff]  ;;  %v8501_v31 = vld [vmem:[#allocation87_spill] sm:$0xff] }
 0x3d7   : > { %v5314_v29 = vpop.f32.mrf.mxu1  ;;  %v4188_v45 = vadd.f32 %v8500_v40, %v3880_v41  ;;  %v7893_v50 = vpop.f32.mrf.mxu0  ;;  %v8518_v49 = vld [vmem:[#allocation99_spill] sm:$0xff] }
 0x3d8   : > { %v4410_v19 = vadd.f32 %v5314_v29, %v4152_v56  ;;  %v2579_v56 = vadd.f32 %v7370_v36, %v7794_v61  ;;  %v3896_v29 = vadd.f32 %v8501_v31, %v3596_v53  ;;  %v8502_v36 = vld [vmem:[#allocation43_spill] sm:$0xff]  ;;  %v8514_v53 = vld [vmem:[#allocation41_spill] sm:$0xff] }
 0x3d9   : > { %v4403_v13 = vpop.f32.mrf.mxu1  ;;  %v8520_v40 = vld [vmem:[#allocation39_spill] sm:$0xff] }
 0x3da   : > { %v4594_v10 = vadd.f32 %v4410_v19, %v2682_v39  ;;  %v4404_v33 = vadd.f32 %v4403_v13, %v4146_v43  ;;  %v3333_v39 = vadd.f32 %v8499_v0, %v8498_v23  ;;  %v2590_v19 = vadd.f32 %v7794_v61, %v8502_v36  ;;  %v8505_v13 = vld [vmem:[#allocation49_spill] sm:$0xff]  ;;  %v8519_v23 = vld [vmem:[#allocation91_spill] sm:$0xff] }
 0x3db   : > { %v5317_v58 = vpop.f32.mrf.mxu1 }
 0x3dc   : > { %4627 = vst.msk [vmem:[%s7830_s8 + $0x8] sm:$0xff] %vm4625_vm6, %v4594_v10  ;;  %v4593_v17 = vadd.f32 %v4404_v33, %v2681_v27  ;;  %v4422_v11 = vadd.f32 %v5317_v58, %v4164_v42  ;;  %v8503_v27 = vld [vmem:[#allocation37_spill] sm:$0xff]  ;;  %v3351_v42 = vadd.f32 %v8505_v13, %v8504_v8  ;;  %v2687_v58 = vmax.f32 %v2579_v56, 0.0  ;;  %v8525_v13 = vld [vmem:[#allocation92_spill] sm:$0xff] }
 0x3dd   : > { %v4415_v63 = vpop.f32.mrf.mxu1  ;;  %v3610_v52 = vadd.f32 %v8503_v27, %v3339_v25  ;;  %v8506_v10 = vld [vmem:[#allocation93_spill] sm:$0xff]  ;;  %v2598_v25 = vadd.f32 %v8514_v53, %v7794_v61  ;;  %v8534_v53 = vld [vmem:[#allocation58_spill] sm:$0xff] }
 0x3de   : > { %4626 = vst.msk [vmem:[%s7830_s8] sm:$0xff] %vm4625_vm6, %v4593_v17  ;;  %v4596_v21 = vadd.f32 %v4422_v11, %v2684_v4  ;;  %v4416_v26 = vadd.f32 %v4415_v63, %v4158_v48  ;;  %v4182_v33 = vadd.f32 %v8506_v10, %v3872_v18  ;;  %v8507_v4 = vld [vmem:[#allocation88_spill] sm:$0xff]  ;;  %v8509_v17 = vld [vmem:[#allocation38_spill] sm:$0xff] }
 0x3df   : > { %v5320_v34 = vpop.f32.mrf.mxu1  ;;  %v3888_v24 = vadd.f32 %v8507_v4, %v3589_v46  ;;  %v8508_v48 = vld [vmem:[#allocation40_spill] sm:$0xff]  ;;  %v3603_v11 = vadd.f32 %v8509_v17, %v3333_v39 }
 0x3e0   : > { %4629 = vst.msk [vmem:[%s7830_s8 + $0x18] sm:$0xff] %vm4625_vm6, %v4596_v21  ;;  %v4595_v59 = vadd.f32 %v4416_v26, %v2683_v5  ;;  %v4434_v14 = vadd.f32 %v5320_v34, %v4176_v62  ;;  %v2587_v44 = vadd.f32 %v7794_v61, %v8508_v48  ;;  %v8510_v5 = vld [vmem:[#allocation6_spill] sm:$0xff]  ;;  %v8512_v62 = vld [vmem:[#allocation96_spill] sm:$0xff]  ;;  %v8513_v21 = vld [vmem:[#allocation89_spill] sm:$0xff]  ;;  %v2690_v34 = vmax.f32 %v2590_v19, 0.0  ;;  %v7913_v19 = vpop.f32.mrf.mxu0 }
 0x3e1   : > { %v4427_v2 = vpop.f32.mrf.mxu1  ;;  %v3345_v7 = vadd.f32 %v8511_v54, %v8510_v5  ;;  %v4200_v41 = vadd.f32 %v8512_v62, %v3896_v29  ;;  %v3912_v26 = vadd.f32 %v8513_v21, %v3610_v52  ;;  %v4194_v46 = vadd.f32 %v8518_v49, %v3888_v24  ;;  %v8521_v29 = vld [vmem:[#allocation50_spill] sm:$0xff]  ;;  %v8526_v4 = vld [vmem:[#allocation8_spill] sm:$0xff]  ;;  %v8537_v49 = vld [vmem:[#allocation3_spill] sm:$0xff] }
 0x3e2   : > { %4628 = vst.msk [vmem:[%s7830_s8 + $0x10] sm:$0xff] %vm4625_vm6, %v4595_v59  ;;  %v4598_v6 = vadd.f32 %v4434_v14, %v2686_v1  ;;  %v4428_v43 = vadd.f32 %v4427_v2, %v4170_v30  ;;  %v8515_v30 = vld [vmem:[#allocation45_spill] sm:$0xff]  ;;  %v8516_v59 = vld [vmem:[#allocation4_spill] sm:$0xff]  ;;  %v8517_v14 = vld [vmem:[#allocation47_spill] sm:$0xff]  ;;  %v3904_v0 = vadd.f32 %v8519_v23, %v3603_v11  ;;  %v2689_v31 = vmax.f32 %v2587_v44, 0.0 }
 0x3e3   : > { %v5323_v55 = vpop.f32.mrf.mxu1  ;;  %v3624_v18 = vadd.f32 %v8515_v30, %v3351_v42  ;;  %v3363_v56 = vadd.f32 %v8517_v14, %v8516_v59  ;;  %v8524_v52 = vld [vmem:[#allocation102_spill] sm:$0xff]  ;;  %v2606_v24 = vadd.f32 %v7794_v61, %v8526_v4  ;;  %v8529_v48 = vld [vmem:[#allocation56_spill] sm:$0xff]  ;;  %v8536_v59 = vld [vmem:[#allocation95_spill] sm:$0xff] }
 0x3e4   : > { %4631 = vst.msk [vmem:[%s7830_s8 + $0x28] sm:$0xff] %vm4625_vm6, %v4598_v6  ;;  %v4597_v51 = vadd.f32 %v4428_v43, %v2685_v28  ;;  %v4446_v22 = vadd.f32 %v5323_v55, %v4188_v45  ;;  %v2595_v45 = vadd.f32 %v8520_v40, %v7794_v61  ;;  %v3617_v6 = vadd.f32 %v8521_v29, %v3345_v7  ;;  %v8522_v43 = vld [vmem:[#allocation10_spill] sm:$0xff]  ;;  %v8540_v40 = vld [vmem:[#allocation60_spill] sm:$0xff] }
 0x3e5   : > { %v4439_v63 = vpop.f32.mrf.mxu1  ;;  %v4212_v8 = vadd.f32 %v8524_v52, %v3912_v26  ;;  %v3928_v42 = vadd.f32 %v8525_v13, %v3624_v18  ;;  %v4206_v11 = vadd.f32 %v7756_v9, %v3904_v0  ;;  %v8530_v5 = vld [vmem:[#allocation94_spill] sm:$0xff]  ;;  %v8532_v26 = vld [vmem:[#allocation48_spill] sm:$0xff]  ;;  %v8535_v9 = vld [vmem:[#allocation107_spill] sm:$0xff]  ;;  %v2694_v23 = vmax.f32 %v2606_v24, 0.0 }
 0x3e6   : > { %4630 = vst.msk [vmem:[%s7830_s8 + $0x20] sm:$0xff] %vm4625_vm6, %v4597_v51  ;;  %v4600_v38 = vadd.f32 %v4446_v22, %v2688_v37  ;;  %v4440_v1 = vadd.f32 %v4439_v63, %v4182_v33  ;;  %v8523_v37 = vld [vmem:[#allocation53_spill] sm:$0xff]  ;;  %v2692_v33 = vmax.f32 %v2598_v25, 0.0  ;;  %v8527_v51 = vld [vmem:[#allocation52_spill] sm:$0xff]  ;;  %v3920_v54 = vadd.f32 %v8530_v5, %v3617_v6  ;;  %v8538_v0 = vld [vmem:[#allocation55_spill] sm:$0xff] }
 0x3e7   : > { %v5326_v28 = vpop.f32.mrf.mxu1  ;;  %v3357_v36 = vadd.f32 %v8523_v37, %v8522_v43  ;;  %v3638_v22 = vadd.f32 %v8527_v51, %v3363_v56  ;;  %v2691_v62 = vmax.f32 %v2595_v45, 0.0  ;;  %v4224_v18 = vadd.f32 %v8535_v9, %v3928_v42  ;;  %v8541_v6 = vld [vmem:[#allocation97_spill] sm:$0xff]  ;;  %v8546_v51 = vld [vmem:[#allocation98_spill] sm:$0xff]  ;;  %v8548_v5 = vld [vmem:[#allocation59_spill] sm:$0xff] }
 0x3e8   : > { %4633 = vst.msk [vmem:[%s7830_s8 + $0x38] sm:$0xff] %vm4625_vm6, %v4600_v38  ;;  %v4599_v39 = vadd.f32 %v4440_v1, %v2687_v58  ;;  %v4458_v2 = vadd.f32 %v5326_v28, %v4200_v41  ;;  %v8528_v58 = vld [vmem:[#allocation5_spill] sm:$0xff]  ;;  %v8531_v41 = vld [vmem:[#allocation7_spill] sm:$0xff]  ;;  %v4218_v29 = vadd.f32 %v7768_v20, %v3920_v54 }
 0x3e9   : > { %v4451_v27 = vpop.f32.mrf.mxu1  ;;  %v3375_v44 = vadd.f32 %v8529_v48, %v8528_v58  ;;  %v2603_v21 = vadd.f32 %v7794_v61, %v8531_v41  ;;  %v3631_v38 = vadd.f32 %v8532_v26, %v3357_v36  ;;  %v8533_v1 = vld [vmem:[#allocation9_spill] sm:$0xff]  ;;  %v3944_v14 = vadd.f32 %v8536_v59, %v3638_v22  ;;  %v8554_v59 = vld [vmem:[#allocation16_spill] sm:$0xff] }
 0x3ea   : > { %4632 = vst.msk [vmem:[%s7830_s8 + $0x30] sm:$0xff] %vm4625_vm6, %v4599_v39  ;;  %v4602_v55 = vadd.f32 %v4458_v2, %v2690_v34  ;;  %v4452_v10 = vadd.f32 %v4451_v27, %v4194_v46  ;;  %v3369_v25 = vadd.f32 %v8534_v53, %v8533_v1  ;;  %v7933_v34 = vpop.f32.mrf.mxu0  ;;  %v2614_v46 = vadd.f32 %v8537_v49, %v7794_v61  ;;  %v8539_v2 = vld [vmem:[#allocation12_spill] sm:$0xff]  ;;  %v8542_v27 = vld [vmem:[#allocation54_spill] sm:$0xff]  ;;  %v8543_v13 = vld [vmem:[#allocation57_spill] sm:$0xff] }
 0x3eb   : > { %v5329_v17 = vpop.f32.mrf.mxu1  ;;  %v3652_v39 = vadd.f32 %v8538_v0, %v3375_v44  ;;  %v3387_v45 = vadd.f32 %v8540_v40, %v8539_v2  ;;  %v3936_v43 = vadd.f32 %v8541_v6, %v3631_v38  ;;  %v2611_v52 = vadd.f32 %v8542_v27, %v7794_v61  ;;  %v8553_v9 = vld [vmem:[#allocation61_spill] sm:$0xff]  ;;  %v8557_v2 = vld [vmem:[#allocation18_spill] sm:$0xff] }
 0x3ec   : > { %4635 = vst.msk [vmem:[%s7830_s8 + $0x48] sm:$0xff] %vm4625_vm6, %v4602_v55  ;;  %v4601_v7 = vadd.f32 %v4452_v10, %v2689_v31  ;;  %v4470_v63 = vadd.f32 %v5329_v17, %v4212_v8  ;;  %v2693_v8 = vmax.f32 %v2603_v21, 0.0  ;;  %v3645_v42 = vadd.f32 %v8543_v13, %v3369_v25  ;;  %v8544_v55 = vld [vmem:[#allocation14_spill] sm:$0xff]  ;;  %v7953_v4 = vpop.f32.mrf.mxu0  ;;  %v8547_v17 = vld [vmem:[#allocation19_spill] sm:$0xff]  ;;  %v8552_v25 = vld [vmem:[#allocation13_spill] sm:$0xff] }
 0x3ed   : > { %v4463_v30 = vpop.f32.mrf.mxu1  ;;  %v8545_v10 = vld [vmem:[#allocation62_spill] sm:$0xff]  ;;  %v4236_v20 = vadd.f32 %v7776_v47, %v3944_v14  ;;  %v3960_v22 = vadd.f32 %v8546_v51, %v3652_v39  ;;  %v2696_v44 = vmax.f32 %v2614_v46, 0.0  ;;  %v3666_v54 = vadd.f32 %v8548_v5, %v3387_v45  ;;  %v8551_v47 = vld [vmem:[#allocation100_spill] sm:$0xff]  ;;  %v8556_v46 = vld [vmem:[#allocation101_spill] sm:$0xff] }
 0x3ee   : > { %4634 = vst.msk [vmem:[%s7830_s8 + $0x40] sm:$0xff] %vm4625_vm6, %v4601_v7  ;;  %v4604_v56 = vadd.f32 %v4470_v63, %v2692_v33  ;;  %v4464_v28 = vadd.f32 %v4463_v30, %v4206_v11  ;;  %v3381_v33 = vadd.f32 %v8545_v10, %v8544_v55  ;;  %v2622_v11 = vadd.f32 %v7794_v61, %v8547_v17  ;;  %v8549_v7 = vld [vmem:[#allocation15_spill] sm:$0xff]  ;;  %v8550_v63 = vld [vmem:[#allocation64_spill] sm:$0xff]  ;;  %v8555_v14 = vld [vmem:[#allocation66_spill] sm:$0xff] }
 0x3ef   : > { %v5332_v31 = vpop.f32.mrf.mxu1  ;;  %v4230_v21 = vadd.f32 %v7787_v15, %v3936_v43  ;;  %v3952_v26 = vadd.f32 %v8551_v47, %v3645_v42  ;;  %v2695_v53 = vmax.f32 %v2611_v52, 0.0  ;;  %v2619_v30 = vadd.f32 %v7794_v61, %v8552_v25  ;;  %v8559_v6 = vld [vmem:[#allocation17_spill] sm:$0xff]  ;;  %v8560_v43 = vld [vmem:[#allocation68_spill] sm:$0xff]  ;;  %v8562_v42 = vld [vmem:[#allocation11_spill] sm:$0xff] }
 0x3f0   : > { %4637 = vst.msk [vmem:[%s7830_s8 + $0x58] sm:$0xff] %vm4625_vm6, %v4604_v56  ;;  %v4603_v37 = vadd.f32 %v4464_v28, %v2691_v62  ;;  %v4482_v36 = vadd.f32 %v5332_v31, %v4224_v18  ;;  %v3399_v62 = vadd.f32 %v8550_v63, %v8549_v7  ;;  %v3659_v18 = vadd.f32 %v8553_v9, %v3381_v33  ;;  %v7973_v28 = vpop.f32.mrf.mxu0  ;;  %v8558_v31 = vld [vmem:[#allocation63_spill] sm:$0xff]  ;;  %v8563_v33 = vld [vmem:[#allocation65_spill] sm:$0xff]  ;;  %v8565_v51 = vld [vmem:[#allocation70_spill] sm:$0xff] }
 0x3f1   : > { %v4475_v24 = vpop.f32.mrf.mxu1  ;;  %v3393_v56 = vadd.f32 %v8555_v14, %v8554_v59  ;;  %v4248_v15 = vadd.f32 %v7810_v16, %v3960_v22  ;;  %v2630_v40 = vadd.f32 %v8557_v2, %v7794_v61  ;;  %v2698_v45 = vmax.f32 %v2622_v11, 0.0  ;;  %v8561_v16 = vld [vmem:[#allocation103_spill] sm:$0xff]  ;;  %v8570_v47 = vld [vmem:[#allocation72_spill] sm:$0xff]  ;;  %v8573_v14 = vld [vmem:[#allocation69_spill] sm:$0xff] }
 0x3f2   : > { %4636 = vst.msk [vmem:[%s7830_s8 + $0x50] sm:$0xff] %vm4625_vm6, %v4603_v37  ;;  %v4606_v58 = vadd.f32 %v4482_v36, %v2694_v23  ;;  %v4476_v48 = vadd.f32 %v4475_v24, %v4218_v29  ;;  %v3976_v23 = vadd.f32 %v8556_v46, %v3666_v54  ;;  %v3680_v29 = vadd.f32 %v8558_v31, %v3399_v62  ;;  %v8567_v7 = vld [vmem:[#allocation23_spill] sm:$0xff]  ;;  %v8577_v31 = vld [vmem:[#allocation21_spill] sm:$0xff] }
 0x3f3   : > { %v5335_v41 = vpop.f32.mrf.mxu1  ;;  %v3411_v37 = vadd.f32 %v8560_v43, %v8559_v6  ;;  %v4242_v27 = vadd.f32 %v7835_v60, %v3952_v26  ;;  %v3968_v52 = vadd.f32 %v8561_v16, %v3659_v18  ;;  %v2627_v55 = vadd.f32 %v8562_v42, %v7794_v61  ;;  %v8568_v62 = vld [vmem:[#allocation67_spill] sm:$0xff]  ;;  %v8572_v18 = vld [vmem:[#allocation24_spill] sm:$0xff] }
 0x3f4   : > { %4639 = vst.msk [vmem:[%s7830_s8 + $0x68] sm:$0xff] %vm4625_vm6, %v4606_v58  ;;  %v4605_v38 = vadd.f32 %v4476_v48, %v2693_v8  ;;  %v4494_v1 = vadd.f32 %v5335_v41, %v4236_v20  ;;  %v2697_v10 = vmax.f32 %v2619_v30, 0.0  ;;  %v3673_v24 = vadd.f32 %v8563_v33, %v3393_v56  ;;  %v8564_v20 = vld [vmem:[#allocation22_spill] sm:$0xff]  ;;  %v7993_v58 = vpop.f32.mrf.mxu0  ;;  %v8578_v43 = vld [vmem:[#allocation71_spill] sm:$0xff] }
 0x3f5   : > { %v4487_v49 = vpop.f32.mrf.mxu1  ;;  %v3405_v22 = vadd.f32 %v8565_v51, %v8564_v20  ;;  %v4260_v60 = vadd.f32 %v7853_v3, %v3976_v23  ;;  %v2700_v54 = vmax.f32 %v2630_v40, 0.0  ;;  %v2638_v63 = vadd.f32 %v7794_v61, %v8567_v7  ;;  %v8571_v3 = vld [vmem:[#allocation105_spill] sm:$0xff] }
 0x3f6   : > { %4638 = vst.msk [vmem:[%s7830_s8 + $0x60] sm:$0xff] %vm4625_vm6, %v4605_v38  ;;  %v4608_v0 = vadd.f32 %v4494_v1, %v2696_v44  ;;  %v4488_v39 = vadd.f32 %v4487_v49, %v4230_v21  ;;  %v8566_v44 = vld [vmem:[#allocation104_spill] sm:$0xff]  ;;  %v3694_v41 = vadd.f32 %v8568_v62, %v3411_v37  ;;  %v8569_v21 = vld [vmem:[#allocation25_spill] sm:$0xff]  ;;  %v4254_v1 = vadd.f32 %v7873_v32, %v3968_v52  ;;  %v8574_v49 = vld [vmem:[#allocation27_spill] sm:$0xff]  ;;  %v5303_v23 = vpop.f32.mrf.mxu0 }
 0x3f7   : > { %v5338_v36 = vpop.f32.mrf.mxu1  ;;  %v3992_v17 = vadd.f32 %v8566_v44, %v3680_v29  ;;  %v3423_v26 = vadd.f32 %v8570_v47, %v8569_v21  ;;  %v2699_v9 = vmax.f32 %v2627_v55, 0.0  ;;  %v2635_v59 = vadd.f32 %v7794_v61, %v8572_v18  ;;  %v8583_v20 = vld [vmem:[#allocation73_spill] sm:$0xff]  ;;  %v8587_v47 = vld [vmem:[#allocation110_spill] sm:$0xff] }
 0x3f8   : > { %4641 = vst.msk [vmem:[%s7830_s8 + $0x78] sm:$0xff] %vm4625_vm6, %v4608_v0  ;;  %v4607_v8 = vadd.f32 %v4488_v39, %v2695_v53  ;;  %v4506_v13 = vadd.f32 %v5338_v36, %v4248_v15  ;;  %v3984_v53 = vadd.f32 %v8571_v3, %v3673_v24  ;;  %v3687_v56 = vadd.f32 %v8573_v14, %v3405_v22  ;;  %v8575_v15 = vld [vmem:[#allocation74_spill] sm:$0xff]  ;;  %v8579_v36 = vld [vmem:[#allocation29_spill] sm:$0xff]  ;;  %v4301_v22 = vpop.f32.mrf.mxu0  ;;  %v8588_v3 = vld [vmem:[#allocation28_spill] sm:$0xff] }
 0x3f9   : > { %v4499_v48 = vpop.f32.mrf.mxu1  ;;  %v3417_v46 = vadd.f32 %v8575_v15, %v8574_v49  ;;  %v4272_v32 = vadd.f32 %v7893_v50, %v3992_v17  ;;  %v8576_v39 = vld [vmem:[#allocation106_spill] sm:$0xff]  ;;  %v2646_v29 = vadd.f32 %v8577_v31, %v7794_v61  ;;  %v2702_v6 = vmax.f32 %v2638_v63, 0.0  ;;  %v8581_v50 = vld [vmem:[#allocation108_spill] sm:$0xff]  ;;  %v8584_v44 = vld [vmem:[#allocation109_spill] sm:$0xff] }
 0x3fa   : > { %4640 = vst.msk [vmem:[%s7830_s8 + $0x70] sm:$0xff] %vm4625_vm6, %v4607_v8  ;;  %v4610_v11 = vadd.f32 %v4506_v13, %v2698_v45  ;;  %v4500_v5 = vadd.f32 %v4499_v48, %v4242_v27  ;;  %v4008_v2 = vadd.f32 %v8576_v39, %v3694_v41  ;;  %v3708_v37 = vadd.f32 %v8578_v43, %v3423_v26  ;;  %v8580_v27 = vld [vmem:[#allocation76_spill] sm:$0xff]  ;;  %v8586_v63 = vld [vmem:[#allocation75_spill] sm:$0xff]  ;;  %v5306_v18 = vpop.f32.mrf.mxu0  ;;  %v8595_v43 = vld [vmem:[#allocation26_spill] sm:$0xff] }
 0x3fb   : > { %v5341_v38 = vpop.f32.mrf.mxu1  ;;  %v3435_v16 = vadd.f32 %v8580_v27, %v8579_v36  ;;  %v4266_v8 = vadd.f32 %v7913_v19, %v3984_v53  ;;  %v4000_v13 = vadd.f32 %v8581_v50, %v3687_v56  ;;  %v2701_v24 = vmax.f32 %v2635_v59, 0.0  ;;  %v8591_v56 = vld [vmem:[#allocation111_spill] sm:$0xff]  ;;  %v8593_v39 = vld [vmem:[#allocation80_spill] sm:$0xff]  ;;  %v8596_v27 = vld [vmem:[#allocation82_spill] sm:$0xff] }
 0x3fc   : > { %4643 = vst.msk [vmem:[%s7830_s8 + $0x88] sm:$0xff] %vm4625_vm6, %v4610_v11  ;;  %v4609_v25 = vadd.f32 %v4500_v5, %v2697_v10  ;;  %v4518_v30 = vadd.f32 %v5341_v38, %v4260_v60  ;;  %v8582_v10 = vld [vmem:[#allocation20_spill] sm:$0xff]  ;;  %v3701_v51 = vadd.f32 %v8583_v20, %v3417_v46  ;;  %v4284_v60 = vadd.f32 %v7933_v34, %v4008_v2  ;;  %v8592_v46 = vld [vmem:[#allocation30_spill] sm:$0xff]  ;;  %v8594_v2 = vld [vmem:[#allocation79_spill] sm:$0xff] }
 0x3fd   : > { %v4511_v0 = vpop.f32.mrf.mxu1  ;;  %v2643_v33 = vadd.f32 %v8582_v10, %v7794_v61  ;;  %v4024_v17 = vadd.f32 %v8584_v44, %v3708_v37  ;;  %v2704_v5 = vmax.f32 %v2646_v29, 0.0  ;;  %v3722_v62 = vadd.f32 %v8586_v63, %v3435_v16  ;;  %v8597_v16 = vld [vmem:[#allocation81_spill] sm:$0xff]  ;;  %v8600_v20 = vld [vmem:[#allocation84_spill] sm:$0xff]  ;;  %v8604_v63 = vld [vmem:[#allocation86_spill] sm:$0xff] }
 0x3fe   : > { %4642 = vst.msk [vmem:[%s7830_s8 + $0x80] sm:$0xff] %vm4625_vm6, %v4609_v25  ;;  %v4612_v40 = vadd.f32 %v4518_v30, %v2700_v54  ;;  %v4512_v45 = vadd.f32 %v4511_v0, %v4254_v1  ;;  %v8585_v54 = vld [vmem:[#allocation31_spill] sm:$0xff]  ;;  %v4278_v21 = vadd.f32 %v7953_v4, %v4000_v13  ;;  %v4016_v26 = vadd.f32 %v8587_v47, %v3701_v51  ;;  %v8589_v25 = vld [vmem:[#allocation78_spill] sm:$0xff]  ;;  %v8590_v30 = vld [vmem:[#allocation77_spill] sm:$0xff] }
 0x3ff   : > { %v5344_v52 = vpop.f32.mrf.mxu1  ;;  %v2654_v7 = vadd.f32 %v7794_v61, %v8585_v54  ;;  %v2703_v1 = vmax.f32 %v2643_v33, 0.0  ;;  %v2651_v53 = vadd.f32 %v7794_v61, %v8588_v3  ;;  %v4296_v14 = vadd.f32 %v7973_v28, %v4024_v17  ;;  %v8599_v33 = vld [vmem:[#allocation35_spill] sm:$0xff]  ;;  %v8602_v17 = vld [vmem:[#allocation113_spill] sm:$0xff] }
 0x400   : > { %4645 = vst.msk [vmem:[%s7830_s8 + $0x98] sm:$0xff] %vm4625_vm6, %v4612_v40  ;;  %v4611_v42 = vadd.f32 %v4512_v45, %v2699_v9  ;;  %v4530_v55 = vadd.f32 %v5344_v52, %v4272_v32  ;;  %v3715_v9 = vadd.f32 %v8590_v30, %v8589_v25  ;;  %v4040_v4 = vadd.f32 %v8591_v56, %v3722_v62  ;;  %v8601_v51 = vld [vmem:[#allocation83_spill] sm:$0xff]  ;;  %v8603_v54 = vld [vmem:[#allocation33_spill] sm:$0xff] }
 0x401   : > { %v4523_v48 = vpop.f32.mrf.mxu1  ;;  %v2662_v0 = vadd.f32 %v8592_v46, %v7794_v61  ;;  %v2706_v32 = vmax.f32 %v2654_v7, 0.0  ;;  %v3736_v40 = vadd.f32 %v8594_v2, %v8593_v39  ;;  %v4290_v31 = vadd.f32 %v7993_v58, %v4016_v26  ;;  %v8605_v62 = vld [vmem:[#allocation85_spill] sm:$0xff] }
 0x402   : > { %4644 = vst.msk [vmem:[%s7830_s8 + $0x90] sm:$0xff] %vm4625_vm6, %v4611_v42  ;;  %v4614_v19 = vadd.f32 %v4530_v55, %v2702_v6  ;;  %v4524_v11 = vadd.f32 %v4523_v48, %v4266_v8  ;;  %v4032_v29 = vadd.f32 %v7778_v35, %v3715_v9  ;;  %v2659_v37 = vadd.f32 %v8595_v43, %v7794_v61  ;;  %v4313_v8 = vpop.f32.mrf.mxu0  ;;  %v8598_v42 = vld [vmem:[#allocation112_spill] sm:$0xff] }
 0x403   : > { %v5347_v41 = vpop.f32.mrf.mxu1  ;;  %v2705_v36 = vmax.f32 %v2651_v53, 0.0  ;;  %v3729_v52 = vadd.f32 %v8597_v16, %v8596_v27  ;;  %v4308_v13 = vadd.f32 %v5303_v23, %v4040_v4  ;;  %v4056_v55 = vadd.f32 %v8598_v42, %v3736_v40 }
 0x404   : > { %4647 = vst.msk [vmem:[%s7830_s8 + $0xa8] sm:$0xff] %vm4625_vm6, %v4614_v19  ;;  %v4613_v34 = vadd.f32 %v4524_v11, %v2701_v24  ;;  %v4542_v38 = vadd.f32 %v5347_v41, %v4284_v60  ;;  %v2708_v10 = vmax.f32 %v2662_v0, 0.0  ;;  %v2670_v24 = vadd.f32 %v7794_v61, %v8599_v33 }
 0x405   : > { %v4535_v59 = vpop.f32.mrf.mxu1  ;;  %v3750_v48 = vadd.f32 %v8601_v51, %v8600_v20  ;;  %v4302_v44 = vadd.f32 %v4301_v22, %v4032_v29  ;;  %v4048_v19 = vadd.f32 %v8602_v17, %v3729_v52  ;;  %v2667_v7 = vadd.f32 %v7794_v61, %v8603_v54 }
 0x406   : > { %4646 = vst.msk [vmem:[%s7830_s8 + $0xa0] sm:$0xff] %vm4625_vm6, %v4613_v34  ;;  %v4616_v49 = vadd.f32 %v4542_v38, %v2704_v5  ;;  %v4536_v15 = vadd.f32 %v4535_v59, %v4278_v21  ;;  %v2707_v5 = vmax.f32 %v2659_v37, 0.0  ;;  %v3743_v41 = vadd.f32 %v8605_v62, %v8604_v63  ;;  %v5309_v21 = vpop.f32.mrf.mxu0 }
 0x407   : > { %v5350_v45 = vpop.f32.mrf.mxu1  ;;  %v4320_v26 = vadd.f32 %v5306_v18, %v4056_v55  ;;  %v4072_v34 = vadd.f32 %v7801_v12, %v3750_v48  ;;  %v2710_v53 = vmax.f32 %v2670_v24, 0.0  ;;  %v4314_v30 = vadd.f32 %v4313_v8, %v4048_v19  ;;  %v8607_v12 = vld [vmem:[#allocation32_spill] sm:$0xff] }
 0x408   : > { %4649 = vst.msk [vmem:[%s7830_s8 + $0xb8] sm:$0xff] %vm4625_vm6, %v4616_v49  ;;  %v4615_v28 = vadd.f32 %v4536_v15, %v2703_v1  ;;  %v4554_v6 = vadd.f32 %v5350_v45, %v4296_v14  ;;  %v8606_v1 = vld [vmem:[#allocation34_spill] sm:$0xff]  ;;  %v4064_v9 = vadd.f32 %v7812_v57, %v3743_v41  ;;  %v2675_v14 = vadd.f32 %v8607_v12, %v7794_v61  ;;  %v4325_v56 = vpop.f32.mrf.mxu0 }
 0x409   : > { %v4547_v50 = vpop.f32.mrf.mxu1  ;;  %v2678_v3 = vadd.f32 %v8606_v1, %v7794_v61  ;;  %v2709_v49 = vmax.f32 %v2667_v7, 0.0  ;;  %v4332_v15 = vadd.f32 %v5309_v21, %v4072_v34 }
 0x40a   : > { %4648 = vst.msk [vmem:[%s7830_s8 + $0xb0] sm:$0xff] %vm4625_vm6, %v4615_v28  ;;  %v4618_v35 = vadd.f32 %v4554_v6, %v2706_v32  ;;  %v4548_v58 = vadd.f32 %v4547_v50, %v4290_v31  ;;  %v4326_v39 = vadd.f32 %v4325_v56, %v4064_v9  ;;  %v2711_v61 = vmax.f32 %v2675_v14, 0.0 }
 0x40b   : > { %v5353_v60 = vpop.f32.mrf.mxu1  ;;  %v2712_v57 = vmax.f32 %v2678_v3, 0.0 }
 0x40c   : > { %4651 = vst.msk [vmem:[%s7830_s8 + $0xc8] sm:$0xff] %vm4625_vm6, %v4618_v35  ;;  %v4617_v23 = vadd.f32 %v4548_v58, %v2705_v36  ;;  %v4566_v11 = vadd.f32 %v5353_v60, %v4308_v13 }
 0x40d   : > { %v4559_v47 = vpop.f32.mrf.mxu1 }
 0x40e   : > { %4650 = vst.msk [vmem:[%s7830_s8 + $0xc0] sm:$0xff] %vm4625_vm6, %v4617_v23  ;;  %v4620_v22 = vadd.f32 %v4566_v11, %v2708_v10  ;;  %v4560_v38 = vadd.f32 %v4559_v47, %v4302_v44 }
 0x40f   : > { %v5356_v25 = vpop.f32.mrf.mxu1 }
 0x410   : > { %4653 = vst.msk [vmem:[%s7830_s8 + $0xd8] sm:$0xff] %vm4625_vm6, %v4620_v22  ;;  %v4619_v59 = vadd.f32 %v4560_v38, %v2707_v5  ;;  %v4578_v18 = vadd.f32 %v5356_v25, %v4320_v26 }
 0x411   : > { %v4571_v4 = vpop.f32.mrf.mxu1 }
 0x412   : > { %4652 = vst.msk [vmem:[%s7830_s8 + $0xd0] sm:$0xff] %vm4625_vm6, %v4619_v59  ;;  %v4622_v46 = vadd.f32 %v4578_v18, %v2710_v53  ;;  %v4572_v0 = vadd.f32 %v4571_v4, %v4314_v30 }
 0x413   : > { %v5359_v32 = vpop.f32.mrf.mxu1 }
 0x414   : > { %4655 = vst.msk [vmem:[%s7830_s8 + $0xe8] sm:$0xff] %vm4625_vm6, %v4622_v46  ;;  %v4621_v2 = vadd.f32 %v4572_v0, %v2709_v49  ;;  %v4590_v40 = vadd.f32 %v5359_v32, %v4332_v15 }
 0x415   : > { %v4583_v45 = vpop.f32.mrf.mxu1 }
 0x416   : > { %4654 = vst.msk [vmem:[%s7830_s8 + $0xe0] sm:$0xff] %vm4625_vm6, %v4621_v2  ;;  %v4624_v31 = vadd.f32 %v4590_v40, %v2712_v57  ;;  %v4584_v29 = vadd.f32 %v4583_v45, %v4326_v39 }
 0x418   : > { %4657 = vst.msk [vmem:[%s7830_s8 + $0xf8] sm:$0xff] %vm4625_vm6, %v4624_v31  ;;  %v4623_v28 = vadd.f32 %v4584_v29, %v2711_v61 }
 0x41a   : > { %4656 = vst.msk [vmem:[%s7830_s8 + $0xf0] sm:$0xff] %vm4625_vm6, %v4623_v28 }
 0x41b PF: > { %s17_s24 = sadd.s32 1, %s5379_s24  }
 0x41c   : > { %p14_p4 = scmp.ge.s32.totalorder %s17_s24, 4  }
 0x41e   :  { %16 = sbr.rel (!%p14_p4) target bundleno = 1 (0x1), region = 79 }

</bundles_post_ra>
